<compile_context>
chip_gen: v5e
topology: v5e:2x2
jax: 0.10.0
libtpu: 0.0.40
codegen_flags: <defaults>
</compile_context>

<pallas_src>
import math
import functools

import jax
import jax.numpy as jnp
from jax.experimental import pallas as pl
from jax.experimental.pallas import tpu as pltpu


# ----------------------------- fused kernel -----------------------------

def _layer_norm(x, g, b, eps):
    mu = jnp.mean(x, axis=-1, keepdims=True)
    var = jnp.mean((x - mu) ** 2, axis=-1, keepdims=True)
    return (x - mu) * jax.lax.rsqrt(var + eps) * g + b


def _fused_model_kernel(
    emb_ref, h0_ref, c0_ref,
    wih_ref, whh_ref, lb_ref,
    fcw1_ref, fcw2_ref, fcb_ref, pe_ref, mask_ref,
    inw_ref, inb_ref, outw_ref, outb_ref,
    l1w_ref, l1b_ref, l2w_ref, l2b_ref,
    ln1g_ref, ln1b_ref, ln2g_ref, ln2b_ref,
    decw_ref, decb_ref,
    out_ref,
    lstm_y,
    *, seq_len, d_model, nhead, nlayers, scale, eps):
    """One grid step == one batch element. All activations stay in VMEM."""
    f32 = jnp.float32
    emb = emb_ref[0]          # (S, D) embeddings for this batch element
    h0 = h0_ref[0]            # (L, H)
    c0 = c0_ref[0]            # (L, H)

    # ---------------- LSTM stack ----------------
    # Input projection for all timesteps is hoisted off the serial path; weights
    # are stored per-gate so the recurrence never lane-slices a fused gate vec.
    x = emb
    for l in range(nlayers):
        gx = [jnp.dot(x, wih_ref[4 * l + k], preferred_element_type=f32)
              + lb_ref[4 * l + k] for k in range(4)]          # 4 x (S, H)
        h = h0[l:l + 1, :]                                    # (1, H)
        c = c0[l:l + 1, :]
        for t in range(seq_len):                              # statically unrolled
            i_g = jax.nn.sigmoid(
                gx[0][t:t + 1, :]
                + jnp.dot(h, whh_ref[4 * l + 0], preferred_element_type=f32))
            f_g = jax.nn.sigmoid(
                gx[1][t:t + 1, :]
                + jnp.dot(h, whh_ref[4 * l + 1], preferred_element_type=f32))
            g_g = jnp.tanh(
                gx[2][t:t + 1, :]
                + jnp.dot(h, whh_ref[4 * l + 2], preferred_element_type=f32))
            o_g = jax.nn.sigmoid(
                gx[3][t:t + 1, :]
                + jnp.dot(h, whh_ref[4 * l + 3], preferred_element_type=f32))
            c = f_g * c + i_g * g_g
            h = o_g * jnp.tanh(c)
            lstm_y[t:t + 1, :] = h
        x = lstm_y[...]                                       # (S, H) next layer input
    lstm_out = x

    # -------- src = pos_encoder(relu(fc(cat(lstm_out, emb*sqrt(D))))) --------
    # fc weight is split along its input dim, so the concat is never materialized.
    src2 = emb * math.sqrt(d_model)
    src = (jnp.dot(lstm_out, fcw1_ref[...], preferred_element_type=f32)
           + jnp.dot(src2, fcw2_ref[...], preferred_element_type=f32)
           + fcb_ref[...])
    xq = jnp.maximum(src, 0.0) + pe_ref[...]                  # (S, D)

    # ---------------- transformer encoder layers (post-LN) ----------------
    mask = mask_ref[...]
    hd = d_model // nhead
    for l in range(nlayers):
        qkv = jnp.dot(xq, inw_ref[l], preferred_element_type=f32) + inb_ref[l]
        q = qkv[:, 0:d_model]
        k = qkv[:, d_model:2 * d_model]
        v = qkv[:, 2 * d_model:3 * d_model]
        out_w = outw_ref[l]                                   # (D, D)
        attn = outb_ref[l]                                    # (1, D) -> broadcasts
        for hh in range(nhead):
            sl = slice(hh * hd, (hh + 1) * hd)
            s = jax.lax.dot_general(q[:, sl], k[:, sl],
                                    (((1,), (1,)), ((), ())),
                                    preferred_element_type=f32) * scale + mask
            m = jnp.max(s, axis=-1, keepdims=True)
            p = jnp.exp(s - m)
            p = p * pl.reciprocal(jnp.sum(p, axis=-1, keepdims=True), approx=True)
            o_h = jnp.dot(p, v[:, sl], preferred_element_type=f32)      # (S, hd)
            # fold the head back in by multiplying with the matching out_proj rows
            attn = attn + jnp.dot(o_h, out_w[sl, :], preferred_element_type=f32)
        xq = _layer_norm(xq + attn, ln1g_ref[l], ln1b_ref[l], eps)
        ff = jnp.maximum(jnp.dot(xq, l1w_ref[l], preferred_element_type=f32)
                         + l1b_ref[l], 0.0)
        ff = jnp.dot(ff, l2w_ref[l], preferred_element_type=f32) + l2b_ref[l]
        xq = _layer_norm(xq + ff, ln2g_ref[l], ln2b_ref[l], eps)

    # ---------------- decoder + log_softmax (lane-padded to 128) ----------------
    logits = jnp.dot(xq, decw_ref[...], preferred_element_type=f32) + decb_ref[...]
    m = jnp.max(logits, axis=-1, keepdims=True)
    sft = logits - m
    lse = jnp.log(jnp.sum(jnp.exp(sft), axis=-1, keepdims=True))
    out_ref[0] = sft - lse


# ----------------------------- parameter setup -----------------------------

def init_params(key, ntoken, ninp, nhead, nhid, nlayers, max_len=128):
    assert ninp == nhid, "model only type-checks when ninp == nhid"
    assert ninp % nhead == 0
    D, H = ninp, nhid
    keys = iter(jax.random.split(key, 128))

    def unif(shape, a):
        return jax.random.uniform(next(keys), shape, jnp.float32, -a, a)

    p = {}
    initrange = 0.1
    p["emb"] = unif((ntoken, D), initrange)                    # nn.Embedding

    # decoder Linear(ninp, ntoken): lane-pad logits to a multiple of 128.
    n_pad = max(128, ((ntoken + 127) // 128) * 128)
    dec_w = unif((ntoken, D), initrange)
    p["dec_w_t"] = jnp.zeros((D, n_pad), jnp.float32).at[:, :ntoken].set(dec_w.T)
    p["dec_b"] = jnp.full((1, n_pad), -1e30, jnp.float32).at[:, :ntoken].set(0.0)

    # LSTM stack, gate order (i, f, g, o); weights stored per-gate, transposed.
    stdv = 1.0 / math.sqrt(H)
    wih, whh, lb = [], [], []
    for l in range(nlayers):
        din = D if l == 0 else H
        w_ih = unif((4 * H, din), stdv)
        w_hh = unif((4 * H, H), stdv)
        bias = unif((4 * H,), stdv) + unif((4 * H,), stdv)     # b_ih + b_hh
        for k in range(4):
            wih.append(w_ih[k * H:(k + 1) * H, :].T)           # (D, H)
            whh.append(w_hh[k * H:(k + 1) * H, :].T)           # (H, H)
            lb.append(bias[k * H:(k + 1) * H][None, :])        # (1, H)
    p["lstm_wih"] = jnp.stack(wih)                             # (L*4, D, H)
    p["lstm_whh"] = jnp.stack(whh)                             # (L*4, H, H)
    p["lstm_b"] = jnp.stack(lb)                                # (L*4, 1, H)

    # fc: Linear(2*nhid, nhid), split along its (concat) input dim.
    a = 1.0 / math.sqrt(2 * H)
    fc_w = unif((H, 2 * H), a)
    p["fc_w1_t"] = fc_w[:, :H].T                               # multiplies src1
    p["fc_w2_t"] = fc_w[:, H:].T                               # multiplies src2
    p["fc_b"] = unif((H,), a)[None, :]

    # sinusoidal positional encoding table
    position = jnp.arange(max_len, dtype=jnp.float32)[:, None]
    div_term = jnp.exp(jnp.arange(0, D, 2, dtype=jnp.float32)
                       * (-math.log(10000.0) / D))
    pe = jnp.zeros((max_len, D), jnp.float32)
    pe = pe.at[:, 0::2].set(jnp.sin(position * div_term))
    pe = pe.at[:, 1::2].set(jnp.cos(position * div_term))
    p["pe"] = pe

    # TransformerEncoder layers (post-LN, relu FFN, dim_feedforward = nhid)
    xa = 1.0 / math.sqrt(D)
    in_w, out_w, l1_w, l2_w = [], [], [], []
    for _ in range(nlayers):
        in_w.append(unif((3 * D, D), xa).T)                    # (D, 3D)
        out_w.append(unif((D, D), xa).T)                       # (D, D)
        l1_w.append(unif((H, D), xa).T)                        # (D, H)
        l2_w.append(unif((D, H), 1.0 / math.sqrt(H)).T)        # (H, D)
    zeros = lambda cols: jnp.zeros((nlayers, 1, cols), jnp.float32)
    p["in_w_t"] = jnp.stack(in_w);   p["in_b"] = zeros(3 * D)
    p["out_w_t"] = jnp.stack(out_w); p["out_b"] = zeros(D)
    p["l1_w_t"] = jnp.stack(l1_w);   p["l1_b"] = zeros(H)
    p["l2_w_t"] = jnp.stack(l2_w);   p["l2_b"] = zeros(D)
    p["ln1_g"] = jnp.ones((nlayers, 1, D), jnp.float32); p["ln1_b"] = zeros(D)
    p["ln2_g"] = jnp.ones((nlayers, 1, D), jnp.float32); p["ln2_b"] = zeros(D)
    return p


# ----------------------------- forward pass -----------------------------

def mem_transformer_forward(params, tokens, h0, c0, *, nhead):
    S, B = tokens.shape
    ntoken, D = params["emb"].shape
    H = D
    L = h0.shape[0]
    n_pad = params["dec_w_t"].shape[1]
    scale = 1.0 / math.sqrt(D // nhead)

    # Embedding gather + layout glue stay in plain JAX (tiny tensors).
    # TODO(synk): token-indexed gather has no clean Pallas equivalent at this size.
    emb = params["emb"][tokens]                    # (S, B, D)
    emb_b = jnp.transpose(emb, (1, 0, 2))          # (B, S, D)
    h0_b = jnp.transpose(h0, (1, 0, 2))            # (B, L, H)
    c0_b = jnp.transpose(c0, (1, 0, 2))
    pe = params["pe"][:S]                          # (S, D)
    causal = jnp.tril(jnp.ones((S, S), dtype=bool))
    mask = jnp.where(causal, 0.0, -1e30).astype(jnp.float32)   # finite "−inf"

    def c2(shape):
        return pl.BlockSpec(shape, lambda b: (0, 0))

    def c3(shape):
        return pl.BlockSpec(shape, lambda b: (0, 0, 0))

    in_specs = [
        pl.BlockSpec((1, S, D), lambda b: (b, 0, 0)),          # emb
        pl.BlockSpec((1, L, H), lambda b: (b, 0, 0)),          # h0
        pl.BlockSpec((1, L, H), lambda b: (b, 0, 0)),          # c0
        c3((L * 4, D, H)), c3((L * 4, H, H)), c3((L * 4, 1, H)),   # lstm
        c2((H, H)), c2((D, H)), c2((1, H)),                    # fc split + bias
        c2((S, D)), c2((S, S)),                                # pe, mask
        c3((L, D, 3 * D)), c3((L, 1, 3 * D)),                  # attn in_proj
        c3((L, D, D)), c3((L, 1, D)),                          # attn out_proj
        c3((L, D, H)), c3((L, 1, H)),                          # ffn linear1
        c3((L, H, D)), c3((L, 1, D)),                          # ffn linear2
        c3((L, 1, D)), c3((L, 1, D)), c3((L, 1, D)), c3((L, 1, D)),  # ln1/ln2
        c2((D, n_pad)), c2((1, n_pad)),                        # decoder
    ]

    kernel = functools.partial(
        _fused_model_kernel, seq_len=S, d_model=D, nhead=nhead, nlayers=L,
        scale=scale, eps=1e-5)

    out = pl.pallas_call(
        kernel,
        grid=(B,),
        in_specs=in_specs,
        out_specs=pl.BlockSpec((1, S, n_pad), lambda b: (b, 0, 0)),
        out_shape=jax.ShapeDtypeStruct((B, S, n_pad), jnp.float32),
        scratch_shapes=[pltpu.VMEM((S, H), jnp.float32)],
        compiler_params=pltpu.CompilerParams(
            dimension_semantics=("parallel",)),     # v7x: one batch elem per core
    )(emb_b, h0_b, c0_b,
      params["lstm_wih"], params["lstm_whh"], params["lstm_b"],
      params["fc_w1_t"], params["fc_w2_t"], params["fc_b"], pe, mask,
      params["in_w_t"], params["in_b"], params["out_w_t"], params["out_b"],
      params["l1_w_t"], params["l1_b"], params["l2_w_t"], params["l2_b"],
      params["ln1_g"], params["ln1_b"], params["ln2_g"], params["ln2_b"],
      params["dec_w_t"], params["dec_b"])

    logp = out[:, :, :ntoken]                      # drop lane padding
    return jnp.transpose(logp, (1, 0, 2))          # (S, B, ntoken)


# ----------------------------- main -----------------------------

if __name__ == "__main__":
    ntoken, ninp, nhead, nhid, nlayers = 64, 32, 2, 32, 2
    S, B = 8, 2

    key = jax.random.PRNGKey(0)
    kp, kt = jax.random.split(key)
    params = init_params(kp, ntoken, ninp, nhead, nhid, nlayers)

    tokens = jax.random.randint(kt, (S, B), 0, ntoken, dtype=jnp.int32)
    h0 = jnp.zeros((nlayers, B, nhid), jnp.float32)   # init_hidden
    c0 = jnp.zeros((nlayers, B, nhid), jnp.float32)

    fwd = jax.jit(functools.partial(mem_transformer_forward, nhead=nhead))
    out = jax.block_until_ready(fwd(params, tokens, h0, c0))

    assert out.shape == (S, B, ntoken)
    assert bool(jnp.all(jnp.isfinite(out)))
    # log_softmax rows must sum to ~1 in prob space
    assert bool(jnp.allclose(jnp.sum(jnp.exp(out), axis=-1), 1.0, atol=1e-3))
    print("KERNEL_OK")
</pallas_src>

<mosaic_0001>
module attributes {stable_mosaic.version = 11 : i64} {
  func.func @_fused_model_kernel(%arg0: i32, %arg1: memref<1x8x32xf32, #tpu.memory_space<vmem>>, %arg2: memref<1x2x32xf32, #tpu.memory_space<vmem>>, %arg3: memref<1x2x32xf32, #tpu.memory_space<vmem>>, %arg4: memref<8x32x32xf32, #tpu.memory_space<vmem>>, %arg5: memref<8x32x32xf32, #tpu.memory_space<vmem>>, %arg6: memref<8x1x32xf32, #tpu.memory_space<vmem>>, %arg7: memref<32x32xf32, #tpu.memory_space<vmem>>, %arg8: memref<32x32xf32, #tpu.memory_space<vmem>>, %arg9: memref<1x32xf32, #tpu.memory_space<vmem>>, %arg10: memref<8x32xf32, #tpu.memory_space<vmem>>, %arg11: memref<8x8xf32, #tpu.memory_space<vmem>>, %arg12: memref<2x32x96xf32, #tpu.memory_space<vmem>>, %arg13: memref<2x1x96xf32, #tpu.memory_space<vmem>>, %arg14: memref<2x32x32xf32, #tpu.memory_space<vmem>>, %arg15: memref<2x1x32xf32, #tpu.memory_space<vmem>>, %arg16: memref<2x32x32xf32, #tpu.memory_space<vmem>>, %arg17: memref<2x1x32xf32, #tpu.memory_space<vmem>>, %arg18: memref<2x32x32xf32, #tpu.memory_space<vmem>>, %arg19: memref<2x1x32xf32, #tpu.memory_space<vmem>>, %arg20: memref<2x1x32xf32, #tpu.memory_space<vmem>>, %arg21: memref<2x1x32xf32, #tpu.memory_space<vmem>>, %arg22: memref<2x1x32xf32, #tpu.memory_space<vmem>>, %arg23: memref<2x1x32xf32, #tpu.memory_space<vmem>>, %arg24: memref<32x128xf32, #tpu.memory_space<vmem>>, %arg25: memref<1x128xf32, #tpu.memory_space<vmem>>, %arg26: memref<1x8x128xf32, #tpu.memory_space<vmem>>, %arg27: memref<8x32xf32, #tpu.memory_space<vmem>>) attributes {dimension_semantics = [#tpu.dimension_semantics<parallel>], iteration_bounds = array<i64: 2>, scalar_prefetch = 0 : i64, scratch_operands = 1 : i64, tpu.core_type = #tpu.core_type<tc>, window_params = [{transform_indices = @transform_0, window_bounds = array<i64: 1, 8, 32>}, {transform_indices = @transform_1, window_bounds = array<i64: 1, 2, 32>}, {transform_indices = @transform_2, window_bounds = array<i64: 1, 2, 32>}, {pipeline_mode = #tpu.pipeline_mode<synchronous>, transform_indices = @transform_3, window_bounds = array<i64: 8, 32, 32>}, {pipeline_mode = #tpu.pipeline_mode<synchronous>, transform_indices = @transform_4, window_bounds = array<i64: 8, 32, 32>}, {pipeline_mode = #tpu.pipeline_mode<synchronous>, transform_indices = @transform_5, window_bounds = array<i64: 8, 1, 32>}, {pipeline_mode = #tpu.pipeline_mode<synchronous>, transform_indices = @transform_6, window_bounds = array<i64: 32, 32>}, {pipeline_mode = #tpu.pipeline_mode<synchronous>, transform_indices = @transform_7, window_bounds = array<i64: 32, 32>}, {pipeline_mode = #tpu.pipeline_mode<synchronous>, transform_indices = @transform_8, window_bounds = array<i64: 1, 32>}, {pipeline_mode = #tpu.pipeline_mode<synchronous>, transform_indices = @transform_9, window_bounds = array<i64: 8, 32>}, {pipeline_mode = #tpu.pipeline_mode<synchronous>, transform_indices = @transform_10, window_bounds = array<i64: 8, 8>}, {pipeline_mode = #tpu.pipeline_mode<synchronous>, transform_indices = @transform_11, window_bounds = array<i64: 2, 32, 96>}, {pipeline_mode = #tpu.pipeline_mode<synchronous>, transform_indices = @transform_12, window_bounds = array<i64: 2, 1, 96>}, {pipeline_mode = #tpu.pipeline_mode<synchronous>, transform_indices = @transform_13, window_bounds = array<i64: 2, 32, 32>}, {pipeline_mode = #tpu.pipeline_mode<synchronous>, transform_indices = @transform_14, window_bounds = array<i64: 2, 1, 32>}, {pipeline_mode = #tpu.pipeline_mode<synchronous>, transform_indices = @transform_15, window_bounds = array<i64: 2, 32, 32>}, {pipeline_mode = #tpu.pipeline_mode<synchronous>, transform_indices = @transform_16, window_bounds = array<i64: 2, 1, 32>}, {pipeline_mode = #tpu.pipeline_mode<synchronous>, transform_indices = @transform_17, window_bounds = array<i64: 2, 32, 32>}, {pipeline_mode = #tpu.pipeline_mode<synchronous>, transform_indices = @transform_18, window_bounds = array<i64: 2, 1, 32>}, {pipeline_mode = #tpu.pipeline_mode<synchronous>, transform_indices = @transform_19, window_bounds = array<i64: 2, 1, 32>}, {pipeline_mode = #tpu.pipeline_mode<synchronous>, transform_indices = @transform_20, window_bounds = array<i64: 2, 1, 32>}, {pipeline_mode = #tpu.pipeline_mode<synchronous>, transform_indices = @transform_21, window_bounds = array<i64: 2, 1, 32>}, {pipeline_mode = #tpu.pipeline_mode<synchronous>, transform_indices = @transform_22, window_bounds = array<i64: 2, 1, 32>}, {pipeline_mode = #tpu.pipeline_mode<synchronous>, transform_indices = @transform_23, window_bounds = array<i64: 32, 128>}, {pipeline_mode = #tpu.pipeline_mode<synchronous>, transform_indices = @transform_24, window_bounds = array<i64: 1, 128>}, {transform_indices = @transform_25, window_bounds = array<i64: 1, 8, 128>}]} {
    %c0 = arith.constant 0 : index
    %c0_0 = arith.constant 0 : index
    %c0_1 = arith.constant 0 : index
    %0 = vector.load %arg1[%c0, %c0_0, %c0_1] : memref<1x8x32xf32, #tpu.memory_space<vmem>>, vector<1x8x32xf32>
    %1 = vector.shape_cast %0 : vector<1x8x32xf32> to vector<8x32xf32>
    %c0_2 = arith.constant 0 : index
    %c0_3 = arith.constant 0 : index
    %c0_4 = arith.constant 0 : index
    %2 = vector.load %arg2[%c0_2, %c0_3, %c0_4] : memref<1x2x32xf32, #tpu.memory_space<vmem>>, vector<1x2x32xf32>
    %3 = vector.shape_cast %2 : vector<1x2x32xf32> to vector<2x32xf32>
    %c0_5 = arith.constant 0 : index
    %c0_6 = arith.constant 0 : index
    %c0_7 = arith.constant 0 : index
    %4 = vector.load %arg3[%c0_5, %c0_6, %c0_7] : memref<1x2x32xf32, #tpu.memory_space<vmem>>, vector<1x2x32xf32>
    %5 = vector.shape_cast %4 : vector<1x2x32xf32> to vector<2x32xf32>
    %c0_8 = arith.constant 0 : index
    %c0_9 = arith.constant 0 : index
    %c0_10 = arith.constant 0 : index
    %6 = vector.load %arg4[%c0_8, %c0_9, %c0_10] : memref<8x32x32xf32, #tpu.memory_space<vmem>>, vector<1x32x32xf32>
    %7 = vector.shape_cast %6 : vector<1x32x32xf32> to vector<32x32xf32>
    %cst = arith.constant dense<0.000000e+00> : vector<8x32xf32>
    %8 = tpu.matmul %1, %7, %cst {dimension_numbers = #tpu.dot_dimension_numbers<[1], [0], [0], [1], [0, 0, 1, 1], [], []>} : vector<8x32xf32>, vector<32x32xf32>, vector<8x32xf32> -> vector<8x32xf32>
    %c0_11 = arith.constant 0 : index
    %c0_12 = arith.constant 0 : index
    %c0_13 = arith.constant 0 : index
    %9 = vector.load %arg6[%c0_11, %c0_12, %c0_13] : memref<8x1x32xf32, #tpu.memory_space<vmem>>, vector<1x1x32xf32>
    %10 = vector.shape_cast %9 : vector<1x1x32xf32> to vector<1x32xf32>
    %11 = vector.broadcast %10 : vector<1x32xf32> to vector<8x32xf32>
    %12 = arith.addf %8, %11 : vector<8x32xf32>
    %c1 = arith.constant 1 : index
    %c0_14 = arith.constant 0 : index
    %c0_15 = arith.constant 0 : index
    %13 = vector.load %arg4[%c1, %c0_14, %c0_15] : memref<8x32x32xf32, #tpu.memory_space<vmem>>, vector<1x32x32xf32>
    %14 = vector.shape_cast %13 : vector<1x32x32xf32> to vector<32x32xf32>
    %cst_16 = arith.constant dense<0.000000e+00> : vector<8x32xf32>
    %15 = tpu.matmul %1, %14, %cst_16 {dimension_numbers = #tpu.dot_dimension_numbers<[1], [0], [0], [1], [0, 0, 1, 1], [], []>} : vector<8x32xf32>, vector<32x32xf32>, vector<8x32xf32> -> vector<8x32xf32>
    %c1_17 = arith.constant 1 : index
    %c0_18 = arith.constant 0 : index
    %c0_19 = arith.constant 0 : index
    %16 = vector.load %arg6[%c1_17, %c0_18, %c0_19] : memref<8x1x32xf32, #tpu.memory_space<vmem>>, vector<1x1x32xf32>
    %17 = vector.shape_cast %16 : vector<1x1x32xf32> to vector<1x32xf32>
    %18 = vector.broadcast %17 : vector<1x32xf32> to vector<8x32xf32>
    %19 = arith.addf %15, %18 : vector<8x32xf32>
    %c2 = arith.constant 2 : index
    %c0_20 = arith.constant 0 : index
    %c0_21 = arith.constant 0 : index
    %20 = vector.load %arg4[%c2, %c0_20, %c0_21] : memref<8x32x32xf32, #tpu.memory_space<vmem>>, vector<1x32x32xf32>
    %21 = vector.shape_cast %20 : vector<1x32x32xf32> to vector<32x32xf32>
    %cst_22 = arith.constant dense<0.000000e+00> : vector<8x32xf32>
    %22 = tpu.matmul %1, %21, %cst_22 {dimension_numbers = #tpu.dot_dimension_numbers<[1], [0], [0], [1], [0, 0, 1, 1], [], []>} : vector<8x32xf32>, vector<32x32xf32>, vector<8x32xf32> -> vector<8x32xf32>
    %c2_23 = arith.constant 2 : index
    %c0_24 = arith.constant 0 : index
    %c0_25 = arith.constant 0 : index
    %23 = vector.load %arg6[%c2_23, %c0_24, %c0_25] : memref<8x1x32xf32, #tpu.memory_space<vmem>>, vector<1x1x32xf32>
    %24 = vector.shape_cast %23 : vector<1x1x32xf32> to vector<1x32xf32>
    %25 = vector.broadcast %24 : vector<1x32xf32> to vector<8x32xf32>
    %26 = arith.addf %22, %25 : vector<8x32xf32>
    %c3 = arith.constant 3 : index
    %c0_26 = arith.constant 0 : index
    %c0_27 = arith.constant 0 : index
    %27 = vector.load %arg4[%c3, %c0_26, %c0_27] : memref<8x32x32xf32, #tpu.memory_space<vmem>>, vector<1x32x32xf32>
    %28 = vector.shape_cast %27 : vector<1x32x32xf32> to vector<32x32xf32>
    %cst_28 = arith.constant dense<0.000000e+00> : vector<8x32xf32>
    %29 = tpu.matmul %1, %28, %cst_28 {dimension_numbers = #tpu.dot_dimension_numbers<[1], [0], [0], [1], [0, 0, 1, 1], [], []>} : vector<8x32xf32>, vector<32x32xf32>, vector<8x32xf32> -> vector<8x32xf32>
    %c3_29 = arith.constant 3 : index
    %c0_30 = arith.constant 0 : index
    %c0_31 = arith.constant 0 : index
    %30 = vector.load %arg6[%c3_29, %c0_30, %c0_31] : memref<8x1x32xf32, #tpu.memory_space<vmem>>, vector<1x1x32xf32>
    %31 = vector.shape_cast %30 : vector<1x1x32xf32> to vector<1x32xf32>
    %32 = vector.broadcast %31 : vector<1x32xf32> to vector<8x32xf32>
    %33 = arith.addf %29, %32 : vector<8x32xf32>
    %34 = vector.extract_strided_slice %3 {offsets = [0, 0], sizes = [1, 32], strides = [1, 1]} : vector<2x32xf32> to vector<1x32xf32>
    %35 = vector.extract_strided_slice %5 {offsets = [0, 0], sizes = [1, 32], strides = [1, 1]} : vector<2x32xf32> to vector<1x32xf32>
    %36 = vector.extract_strided_slice %12 {offsets = [0, 0], sizes = [1, 32], strides = [1, 1]} : vector<8x32xf32> to vector<1x32xf32>
    %c0_32 = arith.constant 0 : index
    %c0_33 = arith.constant 0 : index
    %c0_34 = arith.constant 0 : index
    %37 = vector.load %arg5[%c0_32, %c0_33, %c0_34] : memref<8x32x32xf32, #tpu.memory_space<vmem>>, vector<1x32x32xf32>
    %38 = vector.shape_cast %37 : vector<1x32x32xf32> to vector<32x32xf32>
    %cst_35 = arith.constant dense<0.000000e+00> : vector<1x32xf32>
    %39 = tpu.matmul %34, %38, %cst_35 {dimension_numbers = #tpu.dot_dimension_numbers<[1], [0], [0], [1], [0, 0, 1, 1], [], []>} : vector<1x32xf32>, vector<32x32xf32>, vector<1x32xf32> -> vector<1x32xf32>
    %40 = arith.addf %36, %39 : vector<1x32xf32>
    %41 = arith.negf %40 : vector<1x32xf32>
    %42 = math.exp %41 : vector<1x32xf32>
    %cst_36 = arith.constant 1.000000e+00 : f32
    %43 = vector.broadcast %cst_36 : f32 to vector<1x32xf32>
    %44 = arith.addf %43, %42 : vector<1x32xf32>
    %45 = arith.divf %43, %44 : vector<1x32xf32>
    %46 = vector.extract_strided_slice %19 {offsets = [0, 0], sizes = [1, 32], strides = [1, 1]} : vector<8x32xf32> to vector<1x32xf32>
    %c1_37 = arith.constant 1 : index
    %c0_38 = arith.constant 0 : index
    %c0_39 = arith.constant 0 : index
    %47 = vector.load %arg5[%c1_37, %c0_38, %c0_39] : memref<8x32x32xf32, #tpu.memory_space<vmem>>, vector<1x32x32xf32>
    %48 = vector.shape_cast %47 : vector<1x32x32xf32> to vector<32x32xf32>
    %cst_40 = arith.constant dense<0.000000e+00> : vector<1x32xf32>
    %49 = tpu.matmul %34, %48, %cst_40 {dimension_numbers = #tpu.dot_dimension_numbers<[1], [0], [0], [1], [0, 0, 1, 1], [], []>} : vector<1x32xf32>, vector<32x32xf32>, vector<1x32xf32> -> vector<1x32xf32>
    %50 = arith.addf %46, %49 : vector<1x32xf32>
    %51 = arith.negf %50 : vector<1x32xf32>
    %52 = math.exp %51 : vector<1x32xf32>
    %cst_41 = arith.constant 1.000000e+00 : f32
    %53 = vector.broadcast %cst_41 : f32 to vector<1x32xf32>
    %54 = arith.addf %53, %52 : vector<1x32xf32>
    %55 = arith.divf %53, %54 : vector<1x32xf32>
    %56 = vector.extract_strided_slice %26 {offsets = [0, 0], sizes = [1, 32], strides = [1, 1]} : vector<8x32xf32> to vector<1x32xf32>
    %c2_42 = arith.constant 2 : index
    %c0_43 = arith.constant 0 : index
    %c0_44 = arith.constant 0 : index
    %57 = vector.load %arg5[%c2_42, %c0_43, %c0_44] : memref<8x32x32xf32, #tpu.memory_space<vmem>>, vector<1x32x32xf32>
    %58 = vector.shape_cast %57 : vector<1x32x32xf32> to vector<32x32xf32>
    %cst_45 = arith.constant dense<0.000000e+00> : vector<1x32xf32>
    %59 = tpu.matmul %34, %58, %cst_45 {dimension_numbers = #tpu.dot_dimension_numbers<[1], [0], [0], [1], [0, 0, 1, 1], [], []>} : vector<1x32xf32>, vector<32x32xf32>, vector<1x32xf32> -> vector<1x32xf32>
    %60 = arith.addf %56, %59 : vector<1x32xf32>
    %61 = math.tanh %60 : vector<1x32xf32>
    %62 = vector.extract_strided_slice %33 {offsets = [0, 0], sizes = [1, 32], strides = [1, 1]} : vector<8x32xf32> to vector<1x32xf32>
    %c3_46 = arith.constant 3 : index
    %c0_47 = arith.constant 0 : index
    %c0_48 = arith.constant 0 : index
    %63 = vector.load %arg5[%c3_46, %c0_47, %c0_48] : memref<8x32x32xf32, #tpu.memory_space<vmem>>, vector<1x32x32xf32>
    %64 = vector.shape_cast %63 : vector<1x32x32xf32> to vector<32x32xf32>
    %cst_49 = arith.constant dense<0.000000e+00> : vector<1x32xf32>
    %65 = tpu.matmul %34, %64, %cst_49 {dimension_numbers = #tpu.dot_dimension_numbers<[1], [0], [0], [1], [0, 0, 1, 1], [], []>} : vector<1x32xf32>, vector<32x32xf32>, vector<1x32xf32> -> vector<1x32xf32>
    %66 = arith.addf %62, %65 : vector<1x32xf32>
    %67 = arith.negf %66 : vector<1x32xf32>
    %68 = math.exp %67 : vector<1x32xf32>
    %cst_50 = arith.constant 1.000000e+00 : f32
    %69 = vector.broadcast %cst_50 : f32 to vector<1x32xf32>
    %70 = arith.addf %69, %68 : vector<1x32xf32>
    %71 = arith.divf %69, %70 : vector<1x32xf32>
    %72 = arith.mulf %55, %35 : vector<1x32xf32>
    %73 = arith.mulf %45, %61 : vector<1x32xf32>
    %74 = arith.addf %72, %73 : vector<1x32xf32>
    %75 = math.tanh %74 : vector<1x32xf32>
    %76 = arith.mulf %71, %75 : vector<1x32xf32>
    %c0_51 = arith.constant 0 : index
    %c0_52 = arith.constant 0 : index
    %77 = vector.load %arg27[%c0_51, %c0_52] : memref<8x32xf32, #tpu.memory_space<vmem>>, vector<1x32xf32>
    tpu.vector_store %arg27[%c0_51, %c0_52], %76 {strides = array<i32>} : memref<8x32xf32, #tpu.memory_space<vmem>>, vector<1x32xf32>,
    %78 = vector.extract_strided_slice %12 {offsets = [1, 0], sizes = [1, 32], strides = [1, 1]} : vector<8x32xf32> to vector<1x32xf32>
    %c0_53 = arith.constant 0 : index
    %c0_54 = arith.constant 0 : index
    %c0_55 = arith.constant 0 : index
    %79 = vector.load %arg5[%c0_53, %c0_54, %c0_55] : memref<8x32x32xf32, #tpu.memory_space<vmem>>, vector<1x32x32xf32>
    %80 = vector.shape_cast %79 : vector<1x32x32xf32> to vector<32x32xf32>
    %cst_56 = arith.constant dense<0.000000e+00> : vector<1x32xf32>
    %81 = tpu.matmul %76, %80, %cst_56 {dimension_numbers = #tpu.dot_dimension_numbers<[1], [0], [0], [1], [0, 0, 1, 1], [], []>} : vector<1x32xf32>, vector<32x32xf32>, vector<1x32xf32> -> vector<1x32xf32>
    %82 = arith.addf %78, %81 : vector<1x32xf32>
    %83 = arith.negf %82 : vector<1x32xf32>
    %84 = math.exp %83 : vector<1x32xf32>
    %cst_57 = arith.constant 1.000000e+00 : f32
    %85 = vector.broadcast %cst_57 : f32 to vector<1x32xf32>
    %86 = arith.addf %85, %84 : vector<1x32xf32>
    %87 = arith.divf %85, %86 : vector<1x32xf32>
    %88 = vector.extract_strided_slice %19 {offsets = [1, 0], sizes = [1, 32], strides = [1, 1]} : vector<8x32xf32> to vector<1x32xf32>
    %c1_58 = arith.constant 1 : index
    %c0_59 = arith.constant 0 : index
    %c0_60 = arith.constant 0 : index
    %89 = vector.load %arg5[%c1_58, %c0_59, %c0_60] : memref<8x32x32xf32, #tpu.memory_space<vmem>>, vector<1x32x32xf32>
    %90 = vector.shape_cast %89 : vector<1x32x32xf32> to vector<32x32xf32>
    %cst_61 = arith.constant dense<0.000000e+00> : vector<1x32xf32>
    %91 = tpu.matmul %76, %90, %cst_61 {dimension_numbers = #tpu.dot_dimension_numbers<[1], [0], [0], [1], [0, 0, 1, 1], [], []>} : vector<1x32xf32>, vector<32x32xf32>, vector<1x32xf32> -> vector<1x32xf32>
    %92 = arith.addf %88, %91 : vector<1x32xf32>
    %93 = arith.negf %92 : vector<1x32xf32>
    %94 = math.exp %93 : vector<1x32xf32>
    %cst_62 = arith.constant 1.000000e+00 : f32
    %95 = vector.broadcast %cst_62 : f32 to vector<1x32xf32>
    %96 = arith.addf %95, %94 : vector<1x32xf32>
    %97 = arith.divf %95, %96 : vector<1x32xf32>
    %98 = vector.extract_strided_slice %26 {offsets = [1, 0], sizes = [1, 32], strides = [1, 1]} : vector<8x32xf32> to vector<1x32xf32>
    %c2_63 = arith.constant 2 : index
    %c0_64 = arith.constant 0 : index
    %c0_65 = arith.constant 0 : index
    %99 = vector.load %arg5[%c2_63, %c0_64, %c0_65] : memref<8x32x32xf32, #tpu.memory_space<vmem>>, vector<1x32x32xf32>
    %100 = vector.shape_cast %99 : vector<1x32x32xf32> to vector<32x32xf32>
    %cst_66 = arith.constant dense<0.000000e+00> : vector<1x32xf32>
    %101 = tpu.matmul %76, %100, %cst_66 {dimension_numbers = #tpu.dot_dimension_numbers<[1], [0], [0], [1], [0, 0, 1, 1], [], []>} : vector<1x32xf32>, vector<32x32xf32>, vector<1x32xf32> -> vector<1x32xf32>
    %102 = arith.addf %98, %101 : vector<1x32xf32>
    %103 = math.tanh %102 : vector<1x32xf32>
    %104 = vector.extract_strided_slice %33 {offsets = [1, 0], sizes = [1, 32], strides = [1, 1]} : vector<8x32xf32> to vector<1x32xf32>
    %c3_67 = arith.constant 3 : index
    %c0_68 = arith.constant 0 : index
    %c0_69 = arith.constant 0 : index
    %105 = vector.load %arg5[%c3_67, %c0_68, %c0_69] : memref<8x32x32xf32, #tpu.memory_space<vmem>>, vector<1x32x32xf32>
    %106 = vector.shape_cast %105 : vector<1x32x32xf32> to vector<32x32xf32>
    %cst_70 = arith.constant dense<0.000000e+00> : vector<1x32xf32>
    %107 = tpu.matmul %76, %106, %cst_70 {dimension_numbers = #tpu.dot_dimension_numbers<[1], [0], [0], [1], [0, 0, 1, 1], [], []>} : vector<1x32xf32>, vector<32x32xf32>, vector<1x32xf32> -> vector<1x32xf32>
    %108 = arith.addf %104, %107 : vector<1x32xf32>
    %109 = arith.negf %108 : vector<1x32xf32>
    %110 = math.exp %109 : vector<1x32xf32>
    %cst_71 = arith.constant 1.000000e+00 : f32
    %111 = vector.broadcast %cst_71 : f32 to vector<1x32xf32>
    %112 = arith.addf %111, %110 : vector<1x32xf32>
    %113 = arith.divf %111, %112 : vector<1x32xf32>
    %114 = arith.mulf %97, %74 : vector<1x32xf32>
    %115 = arith.mulf %87, %103 : vector<1x32xf32>
    %116 = arith.addf %114, %115 : vector<1x32xf32>
    %117 = math.tanh %116 : vector<1x32xf32>
    %118 = arith.mulf %113, %117 : vector<1x32xf32>
    %c1_72 = arith.constant 1 : index
    %c0_73 = arith.constant 0 : index
    %119 = vector.load %arg27[%c1_72, %c0_73] : memref<8x32xf32, #tpu.memory_space<vmem>>, vector<1x32xf32>
    tpu.vector_store %arg27[%c1_72, %c0_73], %118 {strides = array<i32>} : memref<8x32xf32, #tpu.memory_space<vmem>>, vector<1x32xf32>,
    %120 = vector.extract_strided_slice %12 {offsets = [2, 0], sizes = [1, 32], strides = [1, 1]} : vector<8x32xf32> to vector<1x32xf32>
    %c0_74 = arith.constant 0 : index
    %c0_75 = arith.constant 0 : index
    %c0_76 = arith.constant 0 : index
    %121 = vector.load %arg5[%c0_74, %c0_75, %c0_76] : memref<8x32x32xf32, #tpu.memory_space<vmem>>, vector<1x32x32xf32>
    %122 = vector.shape_cast %121 : vector<1x32x32xf32> to vector<32x32xf32>
    %cst_77 = arith.constant dense<0.000000e+00> : vector<1x32xf32>
    %123 = tpu.matmul %118, %122, %cst_77 {dimension_numbers = #tpu.dot_dimension_numbers<[1], [0], [0], [1], [0, 0, 1, 1], [], []>} : vector<1x32xf32>, vector<32x32xf32>, vector<1x32xf32> -> vector<1x32xf32>
    %124 = arith.addf %120, %123 : vector<1x32xf32>
    %125 = arith.negf %124 : vector<1x32xf32>
    %126 = math.exp %125 : vector<1x32xf32>
    %cst_78 = arith.constant 1.000000e+00 : f32
    %127 = vector.broadcast %cst_78 : f32 to vector<1x32xf32>
    %128 = arith.addf %127, %126 : vector<1x32xf32>
    %129 = arith.divf %127, %128 : vector<1x32xf32>
    %130 = vector.extract_strided_slice %19 {offsets = [2, 0], sizes = [1, 32], strides = [1, 1]} : vector<8x32xf32> to vector<1x32xf32>
    %c1_79 = arith.constant 1 : index
    %c0_80 = arith.constant 0 : index
    %c0_81 = arith.constant 0 : index
    %131 = vector.load %arg5[%c1_79, %c0_80, %c0_81] : memref<8x32x32xf32, #tpu.memory_space<vmem>>, vector<1x32x32xf32>
    %132 = vector.shape_cast %131 : vector<1x32x32xf32> to vector<32x32xf32>
    %cst_82 = arith.constant dense<0.000000e+00> : vector<1x32xf32>
    %133 = tpu.matmul %118, %132, %cst_82 {dimension_numbers = #tpu.dot_dimension_numbers<[1], [0], [0], [1], [0, 0, 1, 1], [], []>} : vector<1x32xf32>, vector<32x32xf32>, vector<1x32xf32> -> vector<1x32xf32>
    %134 = arith.addf %130, %133 : vector<1x32xf32>
    %135 = arith.negf %134 : vector<1x32xf32>
    %136 = math.exp %135 : vector<1x32xf32>
    %cst_83 = arith.constant 1.000000e+00 : f32
    %137 = vector.broadcast %cst_83 : f32 to vector<1x32xf32>
    %138 = arith.addf %137, %136 : vector<1x32xf32>
    %139 = arith.divf %137, %138 : vector<1x32xf32>
    %140 = vector.extract_strided_slice %26 {offsets = [2, 0], sizes = [1, 32], strides = [1, 1]} : vector<8x32xf32> to vector<1x32xf32>
    %c2_84 = arith.constant 2 : index
    %c0_85 = arith.constant 0 : index
    %c0_86 = arith.constant 0 : index
    %141 = vector.load %arg5[%c2_84, %c0_85, %c0_86] : memref<8x32x32xf32, #tpu.memory_space<vmem>>, vector<1x32x32xf32>
    %142 = vector.shape_cast %141 : vector<1x32x32xf32> to vector<32x32xf32>
    %cst_87 = arith.constant dense<0.000000e+00> : vector<1x32xf32>
    %143 = tpu.matmul %118, %142, %cst_87 {dimension_numbers = #tpu.dot_dimension_numbers<[1], [0], [0], [1], [0, 0, 1, 1], [], []>} : vector<1x32xf32>, vector<32x32xf32>, vector<1x32xf32> -> vector<1x32xf32>
    %144 = arith.addf %140, %143 : vector<1x32xf32>
    %145 = math.tanh %144 : vector<1x32xf32>
    %146 = vector.extract_strided_slice %33 {offsets = [2, 0], sizes = [1, 32], strides = [1, 1]} : vector<8x32xf32> to vector<1x32xf32>
    %c3_88 = arith.constant 3 : index
    %c0_89 = arith.constant 0 : index
    %c0_90 = arith.constant 0 : index
    %147 = vector.load %arg5[%c3_88, %c0_89, %c0_90] : memref<8x32x32xf32, #tpu.memory_space<vmem>>, vector<1x32x32xf32>
    %148 = vector.shape_cast %147 : vector<1x32x32xf32> to vector<32x32xf32>
    %cst_91 = arith.constant dense<0.000000e+00> : vector<1x32xf32>
    %149 = tpu.matmul %118, %148, %cst_91 {dimension_numbers = #tpu.dot_dimension_numbers<[1], [0], [0], [1], [0, 0, 1, 1], [], []>} : vector<1x32xf32>, vector<32x32xf32>, vector<1x32xf32> -> vector<1x32xf32>
    %150 = arith.addf %146, %149 : vector<1x32xf32>
    %151 = arith.negf %150 : vector<1x32xf32>
    %152 = math.exp %151 : vector<1x32xf32>
    %cst_92 = arith.constant 1.000000e+00 : f32
    %153 = vector.broadcast %cst_92 : f32 to vector<1x32xf32>
    %154 = arith.addf %153, %152 : vector<1x32xf32>
    %155 = arith.divf %153, %154 : vector<1x32xf32>
    %156 = arith.mulf %139, %116 : vector<1x32xf32>
    %157 = arith.mulf %129, %145 : vector<1x32xf32>
    %158 = arith.addf %156, %157 : vector<1x32xf32>
    %159 = math.tanh %158 : vector<1x32xf32>
    %160 = arith.mulf %155, %159 : vector<1x32xf32>
    %c2_93 = arith.constant 2 : index
    %c0_94 = arith.constant 0 : index
    %161 = vector.load %arg27[%c2_93, %c0_94] : memref<8x32xf32, #tpu.memory_space<vmem>>, vector<1x32xf32>
    tpu.vector_store %arg27[%c2_93, %c0_94], %160 {strides = array<i32>} : memref<8x32xf32, #tpu.memory_space<vmem>>, vector<1x32xf32>,
    %162 = vector.extract_strided_slice %12 {offsets = [3, 0], sizes = [1, 32], strides = [1, 1]} : vector<8x32xf32> to vector<1x32xf32>
    %c0_95 = arith.constant 0 : index
    %c0_96 = arith.constant 0 : index
    %c0_97 = arith.constant 0 : index
    %163 = vector.load %arg5[%c0_95, %c0_96, %c0_97] : memref<8x32x32xf32, #tpu.memory_space<vmem>>, vector<1x32x32xf32>
    %164 = vector.shape_cast %163 : vector<1x32x32xf32> to vector<32x32xf32>
    %cst_98 = arith.constant dense<0.000000e+00> : vector<1x32xf32>
    %165 = tpu.matmul %160, %164, %cst_98 {dimension_numbers = #tpu.dot_dimension_numbers<[1], [0], [0], [1], [0, 0, 1, 1], [], []>} : vector<1x32xf32>, vector<32x32xf32>, vector<1x32xf32> -> vector<1x32xf32>
    %166 = arith.addf %162, %165 : vector<1x32xf32>
    %167 = arith.negf %166 : vector<1x32xf32>
    %168 = math.exp %167 : vector<1x32xf32>
    %cst_99 = arith.constant 1.000000e+00 : f32
    %169 = vector.broadcast %cst_99 : f32 to vector<1x32xf32>
    %170 = arith.addf %169, %168 : vector<1x32xf32>
    %171 = arith.divf %169, %170 : vector<1x32xf32>
    %172 = vector.extract_strided_slice %19 {offsets = [3, 0], sizes = [1, 32], strides = [1, 1]} : vector<8x32xf32> to vector<1x32xf32>
    %c1_100 = arith.constant 1 : index
    %c0_101 = arith.constant 0 : index
    %c0_102 = arith.constant 0 : index
    %173 = vector.load %arg5[%c1_100, %c0_101, %c0_102] : memref<8x32x32xf32, #tpu.memory_space<vmem>>, vector<1x32x32xf32>
    %174 = vector.shape_cast %173 : vector<1x32x32xf32> to vector<32x32xf32>
    %cst_103 = arith.constant dense<0.000000e+00> : vector<1x32xf32>
    %175 = tpu.matmul %160, %174, %cst_103 {dimension_numbers = #tpu.dot_dimension_numbers<[1], [0], [0], [1], [0, 0, 1, 1], [], []>} : vector<1x32xf32>, vector<32x32xf32>, vector<1x32xf32> -> vector<1x32xf32>
    %176 = arith.addf %172, %175 : vector<1x32xf32>
    %177 = arith.negf %176 : vector<1x32xf32>
    %178 = math.exp %177 : vector<1x32xf32>
    %cst_104 = arith.constant 1.000000e+00 : f32
    %179 = vector.broadcast %cst_104 : f32 to vector<1x32xf32>
    %180 = arith.addf %179, %178 : vector<1x32xf32>
    %181 = arith.divf %179, %180 : vector<1x32xf32>
    %182 = vector.extract_strided_slice %26 {offsets = [3, 0], sizes = [1, 32], strides = [1, 1]} : vector<8x32xf32> to vector<1x32xf32>
    %c2_105 = arith.constant 2 : index
    %c0_106 = arith.constant 0 : index
    %c0_107 = arith.constant 0 : index
    %183 = vector.load %arg5[%c2_105, %c0_106, %c0_107] : memref<8x32x32xf32, #tpu.memory_space<vmem>>, vector<1x32x32xf32>
    %184 = vector.shape_cast %183 : vector<1x32x32xf32> to vector<32x32xf32>
    %cst_108 = arith.constant dense<0.000000e+00> : vector<1x32xf32>
    %185 = tpu.matmul %160, %184, %cst_108 {dimension_numbers = #tpu.dot_dimension_numbers<[1], [0], [0], [1], [0, 0, 1, 1], [], []>} : vector<1x32xf32>, vector<32x32xf32>, vector<1x32xf32> -> vector<1x32xf32>
    %186 = arith.addf %182, %185 : vector<1x32xf32>
    %187 = math.tanh %186 : vector<1x32xf32>
    %188 = vector.extract_strided_slice %33 {offsets = [3, 0], sizes = [1, 32], strides = [1, 1]} : vector<8x32xf32> to vector<1x32xf32>
    %c3_109 = arith.constant 3 : index
    %c0_110 = arith.constant 0 : index
    %c0_111 = arith.constant 0 : index
    %189 = vector.load %arg5[%c3_109, %c0_110, %c0_111] : memref<8x32x32xf32, #tpu.memory_space<vmem>>, vector<1x32x32xf32>
    %190 = vector.shape_cast %189 : vector<1x32x32xf32> to vector<32x32xf32>
    %cst_112 = arith.constant dense<0.000000e+00> : vector<1x32xf32>
    %191 = tpu.matmul %160, %190, %cst_112 {dimension_numbers = #tpu.dot_dimension_numbers<[1], [0], [0], [1], [0, 0, 1, 1], [], []>} : vector<1x32xf32>, vector<32x32xf32>, vector<1x32xf32> -> vector<1x32xf32>
    %192 = arith.addf %188, %191 : vector<1x32xf32>
    %193 = arith.negf %192 : vector<1x32xf32>
    %194 = math.exp %193 : vector<1x32xf32>
    %cst_113 = arith.constant 1.000000e+00 : f32
    %195 = vector.broadcast %cst_113 : f32 to vector<1x32xf32>
    %196 = arith.addf %195, %194 : vector<1x32xf32>
    %197 = arith.divf %195, %196 : vector<1x32xf32>
    %198 = arith.mulf %181, %158 : vector<1x32xf32>
    %199 = arith.mulf %171, %187 : vector<1x32xf32>
    %200 = arith.addf %198, %199 : vector<1x32xf32>
    %201 = math.tanh %200 : vector<1x32xf32>
    %202 = arith.mulf %197, %201 : vector<1x32xf32>
    %c3_114 = arith.constant 3 : index
    %c0_115 = arith.constant 0 : index
    %203 = vector.load %arg27[%c3_114, %c0_115] : memref<8x32xf32, #tpu.memory_space<vmem>>, vector<1x32xf32>
    tpu.vector_store %arg27[%c3_114, %c0_115], %202 {strides = array<i32>} : memref<8x32xf32, #tpu.memory_space<vmem>>, vector<1x32xf32>,
    %204 = vector.extract_strided_slice %12 {offsets = [4, 0], sizes = [1, 32], strides = [1, 1]} : vector<8x32xf32> to vector<1x32xf32>
    %c0_116 = arith.constant 0 : index
    %c0_117 = arith.constant 0 : index
    %c0_118 = arith.constant 0 : index
    %205 = vector.load %arg5[%c0_116, %c0_117, %c0_118] : memref<8x32x32xf32, #tpu.memory_space<vmem>>, vector<1x32x32xf32>
    %206 = vector.shape_cast %205 : vector<1x32x32xf32> to vector<32x32xf32>
    %cst_119 = arith.constant dense<0.000000e+00> : vector<1x32xf32>
    %207 = tpu.matmul %202, %206, %cst_119 {dimension_numbers = #tpu.dot_dimension_numbers<[1], [0], [0], [1], [0, 0, 1, 1], [], []>} : vector<1x32xf32>, vector<32x32xf32>, vector<1x32xf32> -> vector<1x32xf32>
    %208 = arith.addf %204, %207 : vector<1x32xf32>
    %209 = arith.negf %208 : vector<1x32xf32>
    %210 = math.exp %209 : vector<1x32xf32>
    %cst_120 = arith.constant 1.000000e+00 : f32
    %211 = vector.broadcast %cst_120 : f32 to vector<1x32xf32>
    %212 = arith.addf %211, %210 : vector<1x32xf32>
    %213 = arith.divf %211, %212 : vector<1x32xf32>
    %214 = vector.extract_strided_slice %19 {offsets = [4, 0], sizes = [1, 32], strides = [1, 1]} : vector<8x32xf32> to vector<1x32xf32>
    %c1_121 = arith.constant 1 : index
    %c0_122 = arith.constant 0 : index
    %c0_123 = arith.constant 0 : index
    %215 = vector.load %arg5[%c1_121, %c0_122, %c0_123] : memref<8x32x32xf32, #tpu.memory_space<vmem>>, vector<1x32x32xf32>
    %216 = vector.shape_cast %215 : vector<1x32x32xf32> to vector<32x32xf32>
    %cst_124 = arith.constant dense<0.000000e+00> : vector<1x32xf32>
    %217 = tpu.matmul %202, %216, %cst_124 {dimension_numbers = #tpu.dot_dimension_numbers<[1], [0], [0], [1], [0, 0, 1, 1], [], []>} : vector<1x32xf32>, vector<32x32xf32>, vector<1x32xf32> -> vector<1x32xf32>
    %218 = arith.addf %214, %217 : vector<1x32xf32>
    %219 = arith.negf %218 : vector<1x32xf32>
    %220 = math.exp %219 : vector<1x32xf32>
    %cst_125 = arith.constant 1.000000e+00 : f32
    %221 = vector.broadcast %cst_125 : f32 to vector<1x32xf32>
    %222 = arith.addf %221, %220 : vector<1x32xf32>
    %223 = arith.divf %221, %222 : vector<1x32xf32>
    %224 = vector.extract_strided_slice %26 {offsets = [4, 0], sizes = [1, 32], strides = [1, 1]} : vector<8x32xf32> to vector<1x32xf32>
    %c2_126 = arith.constant 2 : index
    %c0_127 = arith.constant 0 : index
    %c0_128 = arith.constant 0 : index
    %225 = vector.load %arg5[%c2_126, %c0_127, %c0_128] : memref<8x32x32xf32, #tpu.memory_space<vmem>>, vector<1x32x32xf32>
    %226 = vector.shape_cast %225 : vector<1x32x32xf32> to vector<32x32xf32>
    %cst_129 = arith.constant dense<0.000000e+00> : vector<1x32xf32>
    %227 = tpu.matmul %202, %226, %cst_129 {dimension_numbers = #tpu.dot_dimension_numbers<[1], [0], [0], [1], [0, 0, 1, 1], [], []>} : vector<1x32xf32>, vector<32x32xf32>, vector<1x32xf32> -> vector<1x32xf32>
    %228 = arith.addf %224, %227 : vector<1x32xf32>
    %229 = math.tanh %228 : vector<1x32xf32>
    %230 = vector.extract_strided_slice %33 {offsets = [4, 0], sizes = [1, 32], strides = [1, 1]} : vector<8x32xf32> to vector<1x32xf32>
    %c3_130 = arith.constant 3 : index
    %c0_131 = arith.constant 0 : index
    %c0_132 = arith.constant 0 : index
    %231 = vector.load %arg5[%c3_130, %c0_131, %c0_132] : memref<8x32x32xf32, #tpu.memory_space<vmem>>, vector<1x32x32xf32>
    %232 = vector.shape_cast %231 : vector<1x32x32xf32> to vector<32x32xf32>
    %cst_133 = arith.constant dense<0.000000e+00> : vector<1x32xf32>
    %233 = tpu.matmul %202, %232, %cst_133 {dimension_numbers = #tpu.dot_dimension_numbers<[1], [0], [0], [1], [0, 0, 1, 1], [], []>} : vector<1x32xf32>, vector<32x32xf32>, vector<1x32xf32> -> vector<1x32xf32>
    %234 = arith.addf %230, %233 : vector<1x32xf32>
    %235 = arith.negf %234 : vector<1x32xf32>
    %236 = math.exp %235 : vector<1x32xf32>
    %cst_134 = arith.constant 1.000000e+00 : f32
    %237 = vector.broadcast %cst_134 : f32 to vector<1x32xf32>
    %238 = arith.addf %237, %236 : vector<1x32xf32>
    %239 = arith.divf %237, %238 : vector<1x32xf32>
    %240 = arith.mulf %223, %200 : vector<1x32xf32>
    %241 = arith.mulf %213, %229 : vector<1x32xf32>
    %242 = arith.addf %240, %241 : vector<1x32xf32>
    %243 = math.tanh %242 : vector<1x32xf32>
    %244 = arith.mulf %239, %243 : vector<1x32xf32>
    %c4 = arith.constant 4 : index
    %c0_135 = arith.constant 0 : index
    %245 = vector.load %arg27[%c4, %c0_135] : memref<8x32xf32, #tpu.memory_space<vmem>>, vector<1x32xf32>
    tpu.vector_store %arg27[%c4, %c0_135], %244 {strides = array<i32>} : memref<8x32xf32, #tpu.memory_space<vmem>>, vector<1x32xf32>,
    %246 = vector.extract_strided_slice %12 {offsets = [5, 0], sizes = [1, 32], strides = [1, 1]} : vector<8x32xf32> to vector<1x32xf32>
    %c0_136 = arith.constant 0 : index
    %c0_137 = arith.constant 0 : index
    %c0_138 = arith.constant 0 : index
    %247 = vector.load %arg5[%c0_136, %c0_137, %c0_138] : memref<8x32x32xf32, #tpu.memory_space<vmem>>, vector<1x32x32xf32>
    %248 = vector.shape_cast %247 : vector<1x32x32xf32> to vector<32x32xf32>
    %cst_139 = arith.constant dense<0.000000e+00> : vector<1x32xf32>
    %249 = tpu.matmul %244, %248, %cst_139 {dimension_numbers = #tpu.dot_dimension_numbers<[1], [0], [0], [1], [0, 0, 1, 1], [], []>} : vector<1x32xf32>, vector<32x32xf32>, vector<1x32xf32> -> vector<1x32xf32>
    %250 = arith.addf %246, %249 : vector<1x32xf32>
    %251 = arith.negf %250 : vector<1x32xf32>
    %252 = math.exp %251 : vector<1x32xf32>
    %cst_140 = arith.constant 1.000000e+00 : f32
    %253 = vector.broadcast %cst_140 : f32 to vector<1x32xf32>
    %254 = arith.addf %253, %252 : vector<1x32xf32>
    %255 = arith.divf %253, %254 : vector<1x32xf32>
    %256 = vector.extract_strided_slice %19 {offsets = [5, 0], sizes = [1, 32], strides = [1, 1]} : vector<8x32xf32> to vector<1x32xf32>
    %c1_141 = arith.constant 1 : index
    %c0_142 = arith.constant 0 : index
    %c0_143 = arith.constant 0 : index
    %257 = vector.load %arg5[%c1_141, %c0_142, %c0_143] : memref<8x32x32xf32, #tpu.memory_space<vmem>>, vector<1x32x32xf32>
    %258 = vector.shape_cast %257 : vector<1x32x32xf32> to vector<32x32xf32>
    %cst_144 = arith.constant dense<0.000000e+00> : vector<1x32xf32>
    %259 = tpu.matmul %244, %258, %cst_144 {dimension_numbers = #tpu.dot_dimension_numbers<[1], [0], [0], [1], [0, 0, 1, 1], [], []>} : vector<1x32xf32>, vector<32x32xf32>, vector<1x32xf32> -> vector<1x32xf32>
    %260 = arith.addf %256, %259 : vector<1x32xf32>
    %261 = arith.negf %260 : vector<1x32xf32>
    %262 = math.exp %261 : vector<1x32xf32>
    %cst_145 = arith.constant 1.000000e+00 : f32
    %263 = vector.broadcast %cst_145 : f32 to vector<1x32xf32>
    %264 = arith.addf %263, %262 : vector<1x32xf32>
    %265 = arith.divf %263, %264 : vector<1x32xf32>
    %266 = vector.extract_strided_slice %26 {offsets = [5, 0], sizes = [1, 32], strides = [1, 1]} : vector<8x32xf32> to vector<1x32xf32>
    %c2_146 = arith.constant 2 : index
    %c0_147 = arith.constant 0 : index
    %c0_148 = arith.constant 0 : index
    %267 = vector.load %arg5[%c2_146, %c0_147, %c0_148] : memref<8x32x32xf32, #tpu.memory_space<vmem>>, vector<1x32x32xf32>
    %268 = vector.shape_cast %267 : vector<1x32x32xf32> to vector<32x32xf32>
    %cst_149 = arith.constant dense<0.000000e+00> : vector<1x32xf32>
    %269 = tpu.matmul %244, %268, %cst_149 {dimension_numbers = #tpu.dot_dimension_numbers<[1], [0], [0], [1], [0, 0, 1, 1], [], []>} : vector<1x32xf32>, vector<32x32xf32>, vector<1x32xf32> -> vector<1x32xf32>
    %270 = arith.addf %266, %269 : vector<1x32xf32>
    %271 = math.tanh %270 : vector<1x32xf32>
    %272 = vector.extract_strided_slice %33 {offsets = [5, 0], sizes = [1, 32], strides = [1, 1]} : vector<8x32xf32> to vector<1x32xf32>
    %c3_150 = arith.constant 3 : index
    %c0_151 = arith.constant 0 : index
    %c0_152 = arith.constant 0 : index
    %273 = vector.load %arg5[%c3_150, %c0_151, %c0_152] : memref<8x32x32xf32, #tpu.memory_space<vmem>>, vector<1x32x32xf32>
    %274 = vector.shape_cast %273 : vector<1x32x32xf32> to vector<32x32xf32>
    %cst_153 = arith.constant dense<0.000000e+00> : vector<1x32xf32>
    %275 = tpu.matmul %244, %274, %cst_153 {dimension_numbers = #tpu.dot_dimension_numbers<[1], [0], [0], [1], [0, 0, 1, 1], [], []>} : vector<1x32xf32>, vector<32x32xf32>, vector<1x32xf32> -> vector<1x32xf32>
    %276 = arith.addf %272, %275 : vector<1x32xf32>
    %277 = arith.negf %276 : vector<1x32xf32>
    %278 = math.exp %277 : vector<1x32xf32>
    %cst_154 = arith.constant 1.000000e+00 : f32
    %279 = vector.broadcast %cst_154 : f32 to vector<1x32xf32>
    %280 = arith.addf %279, %278 : vector<1x32xf32>
    %281 = arith.divf %279, %280 : vector<1x32xf32>
    %282 = arith.mulf %265, %242 : vector<1x32xf32>
    %283 = arith.mulf %255, %271 : vector<1x32xf32>
    %284 = arith.addf %282, %283 : vector<1x32xf32>
    %285 = math.tanh %284 : vector<1x32xf32>
    %286 = arith.mulf %281, %285 : vector<1x32xf32>
    %c5 = arith.constant 5 : index
    %c0_155 = arith.constant 0 : index
    %287 = vector.load %arg27[%c5, %c0_155] : memref<8x32xf32, #tpu.memory_space<vmem>>, vector<1x32xf32>
    tpu.vector_store %arg27[%c5, %c0_155], %286 {strides = array<i32>} : memref<8x32xf32, #tpu.memory_space<vmem>>, vector<1x32xf32>,
    %288 = vector.extract_strided_slice %12 {offsets = [6, 0], sizes = [1, 32], strides = [1, 1]} : vector<8x32xf32> to vector<1x32xf32>
    %c0_156 = arith.constant 0 : index
    %c0_157 = arith.constant 0 : index
    %c0_158 = arith.constant 0 : index
    %289 = vector.load %arg5[%c0_156, %c0_157, %c0_158] : memref<8x32x32xf32, #tpu.memory_space<vmem>>, vector<1x32x32xf32>
    %290 = vector.shape_cast %289 : vector<1x32x32xf32> to vector<32x32xf32>
    %cst_159 = arith.constant dense<0.000000e+00> : vector<1x32xf32>
    %291 = tpu.matmul %286, %290, %cst_159 {dimension_numbers = #tpu.dot_dimension_numbers<[1], [0], [0], [1], [0, 0, 1, 1], [], []>} : vector<1x32xf32>, vector<32x32xf32>, vector<1x32xf32> -> vector<1x32xf32>
    %292 = arith.addf %288, %291 : vector<1x32xf32>
    %293 = arith.negf %292 : vector<1x32xf32>
    %294 = math.exp %293 : vector<1x32xf32>
    %cst_160 = arith.constant 1.000000e+00 : f32
    %295 = vector.broadcast %cst_160 : f32 to vector<1x32xf32>
    %296 = arith.addf %295, %294 : vector<1x32xf32>
    %297 = arith.divf %295, %296 : vector<1x32xf32>
    %298 = vector.extract_strided_slice %19 {offsets = [6, 0], sizes = [1, 32], strides = [1, 1]} : vector<8x32xf32> to vector<1x32xf32>
    %c1_161 = arith.constant 1 : index
    %c0_162 = arith.constant 0 : index
    %c0_163 = arith.constant 0 : index
    %299 = vector.load %arg5[%c1_161, %c0_162, %c0_163] : memref<8x32x32xf32, #tpu.memory_space<vmem>>, vector<1x32x32xf32>
    %300 = vector.shape_cast %299 : vector<1x32x32xf32> to vector<32x32xf32>
    %cst_164 = arith.constant dense<0.000000e+00> : vector<1x32xf32>
    %301 = tpu.matmul %286, %300, %cst_164 {dimension_numbers = #tpu.dot_dimension_numbers<[1], [0], [0], [1], [0, 0, 1, 1], [], []>} : vector<1x32xf32>, vector<32x32xf32>, vector<1x32xf32> -> vector<1x32xf32>
    %302 = arith.addf %298, %301 : vector<1x32xf32>
    %303 = arith.negf %302 : vector<1x32xf32>
    %304 = math.exp %303 : vector<1x32xf32>
    %cst_165 = arith.constant 1.000000e+00 : f32
    %305 = vector.broadcast %cst_165 : f32 to vector<1x32xf32>
    %306 = arith.addf %305, %304 : vector<1x32xf32>
    %307 = arith.divf %305, %306 : vector<1x32xf32>
    %308 = vector.extract_strided_slice %26 {offsets = [6, 0], sizes = [1, 32], strides = [1, 1]} : vector<8x32xf32> to vector<1x32xf32>
    %c2_166 = arith.constant 2 : index
    %c0_167 = arith.constant 0 : index
    %c0_168 = arith.constant 0 : index
    %309 = vector.load %arg5[%c2_166, %c0_167, %c0_168] : memref<8x32x32xf32, #tpu.memory_space<vmem>>, vector<1x32x32xf32>
    %310 = vector.shape_cast %309 : vector<1x32x32xf32> to vector<32x32xf32>
    %cst_169 = arith.constant dense<0.000000e+00> : vector<1x32xf32>
    %311 = tpu.matmul %286, %310, %cst_169 {dimension_numbers = #tpu.dot_dimension_numbers<[1], [0], [0], [1], [0, 0, 1, 1], [], []>} : vector<1x32xf32>, vector<32x32xf32>, vector<1x32xf32> -> vector<1x32xf32>
    %312 = arith.addf %308, %311 : vector<1x32xf32>
    %313 = math.tanh %312 : vector<1x32xf32>
    %314 = vector.extract_strided_slice %33 {offsets = [6, 0], sizes = [1, 32], strides = [1, 1]} : vector<8x32xf32> to vector<1x32xf32>
    %c3_170 = arith.constant 3 : index
    %c0_171 = arith.constant 0 : index
    %c0_172 = arith.constant 0 : index
    %315 = vector.load %arg5[%c3_170, %c0_171, %c0_172] : memref<8x32x32xf32, #tpu.memory_space<vmem>>, vector<1x32x32xf32>
    %316 = vector.shape_cast %315 : vector<1x32x32xf32> to vector<32x32xf32>
    %cst_173 = arith.constant dense<0.000000e+00> : vector<1x32xf32>
    %317 = tpu.matmul %286, %316, %cst_173 {dimension_numbers = #tpu.dot_dimension_numbers<[1], [0], [0], [1], [0, 0, 1, 1], [], []>} : vector<1x32xf32>, vector<32x32xf32>, vector<1x32xf32> -> vector<1x32xf32>
    %318 = arith.addf %314, %317 : vector<1x32xf32>
    %319 = arith.negf %318 : vector<1x32xf32>
    %320 = math.exp %319 : vector<1x32xf32>
    %cst_174 = arith.constant 1.000000e+00 : f32
    %321 = vector.broadcast %cst_174 : f32 to vector<1x32xf32>
    %322 = arith.addf %321, %320 : vector<1x32xf32>
    %323 = arith.divf %321, %322 : vector<1x32xf32>
    %324 = arith.mulf %307, %284 : vector<1x32xf32>
    %325 = arith.mulf %297, %313 : vector<1x32xf32>
    %326 = arith.addf %324, %325 : vector<1x32xf32>
    %327 = math.tanh %326 : vector<1x32xf32>
    %328 = arith.mulf %323, %327 : vector<1x32xf32>
    %c6 = arith.constant 6 : index
    %c0_175 = arith.constant 0 : index
    %329 = vector.load %arg27[%c6, %c0_175] : memref<8x32xf32, #tpu.memory_space<vmem>>, vector<1x32xf32>
    tpu.vector_store %arg27[%c6, %c0_175], %328 {strides = array<i32>} : memref<8x32xf32, #tpu.memory_space<vmem>>, vector<1x32xf32>,
    %330 = vector.extract_strided_slice %12 {offsets = [7, 0], sizes = [1, 32], strides = [1, 1]} : vector<8x32xf32> to vector<1x32xf32>
    %c0_176 = arith.constant 0 : index
    %c0_177 = arith.constant 0 : index
    %c0_178 = arith.constant 0 : index
    %331 = vector.load %arg5[%c0_176, %c0_177, %c0_178] : memref<8x32x32xf32, #tpu.memory_space<vmem>>, vector<1x32x32xf32>
    %332 = vector.shape_cast %331 : vector<1x32x32xf32> to vector<32x32xf32>
    %cst_179 = arith.constant dense<0.000000e+00> : vector<1x32xf32>
    %333 = tpu.matmul %328, %332, %cst_179 {dimension_numbers = #tpu.dot_dimension_numbers<[1], [0], [0], [1], [0, 0, 1, 1], [], []>} : vector<1x32xf32>, vector<32x32xf32>, vector<1x32xf32> -> vector<1x32xf32>
    %334 = arith.addf %330, %333 : vector<1x32xf32>
    %335 = arith.negf %334 : vector<1x32xf32>
    %336 = math.exp %335 : vector<1x32xf32>
    %cst_180 = arith.constant 1.000000e+00 : f32
    %337 = vector.broadcast %cst_180 : f32 to vector<1x32xf32>
    %338 = arith.addf %337, %336 : vector<1x32xf32>
    %339 = arith.divf %337, %338 : vector<1x32xf32>
    %340 = vector.extract_strided_slice %19 {offsets = [7, 0], sizes = [1, 32], strides = [1, 1]} : vector<8x32xf32> to vector<1x32xf32>
    %c1_181 = arith.constant 1 : index
    %c0_182 = arith.constant 0 : index
    %c0_183 = arith.constant 0 : index
    %341 = vector.load %arg5[%c1_181, %c0_182, %c0_183] : memref<8x32x32xf32, #tpu.memory_space<vmem>>, vector<1x32x32xf32>
    %342 = vector.shape_cast %341 : vector<1x32x32xf32> to vector<32x32xf32>
    %cst_184 = arith.constant dense<0.000000e+00> : vector<1x32xf32>
    %343 = tpu.matmul %328, %342, %cst_184 {dimension_numbers = #tpu.dot_dimension_numbers<[1], [0], [0], [1], [0, 0, 1, 1], [], []>} : vector<1x32xf32>, vector<32x32xf32>, vector<1x32xf32> -> vector<1x32xf32>
    %344 = arith.addf %340, %343 : vector<1x32xf32>
    %345 = arith.negf %344 : vector<1x32xf32>
    %346 = math.exp %345 : vector<1x32xf32>
    %cst_185 = arith.constant 1.000000e+00 : f32
    %347 = vector.broadcast %cst_185 : f32 to vector<1x32xf32>
    %348 = arith.addf %347, %346 : vector<1x32xf32>
    %349 = arith.divf %347, %348 : vector<1x32xf32>
    %350 = vector.extract_strided_slice %26 {offsets = [7, 0], sizes = [1, 32], strides = [1, 1]} : vector<8x32xf32> to vector<1x32xf32>
    %c2_186 = arith.constant 2 : index
    %c0_187 = arith.constant 0 : index
    %c0_188 = arith.constant 0 : index
    %351 = vector.load %arg5[%c2_186, %c0_187, %c0_188] : memref<8x32x32xf32, #tpu.memory_space<vmem>>, vector<1x32x32xf32>
    %352 = vector.shape_cast %351 : vector<1x32x32xf32> to vector<32x32xf32>
    %cst_189 = arith.constant dense<0.000000e+00> : vector<1x32xf32>
    %353 = tpu.matmul %328, %352, %cst_189 {dimension_numbers = #tpu.dot_dimension_numbers<[1], [0], [0], [1], [0, 0, 1, 1], [], []>} : vector<1x32xf32>, vector<32x32xf32>, vector<1x32xf32> -> vector<1x32xf32>
    %354 = arith.addf %350, %353 : vector<1x32xf32>
    %355 = math.tanh %354 : vector<1x32xf32>
    %356 = vector.extract_strided_slice %33 {offsets = [7, 0], sizes = [1, 32], strides = [1, 1]} : vector<8x32xf32> to vector<1x32xf32>
    %c3_190 = arith.constant 3 : index
    %c0_191 = arith.constant 0 : index
    %c0_192 = arith.constant 0 : index
    %357 = vector.load %arg5[%c3_190, %c0_191, %c0_192] : memref<8x32x32xf32, #tpu.memory_space<vmem>>, vector<1x32x32xf32>
    %358 = vector.shape_cast %357 : vector<1x32x32xf32> to vector<32x32xf32>
    %cst_193 = arith.constant dense<0.000000e+00> : vector<1x32xf32>
    %359 = tpu.matmul %328, %358, %cst_193 {dimension_numbers = #tpu.dot_dimension_numbers<[1], [0], [0], [1], [0, 0, 1, 1], [], []>} : vector<1x32xf32>, vector<32x32xf32>, vector<1x32xf32> -> vector<1x32xf32>
    %360 = arith.addf %356, %359 : vector<1x32xf32>
    %361 = arith.negf %360 : vector<1x32xf32>
    %362 = math.exp %361 : vector<1x32xf32>
    %cst_194 = arith.constant 1.000000e+00 : f32
    %363 = vector.broadcast %cst_194 : f32 to vector<1x32xf32>
    %364 = arith.addf %363, %362 : vector<1x32xf32>
    %365 = arith.divf %363, %364 : vector<1x32xf32>
    %366 = arith.mulf %349, %326 : vector<1x32xf32>
    %367 = arith.mulf %339, %355 : vector<1x32xf32>
    %368 = arith.addf %366, %367 : vector<1x32xf32>
    %369 = math.tanh %368 : vector<1x32xf32>
    %370 = arith.mulf %365, %369 : vector<1x32xf32>
    %c7 = arith.constant 7 : index
    %c0_195 = arith.constant 0 : index
    %371 = vector.load %arg27[%c7, %c0_195] : memref<8x32xf32, #tpu.memory_space<vmem>>, vector<1x32xf32>
    tpu.vector_store %arg27[%c7, %c0_195], %370 {strides = array<i32>} : memref<8x32xf32, #tpu.memory_space<vmem>>, vector<1x32xf32>,
    %c0_196 = arith.constant 0 : index
    %c0_197 = arith.constant 0 : index
    %372 = vector.load %arg27[%c0_196, %c0_197] : memref<8x32xf32, #tpu.memory_space<vmem>>, vector<8x32xf32>
    %c4_198 = arith.constant 4 : index
    %c0_199 = arith.constant 0 : index
    %c0_200 = arith.constant 0 : index
    %373 = vector.load %arg4[%c4_198, %c0_199, %c0_200] : memref<8x32x32xf32, #tpu.memory_space<vmem>>, vector<1x32x32xf32>
    %374 = vector.shape_cast %373 : vector<1x32x32xf32> to vector<32x32xf32>
    %cst_201 = arith.constant dense<0.000000e+00> : vector<8x32xf32>
    %375 = tpu.matmul %372, %374, %cst_201 {dimension_numbers = #tpu.dot_dimension_numbers<[1], [0], [0], [1], [0, 0, 1, 1], [], []>} : vector<8x32xf32>, vector<32x32xf32>, vector<8x32xf32> -> vector<8x32xf32>
    %c4_202 = arith.constant 4 : index
    %c0_203 = arith.constant 0 : index
    %c0_204 = arith.constant 0 : index
    %376 = vector.load %arg6[%c4_202, %c0_203, %c0_204] : memref<8x1x32xf32, #tpu.memory_space<vmem>>, vector<1x1x32xf32>
    %377 = vector.shape_cast %376 : vector<1x1x32xf32> to vector<1x32xf32>
    %378 = vector.broadcast %377 : vector<1x32xf32> to vector<8x32xf32>
    %379 = arith.addf %375, %378 : vector<8x32xf32>
    %c5_205 = arith.constant 5 : index
    %c0_206 = arith.constant 0 : index
    %c0_207 = arith.constant 0 : index
    %380 = vector.load %arg4[%c5_205, %c0_206, %c0_207] : memref<8x32x32xf32, #tpu.memory_space<vmem>>, vector<1x32x32xf32>
    %381 = vector.shape_cast %380 : vector<1x32x32xf32> to vector<32x32xf32>
    %cst_208 = arith.constant dense<0.000000e+00> : vector<8x32xf32>
    %382 = tpu.matmul %372, %381, %cst_208 {dimension_numbers = #tpu.dot_dimension_numbers<[1], [0], [0], [1], [0, 0, 1, 1], [], []>} : vector<8x32xf32>, vector<32x32xf32>, vector<8x32xf32> -> vector<8x32xf32>
    %c5_209 = arith.constant 5 : index
    %c0_210 = arith.constant 0 : index
    %c0_211 = arith.constant 0 : index
    %383 = vector.load %arg6[%c5_209, %c0_210, %c0_211] : memref<8x1x32xf32, #tpu.memory_space<vmem>>, vector<1x1x32xf32>
    %384 = vector.shape_cast %383 : vector<1x1x32xf32> to vector<1x32xf32>
    %385 = vector.broadcast %384 : vector<1x32xf32> to vector<8x32xf32>
    %386 = arith.addf %382, %385 : vector<8x32xf32>
    %c6_212 = arith.constant 6 : index
    %c0_213 = arith.constant 0 : index
    %c0_214 = arith.constant 0 : index
    %387 = vector.load %arg4[%c6_212, %c0_213, %c0_214] : memref<8x32x32xf32, #tpu.memory_space<vmem>>, vector<1x32x32xf32>
    %388 = vector.shape_cast %387 : vector<1x32x32xf32> to vector<32x32xf32>
    %cst_215 = arith.constant dense<0.000000e+00> : vector<8x32xf32>
    %389 = tpu.matmul %372, %388, %cst_215 {dimension_numbers = #tpu.dot_dimension_numbers<[1], [0], [0], [1], [0, 0, 1, 1], [], []>} : vector<8x32xf32>, vector<32x32xf32>, vector<8x32xf32> -> vector<8x32xf32>
    %c6_216 = arith.constant 6 : index
    %c0_217 = arith.constant 0 : index
    %c0_218 = arith.constant 0 : index
    %390 = vector.load %arg6[%c6_216, %c0_217, %c0_218] : memref<8x1x32xf32, #tpu.memory_space<vmem>>, vector<1x1x32xf32>
    %391 = vector.shape_cast %390 : vector<1x1x32xf32> to vector<1x32xf32>
    %392 = vector.broadcast %391 : vector<1x32xf32> to vector<8x32xf32>
    %393 = arith.addf %389, %392 : vector<8x32xf32>
    %c7_219 = arith.constant 7 : index
    %c0_220 = arith.constant 0 : index
    %c0_221 = arith.constant 0 : index
    %394 = vector.load %arg4[%c7_219, %c0_220, %c0_221] : memref<8x32x32xf32, #tpu.memory_space<vmem>>, vector<1x32x32xf32>
    %395 = vector.shape_cast %394 : vector<1x32x32xf32> to vector<32x32xf32>
    %cst_222 = arith.constant dense<0.000000e+00> : vector<8x32xf32>
    %396 = tpu.matmul %372, %395, %cst_222 {dimension_numbers = #tpu.dot_dimension_numbers<[1], [0], [0], [1], [0, 0, 1, 1], [], []>} : vector<8x32xf32>, vector<32x32xf32>, vector<8x32xf32> -> vector<8x32xf32>
    %c7_223 = arith.constant 7 : index
    %c0_224 = arith.constant 0 : index
    %c0_225 = arith.constant 0 : index
    %397 = vector.load %arg6[%c7_223, %c0_224, %c0_225] : memref<8x1x32xf32, #tpu.memory_space<vmem>>, vector<1x1x32xf32>
    %398 = vector.shape_cast %397 : vector<1x1x32xf32> to vector<1x32xf32>
    %399 = vector.broadcast %398 : vector<1x32xf32> to vector<8x32xf32>
    %400 = arith.addf %396, %399 : vector<8x32xf32>
    %401 = vector.extract_strided_slice %3 {offsets = [1, 0], sizes = [1, 32], strides = [1, 1]} : vector<2x32xf32> to vector<1x32xf32>
    %402 = vector.extract_strided_slice %5 {offsets = [1, 0], sizes = [1, 32], strides = [1, 1]} : vector<2x32xf32> to vector<1x32xf32>
    %403 = vector.extract_strided_slice %379 {offsets = [0, 0], sizes = [1, 32], strides = [1, 1]} : vector<8x32xf32> to vector<1x32xf32>
    %c4_226 = arith.constant 4 : index
    %c0_227 = arith.constant 0 : index
    %c0_228 = arith.constant 0 : index
    %404 = vector.load %arg5[%c4_226, %c0_227, %c0_228] : memref<8x32x32xf32, #tpu.memory_space<vmem>>, vector<1x32x32xf32>
    %405 = vector.shape_cast %404 : vector<1x32x32xf32> to vector<32x32xf32>
    %cst_229 = arith.constant dense<0.000000e+00> : vector<1x32xf32>
    %406 = tpu.matmul %401, %405, %cst_229 {dimension_numbers = #tpu.dot_dimension_numbers<[1], [0], [0], [1], [0, 0, 1, 1], [], []>} : vector<1x32xf32>, vector<32x32xf32>, vector<1x32xf32> -> vector<1x32xf32>
    %407 = arith.addf %403, %406 : vector<1x32xf32>
    %408 = arith.negf %407 : vector<1x32xf32>
    %409 = math.exp %408 : vector<1x32xf32>
    %cst_230 = arith.constant 1.000000e+00 : f32
    %410 = vector.broadcast %cst_230 : f32 to vector<1x32xf32>
    %411 = arith.addf %410, %409 : vector<1x32xf32>
    %412 = arith.divf %410, %411 : vector<1x32xf32>
    %413 = vector.extract_strided_slice %386 {offsets = [0, 0], sizes = [1, 32], strides = [1, 1]} : vector<8x32xf32> to vector<1x32xf32>
    %c5_231 = arith.constant 5 : index
    %c0_232 = arith.constant 0 : index
    %c0_233 = arith.constant 0 : index
    %414 = vector.load %arg5[%c5_231, %c0_232, %c0_233] : memref<8x32x32xf32, #tpu.memory_space<vmem>>, vector<1x32x32xf32>
    %415 = vector.shape_cast %414 : vector<1x32x32xf32> to vector<32x32xf32>
    %cst_234 = arith.constant dense<0.000000e+00> : vector<1x32xf32>
    %416 = tpu.matmul %401, %415, %cst_234 {dimension_numbers = #tpu.dot_dimension_numbers<[1], [0], [0], [1], [0, 0, 1, 1], [], []>} : vector<1x32xf32>, vector<32x32xf32>, vector<1x32xf32> -> vector<1x32xf32>
    %417 = arith.addf %413, %416 : vector<1x32xf32>
    %418 = arith.negf %417 : vector<1x32xf32>
    %419 = math.exp %418 : vector<1x32xf32>
    %cst_235 = arith.constant 1.000000e+00 : f32
    %420 = vector.broadcast %cst_235 : f32 to vector<1x32xf32>
    %421 = arith.addf %420, %419 : vector<1x32xf32>
    %422 = arith.divf %420, %421 : vector<1x32xf32>
    %423 = vector.extract_strided_slice %393 {offsets = [0, 0], sizes = [1, 32], strides = [1, 1]} : vector<8x32xf32> to vector<1x32xf32>
    %c6_236 = arith.constant 6 : index
    %c0_237 = arith.constant 0 : index
    %c0_238 = arith.constant 0 : index
    %424 = vector.load %arg5[%c6_236, %c0_237, %c0_238] : memref<8x32x32xf32, #tpu.memory_space<vmem>>, vector<1x32x32xf32>
    %425 = vector.shape_cast %424 : vector<1x32x32xf32> to vector<32x32xf32>
    %cst_239 = arith.constant dense<0.000000e+00> : vector<1x32xf32>
    %426 = tpu.matmul %401, %425, %cst_239 {dimension_numbers = #tpu.dot_dimension_numbers<[1], [0], [0], [1], [0, 0, 1, 1], [], []>} : vector<1x32xf32>, vector<32x32xf32>, vector<1x32xf32> -> vector<1x32xf32>
    %427 = arith.addf %423, %426 : vector<1x32xf32>
    %428 = math.tanh %427 : vector<1x32xf32>
    %429 = vector.extract_strided_slice %400 {offsets = [0, 0], sizes = [1, 32], strides = [1, 1]} : vector<8x32xf32> to vector<1x32xf32>
    %c7_240 = arith.constant 7 : index
    %c0_241 = arith.constant 0 : index
    %c0_242 = arith.constant 0 : index
    %430 = vector.load %arg5[%c7_240, %c0_241, %c0_242] : memref<8x32x32xf32, #tpu.memory_space<vmem>>, vector<1x32x32xf32>
    %431 = vector.shape_cast %430 : vector<1x32x32xf32> to vector<32x32xf32>
    %cst_243 = arith.constant dense<0.000000e+00> : vector<1x32xf32>
    %432 = tpu.matmul %401, %431, %cst_243 {dimension_numbers = #tpu.dot_dimension_numbers<[1], [0], [0], [1], [0, 0, 1, 1], [], []>} : vector<1x32xf32>, vector<32x32xf32>, vector<1x32xf32> -> vector<1x32xf32>
    %433 = arith.addf %429, %432 : vector<1x32xf32>
    %434 = arith.negf %433 : vector<1x32xf32>
    %435 = math.exp %434 : vector<1x32xf32>
    %cst_244 = arith.constant 1.000000e+00 : f32
    %436 = vector.broadcast %cst_244 : f32 to vector<1x32xf32>
    %437 = arith.addf %436, %435 : vector<1x32xf32>
    %438 = arith.divf %436, %437 : vector<1x32xf32>
    %439 = arith.mulf %422, %402 : vector<1x32xf32>
    %440 = arith.mulf %412, %428 : vector<1x32xf32>
    %441 = arith.addf %439, %440 : vector<1x32xf32>
    %442 = math.tanh %441 : vector<1x32xf32>
    %443 = arith.mulf %438, %442 : vector<1x32xf32>
    %c0_245 = arith.constant 0 : index
    %c0_246 = arith.constant 0 : index
    %444 = vector.load %arg27[%c0_245, %c0_246] : memref<8x32xf32, #tpu.memory_space<vmem>>, vector<1x32xf32>
    tpu.vector_store %arg27[%c0_245, %c0_246], %443 {strides = array<i32>} : memref<8x32xf32, #tpu.memory_space<vmem>>, vector<1x32xf32>,
    %445 = vector.extract_strided_slice %379 {offsets = [1, 0], sizes = [1, 32], strides = [1, 1]} : vector<8x32xf32> to vector<1x32xf32>
    %c4_247 = arith.constant 4 : index
    %c0_248 = arith.constant 0 : index
    %c0_249 = arith.constant 0 : index
    %446 = vector.load %arg5[%c4_247, %c0_248, %c0_249] : memref<8x32x32xf32, #tpu.memory_space<vmem>>, vector<1x32x32xf32>
    %447 = vector.shape_cast %446 : vector<1x32x32xf32> to vector<32x32xf32>
    %cst_250 = arith.constant dense<0.000000e+00> : vector<1x32xf32>
    %448 = tpu.matmul %443, %447, %cst_250 {dimension_numbers = #tpu.dot_dimension_numbers<[1], [0], [0], [1], [0, 0, 1, 1], [], []>} : vector<1x32xf32>, vector<32x32xf32>, vector<1x32xf32> -> vector<1x32xf32>
    %449 = arith.addf %445, %448 : vector<1x32xf32>
    %450 = arith.negf %449 : vector<1x32xf32>
    %451 = math.exp %450 : vector<1x32xf32>
    %cst_251 = arith.constant 1.000000e+00 : f32
    %452 = vector.broadcast %cst_251 : f32 to vector<1x32xf32>
    %453 = arith.addf %452, %451 : vector<1x32xf32>
    %454 = arith.divf %452, %453 : vector<1x32xf32>
    %455 = vector.extract_strided_slice %386 {offsets = [1, 0], sizes = [1, 32], strides = [1, 1]} : vector<8x32xf32> to vector<1x32xf32>
    %c5_252 = arith.constant 5 : index
    %c0_253 = arith.constant 0 : index
    %c0_254 = arith.constant 0 : index
    %456 = vector.load %arg5[%c5_252, %c0_253, %c0_254] : memref<8x32x32xf32, #tpu.memory_space<vmem>>, vector<1x32x32xf32>
    %457 = vector.shape_cast %456 : vector<1x32x32xf32> to vector<32x32xf32>
    %cst_255 = arith.constant dense<0.000000e+00> : vector<1x32xf32>
    %458 = tpu.matmul %443, %457, %cst_255 {dimension_numbers = #tpu.dot_dimension_numbers<[1], [0], [0], [1], [0, 0, 1, 1], [], []>} : vector<1x32xf32>, vector<32x32xf32>, vector<1x32xf32> -> vector<1x32xf32>
    %459 = arith.addf %455, %458 : vector<1x32xf32>
    %460 = arith.negf %459 : vector<1x32xf32>
    %461 = math.exp %460 : vector<1x32xf32>
    %cst_256 = arith.constant 1.000000e+00 : f32
    %462 = vector.broadcast %cst_256 : f32 to vector<1x32xf32>
    %463 = arith.addf %462, %461 : vector<1x32xf32>
    %464 = arith.divf %462, %463 : vector<1x32xf32>
    %465 = vector.extract_strided_slice %393 {offsets = [1, 0], sizes = [1, 32], strides = [1, 1]} : vector<8x32xf32> to vector<1x32xf32>
    %c6_257 = arith.constant 6 : index
    %c0_258 = arith.constant 0 : index
    %c0_259 = arith.constant 0 : index
    %466 = vector.load %arg5[%c6_257, %c0_258, %c0_259] : memref<8x32x32xf32, #tpu.memory_space<vmem>>, vector<1x32x32xf32>
    %467 = vector.shape_cast %466 : vector<1x32x32xf32> to vector<32x32xf32>
    %cst_260 = arith.constant dense<0.000000e+00> : vector<1x32xf32>
    %468 = tpu.matmul %443, %467, %cst_260 {dimension_numbers = #tpu.dot_dimension_numbers<[1], [0], [0], [1], [0, 0, 1, 1], [], []>} : vector<1x32xf32>, vector<32x32xf32>, vector<1x32xf32> -> vector<1x32xf32>
    %469 = arith.addf %465, %468 : vector<1x32xf32>
    %470 = math.tanh %469 : vector<1x32xf32>
    %471 = vector.extract_strided_slice %400 {offsets = [1, 0], sizes = [1, 32], strides = [1, 1]} : vector<8x32xf32> to vector<1x32xf32>
    %c7_261 = arith.constant 7 : index
    %c0_262 = arith.constant 0 : index
    %c0_263 = arith.constant 0 : index
    %472 = vector.load %arg5[%c7_261, %c0_262, %c0_263] : memref<8x32x32xf32, #tpu.memory_space<vmem>>, vector<1x32x32xf32>
    %473 = vector.shape_cast %472 : vector<1x32x32xf32> to vector<32x32xf32>
    %cst_264 = arith.constant dense<0.000000e+00> : vector<1x32xf32>
    %474 = tpu.matmul %443, %473, %cst_264 {dimension_numbers = #tpu.dot_dimension_numbers<[1], [0], [0], [1], [0, 0, 1, 1], [], []>} : vector<1x32xf32>, vector<32x32xf32>, vector<1x32xf32> -> vector<1x32xf32>
    %475 = arith.addf %471, %474 : vector<1x32xf32>
    %476 = arith.negf %475 : vector<1x32xf32>
    %477 = math.exp %476 : vector<1x32xf32>
    %cst_265 = arith.constant 1.000000e+00 : f32
    %478 = vector.broadcast %cst_265 : f32 to vector<1x32xf32>
    %479 = arith.addf %478, %477 : vector<1x32xf32>
    %480 = arith.divf %478, %479 : vector<1x32xf32>
    %481 = arith.mulf %464, %441 : vector<1x32xf32>
    %482 = arith.mulf %454, %470 : vector<1x32xf32>
    %483 = arith.addf %481, %482 : vector<1x32xf32>
    %484 = math.tanh %483 : vector<1x32xf32>
    %485 = arith.mulf %480, %484 : vector<1x32xf32>
    %c1_266 = arith.constant 1 : index
    %c0_267 = arith.constant 0 : index
    %486 = vector.load %arg27[%c1_266, %c0_267] : memref<8x32xf32, #tpu.memory_space<vmem>>, vector<1x32xf32>
    tpu.vector_store %arg27[%c1_266, %c0_267], %485 {strides = array<i32>} : memref<8x32xf32, #tpu.memory_space<vmem>>, vector<1x32xf32>,
    %487 = vector.extract_strided_slice %379 {offsets = [2, 0], sizes = [1, 32], strides = [1, 1]} : vector<8x32xf32> to vector<1x32xf32>
    %c4_268 = arith.constant 4 : index
    %c0_269 = arith.constant 0 : index
    %c0_270 = arith.constant 0 : index
    %488 = vector.load %arg5[%c4_268, %c0_269, %c0_270] : memref<8x32x32xf32, #tpu.memory_space<vmem>>, vector<1x32x32xf32>
    %489 = vector.shape_cast %488 : vector<1x32x32xf32> to vector<32x32xf32>
    %cst_271 = arith.constant dense<0.000000e+00> : vector<1x32xf32>
    %490 = tpu.matmul %485, %489, %cst_271 {dimension_numbers = #tpu.dot_dimension_numbers<[1], [0], [0], [1], [0, 0, 1, 1], [], []>} : vector<1x32xf32>, vector<32x32xf32>, vector<1x32xf32> -> vector<1x32xf32>
    %491 = arith.addf %487, %490 : vector<1x32xf32>
    %492 = arith.negf %491 : vector<1x32xf32>
    %493 = math.exp %492 : vector<1x32xf32>
    %cst_272 = arith.constant 1.000000e+00 : f32
    %494 = vector.broadcast %cst_272 : f32 to vector<1x32xf32>
    %495 = arith.addf %494, %493 : vector<1x32xf32>
    %496 = arith.divf %494, %495 : vector<1x32xf32>
    %497 = vector.extract_strided_slice %386 {offsets = [2, 0], sizes = [1, 32], strides = [1, 1]} : vector<8x32xf32> to vector<1x32xf32>
    %c5_273 = arith.constant 5 : index
    %c0_274 = arith.constant 0 : index
    %c0_275 = arith.constant 0 : index
    %498 = vector.load %arg5[%c5_273, %c0_274, %c0_275] : memref<8x32x32xf32, #tpu.memory_space<vmem>>, vector<1x32x32xf32>
    %499 = vector.shape_cast %498 : vector<1x32x32xf32> to vector<32x32xf32>
    %cst_276 = arith.constant dense<0.000000e+00> : vector<1x32xf32>
    %500 = tpu.matmul %485, %499, %cst_276 {dimension_numbers = #tpu.dot_dimension_numbers<[1], [0], [0], [1], [0, 0, 1, 1], [], []>} : vector<1x32xf32>, vector<32x32xf32>, vector<1x32xf32> -> vector<1x32xf32>
    %501 = arith.addf %497, %500 : vector<1x32xf32>
    %502 = arith.negf %501 : vector<1x32xf32>
    %503 = math.exp %502 : vector<1x32xf32>
    %cst_277 = arith.constant 1.000000e+00 : f32
    %504 = vector.broadcast %cst_277 : f32 to vector<1x32xf32>
    %505 = arith.addf %504, %503 : vector<1x32xf32>
    %506 = arith.divf %504, %505 : vector<1x32xf32>
    %507 = vector.extract_strided_slice %393 {offsets = [2, 0], sizes = [1, 32], strides = [1, 1]} : vector<8x32xf32> to vector<1x32xf32>
    %c6_278 = arith.constant 6 : index
    %c0_279 = arith.constant 0 : index
    %c0_280 = arith.constant 0 : index
    %508 = vector.load %arg5[%c6_278, %c0_279, %c0_280] : memref<8x32x32xf32, #tpu.memory_space<vmem>>, vector<1x32x32xf32>
    %509 = vector.shape_cast %508 : vector<1x32x32xf32> to vector<32x32xf32>
    %cst_281 = arith.constant dense<0.000000e+00> : vector<1x32xf32>
    %510 = tpu.matmul %485, %509, %cst_281 {dimension_numbers = #tpu.dot_dimension_numbers<[1], [0], [0], [1], [0, 0, 1, 1], [], []>} : vector<1x32xf32>, vector<32x32xf32>, vector<1x32xf32> -> vector<1x32xf32>
    %511 = arith.addf %507, %510 : vector<1x32xf32>
    %512 = math.tanh %511 : vector<1x32xf32>
    %513 = vector.extract_strided_slice %400 {offsets = [2, 0], sizes = [1, 32], strides = [1, 1]} : vector<8x32xf32> to vector<1x32xf32>
    %c7_282 = arith.constant 7 : index
    %c0_283 = arith.constant 0 : index
    %c0_284 = arith.constant 0 : index
    %514 = vector.load %arg5[%c7_282, %c0_283, %c0_284] : memref<8x32x32xf32, #tpu.memory_space<vmem>>, vector<1x32x32xf32>
    %515 = vector.shape_cast %514 : vector<1x32x32xf32> to vector<32x32xf32>
    %cst_285 = arith.constant dense<0.000000e+00> : vector<1x32xf32>
    %516 = tpu.matmul %485, %515, %cst_285 {dimension_numbers = #tpu.dot_dimension_numbers<[1], [0], [0], [1], [0, 0, 1, 1], [], []>} : vector<1x32xf32>, vector<32x32xf32>, vector<1x32xf32> -> vector<1x32xf32>
    %517 = arith.addf %513, %516 : vector<1x32xf32>
    %518 = arith.negf %517 : vector<1x32xf32>
    %519 = math.exp %518 : vector<1x32xf32>
    %cst_286 = arith.constant 1.000000e+00 : f32
    %520 = vector.broadcast %cst_286 : f32 to vector<1x32xf32>
    %521 = arith.addf %520, %519 : vector<1x32xf32>
    %522 = arith.divf %520, %521 : vector<1x32xf32>
    %523 = arith.mulf %506, %483 : vector<1x32xf32>
    %524 = arith.mulf %496, %512 : vector<1x32xf32>
    %525 = arith.addf %523, %524 : vector<1x32xf32>
    %526 = math.tanh %525 : vector<1x32xf32>
    %527 = arith.mulf %522, %526 : vector<1x32xf32>
    %c2_287 = arith.constant 2 : index
    %c0_288 = arith.constant 0 : index
    %528 = vector.load %arg27[%c2_287, %c0_288] : memref<8x32xf32, #tpu.memory_space<vmem>>, vector<1x32xf32>
    tpu.vector_store %arg27[%c2_287, %c0_288], %527 {strides = array<i32>} : memref<8x32xf32, #tpu.memory_space<vmem>>, vector<1x32xf32>,
    %529 = vector.extract_strided_slice %379 {offsets = [3, 0], sizes = [1, 32], strides = [1, 1]} : vector<8x32xf32> to vector<1x32xf32>
    %c4_289 = arith.constant 4 : index
    %c0_290 = arith.constant 0 : index
    %c0_291 = arith.constant 0 : index
    %530 = vector.load %arg5[%c4_289, %c0_290, %c0_291] : memref<8x32x32xf32, #tpu.memory_space<vmem>>, vector<1x32x32xf32>
    %531 = vector.shape_cast %530 : vector<1x32x32xf32> to vector<32x32xf32>
    %cst_292 = arith.constant dense<0.000000e+00> : vector<1x32xf32>
    %532 = tpu.matmul %527, %531, %cst_292 {dimension_numbers = #tpu.dot_dimension_numbers<[1], [0], [0], [1], [0, 0, 1, 1], [], []>} : vector<1x32xf32>, vector<32x32xf32>, vector<1x32xf32> -> vector<1x32xf32>
    %533 = arith.addf %529, %532 : vector<1x32xf32>
    %534 = arith.negf %533 : vector<1x32xf32>
    %535 = math.exp %534 : vector<1x32xf32>
    %cst_293 = arith.constant 1.000000e+00 : f32
    %536 = vector.broadcast %cst_293 : f32 to vector<1x32xf32>
    %537 = arith.addf %536, %535 : vector<1x32xf32>
    %538 = arith.divf %536, %537 : vector<1x32xf32>
    %539 = vector.extract_strided_slice %386 {offsets = [3, 0], sizes = [1, 32], strides = [1, 1]} : vector<8x32xf32> to vector<1x32xf32>
    %c5_294 = arith.constant 5 : index
    %c0_295 = arith.constant 0 : index
    %c0_296 = arith.constant 0 : index
    %540 = vector.load %arg5[%c5_294, %c0_295, %c0_296] : memref<8x32x32xf32, #tpu.memory_space<vmem>>, vector<1x32x32xf32>
    %541 = vector.shape_cast %540 : vector<1x32x32xf32> to vector<32x32xf32>
    %cst_297 = arith.constant dense<0.000000e+00> : vector<1x32xf32>
    %542 = tpu.matmul %527, %541, %cst_297 {dimension_numbers = #tpu.dot_dimension_numbers<[1], [0], [0], [1], [0, 0, 1, 1], [], []>} : vector<1x32xf32>, vector<32x32xf32>, vector<1x32xf32> -> vector<1x32xf32>
    %543 = arith.addf %539, %542 : vector<1x32xf32>
    %544 = arith.negf %543 : vector<1x32xf32>
    %545 = math.exp %544 : vector<1x32xf32>
    %cst_298 = arith.constant 1.000000e+00 : f32
    %546 = vector.broadcast %cst_298 : f32 to vector<1x32xf32>
    %547 = arith.addf %546, %545 : vector<1x32xf32>
    %548 = arith.divf %546, %547 : vector<1x32xf32>
    %549 = vector.extract_strided_slice %393 {offsets = [3, 0], sizes = [1, 32], strides = [1, 1]} : vector<8x32xf32> to vector<1x32xf32>
    %c6_299 = arith.constant 6 : index
    %c0_300 = arith.constant 0 : index
    %c0_301 = arith.constant 0 : index
    %550 = vector.load %arg5[%c6_299, %c0_300, %c0_301] : memref<8x32x32xf32, #tpu.memory_space<vmem>>, vector<1x32x32xf32>
    %551 = vector.shape_cast %550 : vector<1x32x32xf32> to vector<32x32xf32>
    %cst_302 = arith.constant dense<0.000000e+00> : vector<1x32xf32>
    %552 = tpu.matmul %527, %551, %cst_302 {dimension_numbers = #tpu.dot_dimension_numbers<[1], [0], [0], [1], [0, 0, 1, 1], [], []>} : vector<1x32xf32>, vector<32x32xf32>, vector<1x32xf32> -> vector<1x32xf32>
    %553 = arith.addf %549, %552 : vector<1x32xf32>
    %554 = math.tanh %553 : vector<1x32xf32>
    %555 = vector.extract_strided_slice %400 {offsets = [3, 0], sizes = [1, 32], strides = [1, 1]} : vector<8x32xf32> to vector<1x32xf32>
    %c7_303 = arith.constant 7 : index
    %c0_304 = arith.constant 0 : index
    %c0_305 = arith.constant 0 : index
    %556 = vector.load %arg5[%c7_303, %c0_304, %c0_305] : memref<8x32x32xf32, #tpu.memory_space<vmem>>, vector<1x32x32xf32>
    %557 = vector.shape_cast %556 : vector<1x32x32xf32> to vector<32x32xf32>
    %cst_306 = arith.constant dense<0.000000e+00> : vector<1x32xf32>
    %558 = tpu.matmul %527, %557, %cst_306 {dimension_numbers = #tpu.dot_dimension_numbers<[1], [0], [0], [1], [0, 0, 1, 1], [], []>} : vector<1x32xf32>, vector<32x32xf32>, vector<1x32xf32> -> vector<1x32xf32>
    %559 = arith.addf %555, %558 : vector<1x32xf32>
    %560 = arith.negf %559 : vector<1x32xf32>
    %561 = math.exp %560 : vector<1x32xf32>
    %cst_307 = arith.constant 1.000000e+00 : f32
    %562 = vector.broadcast %cst_307 : f32 to vector<1x32xf32>
    %563 = arith.addf %562, %561 : vector<1x32xf32>
    %564 = arith.divf %562, %563 : vector<1x32xf32>
    %565 = arith.mulf %548, %525 : vector<1x32xf32>
    %566 = arith.mulf %538, %554 : vector<1x32xf32>
    %567 = arith.addf %565, %566 : vector<1x32xf32>
    %568 = math.tanh %567 : vector<1x32xf32>
    %569 = arith.mulf %564, %568 : vector<1x32xf32>
    %c3_308 = arith.constant 3 : index
    %c0_309 = arith.constant 0 : index
    %570 = vector.load %arg27[%c3_308, %c0_309] : memref<8x32xf32, #tpu.memory_space<vmem>>, vector<1x32xf32>
    tpu.vector_store %arg27[%c3_308, %c0_309], %569 {strides = array<i32>} : memref<8x32xf32, #tpu.memory_space<vmem>>, vector<1x32xf32>,
    %571 = vector.extract_strided_slice %379 {offsets = [4, 0], sizes = [1, 32], strides = [1, 1]} : vector<8x32xf32> to vector<1x32xf32>
    %c4_310 = arith.constant 4 : index
    %c0_311 = arith.constant 0 : index
    %c0_312 = arith.constant 0 : index
    %572 = vector.load %arg5[%c4_310, %c0_311, %c0_312] : memref<8x32x32xf32, #tpu.memory_space<vmem>>, vector<1x32x32xf32>
    %573 = vector.shape_cast %572 : vector<1x32x32xf32> to vector<32x32xf32>
    %cst_313 = arith.constant dense<0.000000e+00> : vector<1x32xf32>
    %574 = tpu.matmul %569, %573, %cst_313 {dimension_numbers = #tpu.dot_dimension_numbers<[1], [0], [0], [1], [0, 0, 1, 1], [], []>} : vector<1x32xf32>, vector<32x32xf32>, vector<1x32xf32> -> vector<1x32xf32>
    %575 = arith.addf %571, %574 : vector<1x32xf32>
    %576 = arith.negf %575 : vector<1x32xf32>
    %577 = math.exp %576 : vector<1x32xf32>
    %cst_314 = arith.constant 1.000000e+00 : f32
    %578 = vector.broadcast %cst_314 : f32 to vector<1x32xf32>
    %579 = arith.addf %578, %577 : vector<1x32xf32>
    %580 = arith.divf %578, %579 : vector<1x32xf32>
    %581 = vector.extract_strided_slice %386 {offsets = [4, 0], sizes = [1, 32], strides = [1, 1]} : vector<8x32xf32> to vector<1x32xf32>
    %c5_315 = arith.constant 5 : index
    %c0_316 = arith.constant 0 : index
    %c0_317 = arith.constant 0 : index
    %582 = vector.load %arg5[%c5_315, %c0_316, %c0_317] : memref<8x32x32xf32, #tpu.memory_space<vmem>>, vector<1x32x32xf32>
    %583 = vector.shape_cast %582 : vector<1x32x32xf32> to vector<32x32xf32>
    %cst_318 = arith.constant dense<0.000000e+00> : vector<1x32xf32>
    %584 = tpu.matmul %569, %583, %cst_318 {dimension_numbers = #tpu.dot_dimension_numbers<[1], [0], [0], [1], [0, 0, 1, 1], [], []>} : vector<1x32xf32>, vector<32x32xf32>, vector<1x32xf32> -> vector<1x32xf32>
    %585 = arith.addf %581, %584 : vector<1x32xf32>
    %586 = arith.negf %585 : vector<1x32xf32>
    %587 = math.exp %586 : vector<1x32xf32>
    %cst_319 = arith.constant 1.000000e+00 : f32
    %588 = vector.broadcast %cst_319 : f32 to vector<1x32xf32>
    %589 = arith.addf %588, %587 : vector<1x32xf32>
    %590 = arith.divf %588, %589 : vector<1x32xf32>
    %591 = vector.extract_strided_slice %393 {offsets = [4, 0], sizes = [1, 32], strides = [1, 1]} : vector<8x32xf32> to vector<1x32xf32>
    %c6_320 = arith.constant 6 : index
    %c0_321 = arith.constant 0 : index
    %c0_322 = arith.constant 0 : index
    %592 = vector.load %arg5[%c6_320, %c0_321, %c0_322] : memref<8x32x32xf32, #tpu.memory_space<vmem>>, vector<1x32x32xf32>
    %593 = vector.shape_cast %592 : vector<1x32x32xf32> to vector<32x32xf32>
    %cst_323 = arith.constant dense<0.000000e+00> : vector<1x32xf32>
    %594 = tpu.matmul %569, %593, %cst_323 {dimension_numbers = #tpu.dot_dimension_numbers<[1], [0], [0], [1], [0, 0, 1, 1], [], []>} : vector<1x32xf32>, vector<32x32xf32>, vector<1x32xf32> -> vector<1x32xf32>
    %595 = arith.addf %591, %594 : vector<1x32xf32>
    %596 = math.tanh %595 : vector<1x32xf32>
    %597 = vector.extract_strided_slice %400 {offsets = [4, 0], sizes = [1, 32], strides = [1, 1]} : vector<8x32xf32> to vector<1x32xf32>
    %c7_324 = arith.constant 7 : index
    %c0_325 = arith.constant 0 : index
    %c0_326 = arith.constant 0 : index
    %598 = vector.load %arg5[%c7_324, %c0_325, %c0_326] : memref<8x32x32xf32, #tpu.memory_space<vmem>>, vector<1x32x32xf32>
    %599 = vector.shape_cast %598 : vector<1x32x32xf32> to vector<32x32xf32>
    %cst_327 = arith.constant dense<0.000000e+00> : vector<1x32xf32>
    %600 = tpu.matmul %569, %599, %cst_327 {dimension_numbers = #tpu.dot_dimension_numbers<[1], [0], [0], [1], [0, 0, 1, 1], [], []>} : vector<1x32xf32>, vector<32x32xf32>, vector<1x32xf32> -> vector<1x32xf32>
    %601 = arith.addf %597, %600 : vector<1x32xf32>
    %602 = arith.negf %601 : vector<1x32xf32>
    %603 = math.exp %602 : vector<1x32xf32>
    %cst_328 = arith.constant 1.000000e+00 : f32
    %604 = vector.broadcast %cst_328 : f32 to vector<1x32xf32>
    %605 = arith.addf %604, %603 : vector<1x32xf32>
    %606 = arith.divf %604, %605 : vector<1x32xf32>
    %607 = arith.mulf %590, %567 : vector<1x32xf32>
    %608 = arith.mulf %580, %596 : vector<1x32xf32>
    %609 = arith.addf %607, %608 : vector<1x32xf32>
    %610 = math.tanh %609 : vector<1x32xf32>
    %611 = arith.mulf %606, %610 : vector<1x32xf32>
    %c4_329 = arith.constant 4 : index
    %c0_330 = arith.constant 0 : index
    %612 = vector.load %arg27[%c4_329, %c0_330] : memref<8x32xf32, #tpu.memory_space<vmem>>, vector<1x32xf32>
    tpu.vector_store %arg27[%c4_329, %c0_330], %611 {strides = array<i32>} : memref<8x32xf32, #tpu.memory_space<vmem>>, vector<1x32xf32>,
    %613 = vector.extract_strided_slice %379 {offsets = [5, 0], sizes = [1, 32], strides = [1, 1]} : vector<8x32xf32> to vector<1x32xf32>
    %c4_331 = arith.constant 4 : index
    %c0_332 = arith.constant 0 : index
    %c0_333 = arith.constant 0 : index
    %614 = vector.load %arg5[%c4_331, %c0_332, %c0_333] : memref<8x32x32xf32, #tpu.memory_space<vmem>>, vector<1x32x32xf32>
    %615 = vector.shape_cast %614 : vector<1x32x32xf32> to vector<32x32xf32>
    %cst_334 = arith.constant dense<0.000000e+00> : vector<1x32xf32>
    %616 = tpu.matmul %611, %615, %cst_334 {dimension_numbers = #tpu.dot_dimension_numbers<[1], [0], [0], [1], [0, 0, 1, 1], [], []>} : vector<1x32xf32>, vector<32x32xf32>, vector<1x32xf32> -> vector<1x32xf32>
    %617 = arith.addf %613, %616 : vector<1x32xf32>
    %618 = arith.negf %617 : vector<1x32xf32>
    %619 = math.exp %618 : vector<1x32xf32>
    %cst_335 = arith.constant 1.000000e+00 : f32
    %620 = vector.broadcast %cst_335 : f32 to vector<1x32xf32>
    %621 = arith.addf %620, %619 : vector<1x32xf32>
    %622 = arith.divf %620, %621 : vector<1x32xf32>
    %623 = vector.extract_strided_slice %386 {offsets = [5, 0], sizes = [1, 32], strides = [1, 1]} : vector<8x32xf32> to vector<1x32xf32>
    %c5_336 = arith.constant 5 : index
    %c0_337 = arith.constant 0 : index
    %c0_338 = arith.constant 0 : index
    %624 = vector.load %arg5[%c5_336, %c0_337, %c0_338] : memref<8x32x32xf32, #tpu.memory_space<vmem>>, vector<1x32x32xf32>
    %625 = vector.shape_cast %624 : vector<1x32x32xf32> to vector<32x32xf32>
    %cst_339 = arith.constant dense<0.000000e+00> : vector<1x32xf32>
    %626 = tpu.matmul %611, %625, %cst_339 {dimension_numbers = #tpu.dot_dimension_numbers<[1], [0], [0], [1], [0, 0, 1, 1], [], []>} : vector<1x32xf32>, vector<32x32xf32>, vector<1x32xf32> -> vector<1x32xf32>
    %627 = arith.addf %623, %626 : vector<1x32xf32>
    %628 = arith.negf %627 : vector<1x32xf32>
    %629 = math.exp %628 : vector<1x32xf32>
    %cst_340 = arith.constant 1.000000e+00 : f32
    %630 = vector.broadcast %cst_340 : f32 to vector<1x32xf32>
    %631 = arith.addf %630, %629 : vector<1x32xf32>
    %632 = arith.divf %630, %631 : vector<1x32xf32>
    %633 = vector.extract_strided_slice %393 {offsets = [5, 0], sizes = [1, 32], strides = [1, 1]} : vector<8x32xf32> to vector<1x32xf32>
    %c6_341 = arith.constant 6 : index
    %c0_342 = arith.constant 0 : index
    %c0_343 = arith.constant 0 : index
    %634 = vector.load %arg5[%c6_341, %c0_342, %c0_343] : memref<8x32x32xf32, #tpu.memory_space<vmem>>, vector<1x32x32xf32>
    %635 = vector.shape_cast %634 : vector<1x32x32xf32> to vector<32x32xf32>
    %cst_344 = arith.constant dense<0.000000e+00> : vector<1x32xf32>
    %636 = tpu.matmul %611, %635, %cst_344 {dimension_numbers = #tpu.dot_dimension_numbers<[1], [0], [0], [1], [0, 0, 1, 1], [], []>} : vector<1x32xf32>, vector<32x32xf32>, vector<1x32xf32> -> vector<1x32xf32>
    %637 = arith.addf %633, %636 : vector<1x32xf32>
    %638 = math.tanh %637 : vector<1x32xf32>
    %639 = vector.extract_strided_slice %400 {offsets = [5, 0], sizes = [1, 32], strides = [1, 1]} : vector<8x32xf32> to vector<1x32xf32>
    %c7_345 = arith.constant 7 : index
    %c0_346 = arith.constant 0 : index
    %c0_347 = arith.constant 0 : index
    %640 = vector.load %arg5[%c7_345, %c0_346, %c0_347] : memref<8x32x32xf32, #tpu.memory_space<vmem>>, vector<1x32x32xf32>
    %641 = vector.shape_cast %640 : vector<1x32x32xf32> to vector<32x32xf32>
    %cst_348 = arith.constant dense<0.000000e+00> : vector<1x32xf32>
    %642 = tpu.matmul %611, %641, %cst_348 {dimension_numbers = #tpu.dot_dimension_numbers<[1], [0], [0], [1], [0, 0, 1, 1], [], []>} : vector<1x32xf32>, vector<32x32xf32>, vector<1x32xf32> -> vector<1x32xf32>
    %643 = arith.addf %639, %642 : vector<1x32xf32>
    %644 = arith.negf %643 : vector<1x32xf32>
    %645 = math.exp %644 : vector<1x32xf32>
    %cst_349 = arith.constant 1.000000e+00 : f32
    %646 = vector.broadcast %cst_349 : f32 to vector<1x32xf32>
    %647 = arith.addf %646, %645 : vector<1x32xf32>
    %648 = arith.divf %646, %647 : vector<1x32xf32>
    %649 = arith.mulf %632, %609 : vector<1x32xf32>
    %650 = arith.mulf %622, %638 : vector<1x32xf32>
    %651 = arith.addf %649, %650 : vector<1x32xf32>
    %652 = math.tanh %651 : vector<1x32xf32>
    %653 = arith.mulf %648, %652 : vector<1x32xf32>
    %c5_350 = arith.constant 5 : index
    %c0_351 = arith.constant 0 : index
    %654 = vector.load %arg27[%c5_350, %c0_351] : memref<8x32xf32, #tpu.memory_space<vmem>>, vector<1x32xf32>
    tpu.vector_store %arg27[%c5_350, %c0_351], %653 {strides = array<i32>} : memref<8x32xf32, #tpu.memory_space<vmem>>, vector<1x32xf32>,
    %655 = vector.extract_strided_slice %379 {offsets = [6, 0], sizes = [1, 32], strides = [1, 1]} : vector<8x32xf32> to vector<1x32xf32>
    %c4_352 = arith.constant 4 : index
    %c0_353 = arith.constant 0 : index
    %c0_354 = arith.constant 0 : index
    %656 = vector.load %arg5[%c4_352, %c0_353, %c0_354] : memref<8x32x32xf32, #tpu.memory_space<vmem>>, vector<1x32x32xf32>
    %657 = vector.shape_cast %656 : vector<1x32x32xf32> to vector<32x32xf32>
    %cst_355 = arith.constant dense<0.000000e+00> : vector<1x32xf32>
    %658 = tpu.matmul %653, %657, %cst_355 {dimension_numbers = #tpu.dot_dimension_numbers<[1], [0], [0], [1], [0, 0, 1, 1], [], []>} : vector<1x32xf32>, vector<32x32xf32>, vector<1x32xf32> -> vector<1x32xf32>
    %659 = arith.addf %655, %658 : vector<1x32xf32>
    %660 = arith.negf %659 : vector<1x32xf32>
    %661 = math.exp %660 : vector<1x32xf32>
    %cst_356 = arith.constant 1.000000e+00 : f32
    %662 = vector.broadcast %cst_356 : f32 to vector<1x32xf32>
    %663 = arith.addf %662, %661 : vector<1x32xf32>
    %664 = arith.divf %662, %663 : vector<1x32xf32>
    %665 = vector.extract_strided_slice %386 {offsets = [6, 0], sizes = [1, 32], strides = [1, 1]} : vector<8x32xf32> to vector<1x32xf32>
    %c5_357 = arith.constant 5 : index
    %c0_358 = arith.constant 0 : index
    %c0_359 = arith.constant 0 : index
    %666 = vector.load %arg5[%c5_357, %c0_358, %c0_359] : memref<8x32x32xf32, #tpu.memory_space<vmem>>, vector<1x32x32xf32>
    %667 = vector.shape_cast %666 : vector<1x32x32xf32> to vector<32x32xf32>
    %cst_360 = arith.constant dense<0.000000e+00> : vector<1x32xf32>
    %668 = tpu.matmul %653, %667, %cst_360 {dimension_numbers = #tpu.dot_dimension_numbers<[1], [0], [0], [1], [0, 0, 1, 1], [], []>} : vector<1x32xf32>, vector<32x32xf32>, vector<1x32xf32> -> vector<1x32xf32>
    %669 = arith.addf %665, %668 : vector<1x32xf32>
    %670 = arith.negf %669 : vector<1x32xf32>
    %671 = math.exp %670 : vector<1x32xf32>
    %cst_361 = arith.constant 1.000000e+00 : f32
    %672 = vector.broadcast %cst_361 : f32 to vector<1x32xf32>
    %673 = arith.addf %672, %671 : vector<1x32xf32>
    %674 = arith.divf %672, %673 : vector<1x32xf32>
    %675 = vector.extract_strided_slice %393 {offsets = [6, 0], sizes = [1, 32], strides = [1, 1]} : vector<8x32xf32> to vector<1x32xf32>
    %c6_362 = arith.constant 6 : index
    %c0_363 = arith.constant 0 : index
    %c0_364 = arith.constant 0 : index
    %676 = vector.load %arg5[%c6_362, %c0_363, %c0_364] : memref<8x32x32xf32, #tpu.memory_space<vmem>>, vector<1x32x32xf32>
    %677 = vector.shape_cast %676 : vector<1x32x32xf32> to vector<32x32xf32>
    %cst_365 = arith.constant dense<0.000000e+00> : vector<1x32xf32>
    %678 = tpu.matmul %653, %677, %cst_365 {dimension_numbers = #tpu.dot_dimension_numbers<[1], [0], [0], [1], [0, 0, 1, 1], [], []>} : vector<1x32xf32>, vector<32x32xf32>, vector<1x32xf32> -> vector<1x32xf32>
    %679 = arith.addf %675, %678 : vector<1x32xf32>
    %680 = math.tanh %679 : vector<1x32xf32>
    %681 = vector.extract_strided_slice %400 {offsets = [6, 0], sizes = [1, 32], strides = [1, 1]} : vector<8x32xf32> to vector<1x32xf32>
    %c7_366 = arith.constant 7 : index
    %c0_367 = arith.constant 0 : index
    %c0_368 = arith.constant 0 : index
    %682 = vector.load %arg5[%c7_366, %c0_367, %c0_368] : memref<8x32x32xf32, #tpu.memory_space<vmem>>, vector<1x32x32xf32>
    %683 = vector.shape_cast %682 : vector<1x32x32xf32> to vector<32x32xf32>
    %cst_369 = arith.constant dense<0.000000e+00> : vector<1x32xf32>
    %684 = tpu.matmul %653, %683, %cst_369 {dimension_numbers = #tpu.dot_dimension_numbers<[1], [0], [0], [1], [0, 0, 1, 1], [], []>} : vector<1x32xf32>, vector<32x32xf32>, vector<1x32xf32> -> vector<1x32xf32>
    %685 = arith.addf %681, %684 : vector<1x32xf32>
    %686 = arith.negf %685 : vector<1x32xf32>
    %687 = math.exp %686 : vector<1x32xf32>
    %cst_370 = arith.constant 1.000000e+00 : f32
    %688 = vector.broadcast %cst_370 : f32 to vector<1x32xf32>
    %689 = arith.addf %688, %687 : vector<1x32xf32>
    %690 = arith.divf %688, %689 : vector<1x32xf32>
    %691 = arith.mulf %674, %651 : vector<1x32xf32>
    %692 = arith.mulf %664, %680 : vector<1x32xf32>
    %693 = arith.addf %691, %692 : vector<1x32xf32>
    %694 = math.tanh %693 : vector<1x32xf32>
    %695 = arith.mulf %690, %694 : vector<1x32xf32>
    %c6_371 = arith.constant 6 : index
    %c0_372 = arith.constant 0 : index
    %696 = vector.load %arg27[%c6_371, %c0_372] : memref<8x32xf32, #tpu.memory_space<vmem>>, vector<1x32xf32>
    tpu.vector_store %arg27[%c6_371, %c0_372], %695 {strides = array<i32>} : memref<8x32xf32, #tpu.memory_space<vmem>>, vector<1x32xf32>,
    %697 = vector.extract_strided_slice %379 {offsets = [7, 0], sizes = [1, 32], strides = [1, 1]} : vector<8x32xf32> to vector<1x32xf32>
    %c4_373 = arith.constant 4 : index
    %c0_374 = arith.constant 0 : index
    %c0_375 = arith.constant 0 : index
    %698 = vector.load %arg5[%c4_373, %c0_374, %c0_375] : memref<8x32x32xf32, #tpu.memory_space<vmem>>, vector<1x32x32xf32>
    %699 = vector.shape_cast %698 : vector<1x32x32xf32> to vector<32x32xf32>
    %cst_376 = arith.constant dense<0.000000e+00> : vector<1x32xf32>
    %700 = tpu.matmul %695, %699, %cst_376 {dimension_numbers = #tpu.dot_dimension_numbers<[1], [0], [0], [1], [0, 0, 1, 1], [], []>} : vector<1x32xf32>, vector<32x32xf32>, vector<1x32xf32> -> vector<1x32xf32>
    %701 = arith.addf %697, %700 : vector<1x32xf32>
    %702 = arith.negf %701 : vector<1x32xf32>
    %703 = math.exp %702 : vector<1x32xf32>
    %cst_377 = arith.constant 1.000000e+00 : f32
    %704 = vector.broadcast %cst_377 : f32 to vector<1x32xf32>
    %705 = arith.addf %704, %703 : vector<1x32xf32>
    %706 = arith.divf %704, %705 : vector<1x32xf32>
    %707 = vector.extract_strided_slice %386 {offsets = [7, 0], sizes = [1, 32], strides = [1, 1]} : vector<8x32xf32> to vector<1x32xf32>
    %c5_378 = arith.constant 5 : index
    %c0_379 = arith.constant 0 : index
    %c0_380 = arith.constant 0 : index
    %708 = vector.load %arg5[%c5_378, %c0_379, %c0_380] : memref<8x32x32xf32, #tpu.memory_space<vmem>>, vector<1x32x32xf32>
    %709 = vector.shape_cast %708 : vector<1x32x32xf32> to vector<32x32xf32>
    %cst_381 = arith.constant dense<0.000000e+00> : vector<1x32xf32>
    %710 = tpu.matmul %695, %709, %cst_381 {dimension_numbers = #tpu.dot_dimension_numbers<[1], [0], [0], [1], [0, 0, 1, 1], [], []>} : vector<1x32xf32>, vector<32x32xf32>, vector<1x32xf32> -> vector<1x32xf32>
    %711 = arith.addf %707, %710 : vector<1x32xf32>
    %712 = arith.negf %711 : vector<1x32xf32>
    %713 = math.exp %712 : vector<1x32xf32>
    %cst_382 = arith.constant 1.000000e+00 : f32
    %714 = vector.broadcast %cst_382 : f32 to vector<1x32xf32>
    %715 = arith.addf %714, %713 : vector<1x32xf32>
    %716 = arith.divf %714, %715 : vector<1x32xf32>
    %717 = vector.extract_strided_slice %393 {offsets = [7, 0], sizes = [1, 32], strides = [1, 1]} : vector<8x32xf32> to vector<1x32xf32>
    %c6_383 = arith.constant 6 : index
    %c0_384 = arith.constant 0 : index
    %c0_385 = arith.constant 0 : index
    %718 = vector.load %arg5[%c6_383, %c0_384, %c0_385] : memref<8x32x32xf32, #tpu.memory_space<vmem>>, vector<1x32x32xf32>
    %719 = vector.shape_cast %718 : vector<1x32x32xf32> to vector<32x32xf32>
    %cst_386 = arith.constant dense<0.000000e+00> : vector<1x32xf32>
    %720 = tpu.matmul %695, %719, %cst_386 {dimension_numbers = #tpu.dot_dimension_numbers<[1], [0], [0], [1], [0, 0, 1, 1], [], []>} : vector<1x32xf32>, vector<32x32xf32>, vector<1x32xf32> -> vector<1x32xf32>
    %721 = arith.addf %717, %720 : vector<1x32xf32>
    %722 = math.tanh %721 : vector<1x32xf32>
    %723 = vector.extract_strided_slice %400 {offsets = [7, 0], sizes = [1, 32], strides = [1, 1]} : vector<8x32xf32> to vector<1x32xf32>
    %c7_387 = arith.constant 7 : index
    %c0_388 = arith.constant 0 : index
    %c0_389 = arith.constant 0 : index
    %724 = vector.load %arg5[%c7_387, %c0_388, %c0_389] : memref<8x32x32xf32, #tpu.memory_space<vmem>>, vector<1x32x32xf32>
    %725 = vector.shape_cast %724 : vector<1x32x32xf32> to vector<32x32xf32>
    %cst_390 = arith.constant dense<0.000000e+00> : vector<1x32xf32>
    %726 = tpu.matmul %695, %725, %cst_390 {dimension_numbers = #tpu.dot_dimension_numbers<[1], [0], [0], [1], [0, 0, 1, 1], [], []>} : vector<1x32xf32>, vector<32x32xf32>, vector<1x32xf32> -> vector<1x32xf32>
    %727 = arith.addf %723, %726 : vector<1x32xf32>
    %728 = arith.negf %727 : vector<1x32xf32>
    %729 = math.exp %728 : vector<1x32xf32>
    %cst_391 = arith.constant 1.000000e+00 : f32
    %730 = vector.broadcast %cst_391 : f32 to vector<1x32xf32>
    %731 = arith.addf %730, %729 : vector<1x32xf32>
    %732 = arith.divf %730, %731 : vector<1x32xf32>
    %733 = arith.mulf %716, %693 : vector<1x32xf32>
    %734 = arith.mulf %706, %722 : vector<1x32xf32>
    %735 = arith.addf %733, %734 : vector<1x32xf32>
    %736 = math.tanh %735 : vector<1x32xf32>
    %737 = arith.mulf %732, %736 : vector<1x32xf32>
    %c7_392 = arith.constant 7 : index
    %c0_393 = arith.constant 0 : index
    %738 = vector.load %arg27[%c7_392, %c0_393] : memref<8x32xf32, #tpu.memory_space<vmem>>, vector<1x32xf32>
    tpu.vector_store %arg27[%c7_392, %c0_393], %737 {strides = array<i32>} : memref<8x32xf32, #tpu.memory_space<vmem>>, vector<1x32xf32>,
    %c0_394 = arith.constant 0 : index
    %c0_395 = arith.constant 0 : index
    %739 = vector.load %arg27[%c0_394, %c0_395] : memref<8x32xf32, #tpu.memory_space<vmem>>, vector<8x32xf32>
    %cst_396 = arith.constant 5.65685415 : f32
    %740 = vector.broadcast %cst_396 : f32 to vector<8x32xf32>
    %741 = arith.mulf %1, %740 : vector<8x32xf32>
    %c0_397 = arith.constant 0 : index
    %c0_398 = arith.constant 0 : index
    %742 = vector.load %arg7[%c0_397, %c0_398] : memref<32x32xf32, #tpu.memory_space<vmem>>, vector<32x32xf32>
    %cst_399 = arith.constant dense<0.000000e+00> : vector<8x32xf32>
    %743 = tpu.matmul %739, %742, %cst_399 {dimension_numbers = #tpu.dot_dimension_numbers<[1], [0], [0], [1], [0, 0, 1, 1], [], []>} : vector<8x32xf32>, vector<32x32xf32>, vector<8x32xf32> -> vector<8x32xf32>
    %c0_400 = arith.constant 0 : index
    %c0_401 = arith.constant 0 : index
    %744 = vector.load %arg8[%c0_400, %c0_401] : memref<32x32xf32, #tpu.memory_space<vmem>>, vector<32x32xf32>
    %cst_402 = arith.constant dense<0.000000e+00> : vector<8x32xf32>
    %745 = tpu.matmul %741, %744, %cst_402 {dimension_numbers = #tpu.dot_dimension_numbers<[1], [0], [0], [1], [0, 0, 1, 1], [], []>} : vector<8x32xf32>, vector<32x32xf32>, vector<8x32xf32> -> vector<8x32xf32>
    %746 = arith.addf %743, %745 : vector<8x32xf32>
    %c0_403 = arith.constant 0 : index
    %c0_404 = arith.constant 0 : index
    %747 = vector.load %arg9[%c0_403, %c0_404] : memref<1x32xf32, #tpu.memory_space<vmem>>, vector<1x32xf32>
    %748 = vector.broadcast %747 : vector<1x32xf32> to vector<8x32xf32>
    %749 = arith.addf %746, %748 : vector<8x32xf32>
    %cst_405 = arith.constant 0.000000e+00 : f32
    %750 = vector.broadcast %cst_405 : f32 to vector<8x32xf32>
    %751 = arith.maximumf %749, %750 : vector<8x32xf32>
    %c0_406 = arith.constant 0 : index
    %c0_407 = arith.constant 0 : index
    %752 = vector.load %arg10[%c0_406, %c0_407] : memref<8x32xf32, #tpu.memory_space<vmem>>, vector<8x32xf32>
    %753 = arith.addf %751, %752 : vector<8x32xf32>
    %c0_408 = arith.constant 0 : index
    %c0_409 = arith.constant 0 : index
    %754 = vector.load %arg11[%c0_408, %c0_409] : memref<8x8xf32, #tpu.memory_space<vmem>>, vector<8x8xf32>
    %c0_410 = arith.constant 0 : index
    %c0_411 = arith.constant 0 : index
    %c0_412 = arith.constant 0 : index
    %755 = vector.load %arg12[%c0_410, %c0_411, %c0_412] : memref<2x32x96xf32, #tpu.memory_space<vmem>>, vector<1x32x96xf32>
    %756 = vector.shape_cast %755 : vector<1x32x96xf32> to vector<32x96xf32>
    %cst_413 = arith.constant dense<0.000000e+00> : vector<8x96xf32>
    %757 = tpu.matmul %753, %756, %cst_413 {dimension_numbers = #tpu.dot_dimension_numbers<[1], [0], [0], [1], [0, 0, 1, 1], [], []>} : vector<8x32xf32>, vector<32x96xf32>, vector<8x96xf32> -> vector<8x96xf32>
    %c0_414 = arith.constant 0 : index
    %c0_415 = arith.constant 0 : index
    %c0_416 = arith.constant 0 : index
    %758 = vector.load %arg13[%c0_414, %c0_415, %c0_416] : memref<2x1x96xf32, #tpu.memory_space<vmem>>, vector<1x1x96xf32>
    %759 = vector.shape_cast %758 : vector<1x1x96xf32> to vector<1x96xf32>
    %760 = vector.broadcast %759 : vector<1x96xf32> to vector<8x96xf32>
    %761 = arith.addf %757, %760 : vector<8x96xf32>
    %762 = vector.extract_strided_slice %761 {offsets = [0, 0], sizes = [8, 32], strides = [1, 1]} : vector<8x96xf32> to vector<8x32xf32>
    %763 = vector.extract_strided_slice %761 {offsets = [0, 32], sizes = [8, 32], strides = [1, 1]} : vector<8x96xf32> to vector<8x32xf32>
    %764 = vector.extract_strided_slice %761 {offsets = [0, 64], sizes = [8, 32], strides = [1, 1]} : vector<8x96xf32> to vector<8x32xf32>
    %c0_417 = arith.constant 0 : index
    %c0_418 = arith.constant 0 : index
    %c0_419 = arith.constant 0 : index
    %765 = vector.load %arg14[%c0_417, %c0_418, %c0_419] : memref<2x32x32xf32, #tpu.memory_space<vmem>>, vector<1x32x32xf32>
    %766 = vector.shape_cast %765 : vector<1x32x32xf32> to vector<32x32xf32>
    %c0_420 = arith.constant 0 : index
    %c0_421 = arith.constant 0 : index
    %c0_422 = arith.constant 0 : index
    %767 = vector.load %arg15[%c0_420, %c0_421, %c0_422] : memref<2x1x32xf32, #tpu.memory_space<vmem>>, vector<1x1x32xf32>
    %768 = vector.shape_cast %767 : vector<1x1x32xf32> to vector<1x32xf32>
    %769 = vector.extract_strided_slice %762 {offsets = [0, 0], sizes = [8, 16], strides = [1, 1]} : vector<8x32xf32> to vector<8x16xf32>
    %770 = vector.extract_strided_slice %763 {offsets = [0, 0], sizes = [8, 16], strides = [1, 1]} : vector<8x32xf32> to vector<8x16xf32>
    %cst_423 = arith.constant dense<0.000000e+00> : vector<8x8xf32>
    %771 = tpu.matmul %769, %770, %cst_423 {dimension_numbers = #tpu.dot_dimension_numbers<[1], [1], [0], [0], [0, 0, 1, 0], [], []>} : vector<8x16xf32>, vector<8x16xf32>, vector<8x8xf32> -> vector<8x8xf32>
    %cst_424 = arith.constant 2.500000e-01 : f32
    %772 = vector.broadcast %cst_424 : f32 to vector<8x8xf32>
    %773 = arith.mulf %771, %772 : vector<8x8xf32>
    %774 = arith.addf %773, %754 : vector<8x8xf32>
    %cst_425 = arith.constant dense<0xFF800000> : vector<8xf32>
    %775 = vector.multi_reduction <maximumf>, %774, %cst_425 [1] : vector<8x8xf32> to vector<8xf32>
    %776 = vector.shape_cast %775 : vector<8xf32> to vector<8x1xf32>
    %777 = vector.broadcast %776 : vector<8x1xf32> to vector<8x8xf32>
    %778 = arith.subf %774, %777 : vector<8x8xf32>
    %779 = math.exp %778 : vector<8x8xf32>
    %cst_426 = arith.constant dense<0.000000e+00> : vector<8xf32>
    %780 = vector.multi_reduction <add>, %779, %cst_426 [1] : vector<8x8xf32> to vector<8xf32>
    %781 = vector.shape_cast %780 : vector<8xf32> to vector<8x1xf32>
    %782 = tpu.reciprocal %781 {approx = true} : vector<8x1xf32> -> vector<8x1xf32>
    %783 = vector.broadcast %782 : vector<8x1xf32> to vector<8x8xf32>
    %784 = arith.mulf %779, %783 : vector<8x8xf32>
    %785 = vector.extract_strided_slice %764 {offsets = [0, 0], sizes = [8, 16], strides = [1, 1]} : vector<8x32xf32> to vector<8x16xf32>
    %cst_427 = arith.constant dense<0.000000e+00> : vector<8x16xf32>
    %786 = tpu.matmul %784, %785, %cst_427 {dimension_numbers = #tpu.dot_dimension_numbers<[1], [0], [0], [1], [0, 0, 1, 1], [], []>} : vector<8x8xf32>, vector<8x16xf32>, vector<8x16xf32> -> vector<8x16xf32>
    %787 = vector.extract_strided_slice %766 {offsets = [0, 0], sizes = [16, 32], strides = [1, 1]} : vector<32x32xf32> to vector<16x32xf32>
    %cst_428 = arith.constant dense<0.000000e+00> : vector<8x32xf32>
    %788 = tpu.matmul %786, %787, %cst_428 {dimension_numbers = #tpu.dot_dimension_numbers<[1], [0], [0], [1], [0, 0, 1, 1], [], []>} : vector<8x16xf32>, vector<16x32xf32>, vector<8x32xf32> -> vector<8x32xf32>
    %789 = vector.broadcast %768 : vector<1x32xf32> to vector<8x32xf32>
    %790 = arith.addf %789, %788 : vector<8x32xf32>
    %791 = vector.extract_strided_slice %762 {offsets = [0, 16], sizes = [8, 16], strides = [1, 1]} : vector<8x32xf32> to vector<8x16xf32>
    %792 = vector.extract_strided_slice %763 {offsets = [0, 16], sizes = [8, 16], strides = [1, 1]} : vector<8x32xf32> to vector<8x16xf32>
    %cst_429 = arith.constant dense<0.000000e+00> : vector<8x8xf32>
    %793 = tpu.matmul %791, %792, %cst_429 {dimension_numbers = #tpu.dot_dimension_numbers<[1], [1], [0], [0], [0, 0, 1, 0], [], []>} : vector<8x16xf32>, vector<8x16xf32>, vector<8x8xf32> -> vector<8x8xf32>
    %cst_430 = arith.constant 2.500000e-01 : f32
    %794 = vector.broadcast %cst_430 : f32 to vector<8x8xf32>
    %795 = arith.mulf %793, %794 : vector<8x8xf32>
    %796 = arith.addf %795, %754 : vector<8x8xf32>
    %cst_431 = arith.constant dense<0xFF800000> : vector<8xf32>
    %797 = vector.multi_reduction <maximumf>, %796, %cst_431 [1] : vector<8x8xf32> to vector<8xf32>
    %798 = vector.shape_cast %797 : vector<8xf32> to vector<8x1xf32>
    %799 = vector.broadcast %798 : vector<8x1xf32> to vector<8x8xf32>
    %800 = arith.subf %796, %799 : vector<8x8xf32>
    %801 = math.exp %800 : vector<8x8xf32>
    %cst_432 = arith.constant dense<0.000000e+00> : vector<8xf32>
    %802 = vector.multi_reduction <add>, %801, %cst_432 [1] : vector<8x8xf32> to vector<8xf32>
    %803 = vector.shape_cast %802 : vector<8xf32> to vector<8x1xf32>
    %804 = tpu.reciprocal %803 {approx = true} : vector<8x1xf32> -> vector<8x1xf32>
    %805 = vector.broadcast %804 : vector<8x1xf32> to vector<8x8xf32>
    %806 = arith.mulf %801, %805 : vector<8x8xf32>
    %807 = vector.extract_strided_slice %764 {offsets = [0, 16], sizes = [8, 16], strides = [1, 1]} : vector<8x32xf32> to vector<8x16xf32>
    %cst_433 = arith.constant dense<0.000000e+00> : vector<8x16xf32>
    %808 = tpu.matmul %806, %807, %cst_433 {dimension_numbers = #tpu.dot_dimension_numbers<[1], [0], [0], [1], [0, 0, 1, 1], [], []>} : vector<8x8xf32>, vector<8x16xf32>, vector<8x16xf32> -> vector<8x16xf32>
    %809 = vector.extract_strided_slice %766 {offsets = [16, 0], sizes = [16, 32], strides = [1, 1]} : vector<32x32xf32> to vector<16x32xf32>
    %cst_434 = arith.constant dense<0.000000e+00> : vector<8x32xf32>
    %810 = tpu.matmul %808, %809, %cst_434 {dimension_numbers = #tpu.dot_dimension_numbers<[1], [0], [0], [1], [0, 0, 1, 1], [], []>} : vector<8x16xf32>, vector<16x32xf32>, vector<8x32xf32> -> vector<8x32xf32>
    %811 = arith.addf %790, %810 : vector<8x32xf32>
    %812 = arith.addf %753, %811 : vector<8x32xf32>
    %c0_435 = arith.constant 0 : index
    %c0_436 = arith.constant 0 : index
    %c0_437 = arith.constant 0 : index
    %813 = vector.load %arg20[%c0_435, %c0_436, %c0_437] : memref<2x1x32xf32, #tpu.memory_space<vmem>>, vector<1x1x32xf32>
    %814 = vector.shape_cast %813 : vector<1x1x32xf32> to vector<1x32xf32>
    %c0_438 = arith.constant 0 : index
    %c0_439 = arith.constant 0 : index
    %c0_440 = arith.constant 0 : index
    %815 = vector.load %arg21[%c0_438, %c0_439, %c0_440] : memref<2x1x32xf32, #tpu.memory_space<vmem>>, vector<1x1x32xf32>
    %816 = vector.shape_cast %815 : vector<1x1x32xf32> to vector<1x32xf32>
    %cst_441 = arith.constant dense<0.000000e+00> : vector<8xf32>
    %817 = vector.multi_reduction <add>, %812, %cst_441 [1] : vector<8x32xf32> to vector<8xf32>
    %818 = vector.shape_cast %817 : vector<8xf32> to vector<8x1xf32>
    %cst_442 = arith.constant 3.200000e+01 : f32
    %819 = vector.broadcast %cst_442 : f32 to vector<8x1xf32>
    %820 = arith.divf %818, %819 : vector<8x1xf32>
    %821 = vector.broadcast %820 : vector<8x1xf32> to vector<8x32xf32>
    %822 = arith.subf %812, %821 : vector<8x32xf32>
    %823 = arith.mulf %822, %822 : vector<8x32xf32>
    %cst_443 = arith.constant dense<0.000000e+00> : vector<8xf32>
    %824 = vector.multi_reduction <add>, %823, %cst_443 [1] : vector<8x32xf32> to vector<8xf32>
    %825 = vector.shape_cast %824 : vector<8xf32> to vector<8x1xf32>
    %cst_444 = arith.constant 3.200000e+01 : f32
    %826 = vector.broadcast %cst_444 : f32 to vector<8x1xf32>
    %827 = arith.divf %825, %826 : vector<8x1xf32>
    %828 = vector.broadcast %820 : vector<8x1xf32> to vector<8x32xf32>
    %829 = arith.subf %812, %828 : vector<8x32xf32>
    %cst_445 = arith.constant 9.99999974E-6 : f32
    %830 = vector.broadcast %cst_445 : f32 to vector<8x1xf32>
    %831 = arith.addf %827, %830 : vector<8x1xf32>
    %832 = math.rsqrt %831 : vector<8x1xf32>
    %833 = vector.broadcast %832 : vector<8x1xf32> to vector<8x32xf32>
    %834 = arith.mulf %829, %833 : vector<8x32xf32>
    %835 = vector.broadcast %814 : vector<1x32xf32> to vector<8x32xf32>
    %836 = arith.mulf %834, %835 : vector<8x32xf32>
    %837 = vector.broadcast %816 : vector<1x32xf32> to vector<8x32xf32>
    %838 = arith.addf %836, %837 : vector<8x32xf32>
    %c0_446 = arith.constant 0 : index
    %c0_447 = arith.constant 0 : index
    %c0_448 = arith.constant 0 : index
    %839 = vector.load %arg16[%c0_446, %c0_447, %c0_448] : memref<2x32x32xf32, #tpu.memory_space<vmem>>, vector<1x32x32xf32>
    %840 = vector.shape_cast %839 : vector<1x32x32xf32> to vector<32x32xf32>
    %cst_449 = arith.constant dense<0.000000e+00> : vector<8x32xf32>
    %841 = tpu.matmul %838, %840, %cst_449 {dimension_numbers = #tpu.dot_dimension_numbers<[1], [0], [0], [1], [0, 0, 1, 1], [], []>} : vector<8x32xf32>, vector<32x32xf32>, vector<8x32xf32> -> vector<8x32xf32>
    %c0_450 = arith.constant 0 : index
    %c0_451 = arith.constant 0 : index
    %c0_452 = arith.constant 0 : index
    %842 = vector.load %arg17[%c0_450, %c0_451, %c0_452] : memref<2x1x32xf32, #tpu.memory_space<vmem>>, vector<1x1x32xf32>
    %843 = vector.shape_cast %842 : vector<1x1x32xf32> to vector<1x32xf32>
    %844 = vector.broadcast %843 : vector<1x32xf32> to vector<8x32xf32>
    %845 = arith.addf %841, %844 : vector<8x32xf32>
    %cst_453 = arith.constant 0.000000e+00 : f32
    %846 = vector.broadcast %cst_453 : f32 to vector<8x32xf32>
    %847 = arith.maximumf %845, %846 : vector<8x32xf32>
    %c0_454 = arith.constant 0 : index
    %c0_455 = arith.constant 0 : index
    %c0_456 = arith.constant 0 : index
    %848 = vector.load %arg18[%c0_454, %c0_455, %c0_456] : memref<2x32x32xf32, #tpu.memory_space<vmem>>, vector<1x32x32xf32>
    %849 = vector.shape_cast %848 : vector<1x32x32xf32> to vector<32x32xf32>
    %cst_457 = arith.constant dense<0.000000e+00> : vector<8x32xf32>
    %850 = tpu.matmul %847, %849, %cst_457 {dimension_numbers = #tpu.dot_dimension_numbers<[1], [0], [0], [1], [0, 0, 1, 1], [], []>} : vector<8x32xf32>, vector<32x32xf32>, vector<8x32xf32> -> vector<8x32xf32>
    %c0_458 = arith.constant 0 : index
    %c0_459 = arith.constant 0 : index
    %c0_460 = arith.constant 0 : index
    %851 = vector.load %arg19[%c0_458, %c0_459, %c0_460] : memref<2x1x32xf32, #tpu.memory_space<vmem>>, vector<1x1x32xf32>
    %852 = vector.shape_cast %851 : vector<1x1x32xf32> to vector<1x32xf32>
    %853 = vector.broadcast %852 : vector<1x32xf32> to vector<8x32xf32>
    %854 = arith.addf %850, %853 : vector<8x32xf32>
    %855 = arith.addf %838, %854 : vector<8x32xf32>
    %c0_461 = arith.constant 0 : index
    %c0_462 = arith.constant 0 : index
    %c0_463 = arith.constant 0 : index
    %856 = vector.load %arg22[%c0_461, %c0_462, %c0_463] : memref<2x1x32xf32, #tpu.memory_space<vmem>>, vector<1x1x32xf32>
    %857 = vector.shape_cast %856 : vector<1x1x32xf32> to vector<1x32xf32>
    %c0_464 = arith.constant 0 : index
    %c0_465 = arith.constant 0 : index
    %c0_466 = arith.constant 0 : index
    %858 = vector.load %arg23[%c0_464, %c0_465, %c0_466] : memref<2x1x32xf32, #tpu.memory_space<vmem>>, vector<1x1x32xf32>
    %859 = vector.shape_cast %858 : vector<1x1x32xf32> to vector<1x32xf32>
    %cst_467 = arith.constant dense<0.000000e+00> : vector<8xf32>
    %860 = vector.multi_reduction <add>, %855, %cst_467 [1] : vector<8x32xf32> to vector<8xf32>
    %861 = vector.shape_cast %860 : vector<8xf32> to vector<8x1xf32>
    %cst_468 = arith.constant 3.200000e+01 : f32
    %862 = vector.broadcast %cst_468 : f32 to vector<8x1xf32>
    %863 = arith.divf %861, %862 : vector<8x1xf32>
    %864 = vector.broadcast %863 : vector<8x1xf32> to vector<8x32xf32>
    %865 = arith.subf %855, %864 : vector<8x32xf32>
    %866 = arith.mulf %865, %865 : vector<8x32xf32>
    %cst_469 = arith.constant dense<0.000000e+00> : vector<8xf32>
    %867 = vector.multi_reduction <add>, %866, %cst_469 [1] : vector<8x32xf32> to vector<8xf32>
    %868 = vector.shape_cast %867 : vector<8xf32> to vector<8x1xf32>
    %cst_470 = arith.constant 3.200000e+01 : f32
    %869 = vector.broadcast %cst_470 : f32 to vector<8x1xf32>
    %870 = arith.divf %868, %869 : vector<8x1xf32>
    %871 = vector.broadcast %863 : vector<8x1xf32> to vector<8x32xf32>
    %872 = arith.subf %855, %871 : vector<8x32xf32>
    %cst_471 = arith.constant 9.99999974E-6 : f32
    %873 = vector.broadcast %cst_471 : f32 to vector<8x1xf32>
    %874 = arith.addf %870, %873 : vector<8x1xf32>
    %875 = math.rsqrt %874 : vector<8x1xf32>
    %876 = vector.broadcast %875 : vector<8x1xf32> to vector<8x32xf32>
    %877 = arith.mulf %872, %876 : vector<8x32xf32>
    %878 = vector.broadcast %857 : vector<1x32xf32> to vector<8x32xf32>
    %879 = arith.mulf %877, %878 : vector<8x32xf32>
    %880 = vector.broadcast %859 : vector<1x32xf32> to vector<8x32xf32>
    %881 = arith.addf %879, %880 : vector<8x32xf32>
    %c1_472 = arith.constant 1 : index
    %c0_473 = arith.constant 0 : index
    %c0_474 = arith.constant 0 : index
    %882 = vector.load %arg12[%c1_472, %c0_473, %c0_474] : memref<2x32x96xf32, #tpu.memory_space<vmem>>, vector<1x32x96xf32>
    %883 = vector.shape_cast %882 : vector<1x32x96xf32> to vector<32x96xf32>
    %cst_475 = arith.constant dense<0.000000e+00> : vector<8x96xf32>
    %884 = tpu.matmul %881, %883, %cst_475 {dimension_numbers = #tpu.dot_dimension_numbers<[1], [0], [0], [1], [0, 0, 1, 1], [], []>} : vector<8x32xf32>, vector<32x96xf32>, vector<8x96xf32> -> vector<8x96xf32>
    %c1_476 = arith.constant 1 : index
    %c0_477 = arith.constant 0 : index
    %c0_478 = arith.constant 0 : index
    %885 = vector.load %arg13[%c1_476, %c0_477, %c0_478] : memref<2x1x96xf32, #tpu.memory_space<vmem>>, vector<1x1x96xf32>
    %886 = vector.shape_cast %885 : vector<1x1x96xf32> to vector<1x96xf32>
    %887 = vector.broadcast %886 : vector<1x96xf32> to vector<8x96xf32>
    %888 = arith.addf %884, %887 : vector<8x96xf32>
    %889 = vector.extract_strided_slice %888 {offsets = [0, 0], sizes = [8, 32], strides = [1, 1]} : vector<8x96xf32> to vector<8x32xf32>
    %890 = vector.extract_strided_slice %888 {offsets = [0, 32], sizes = [8, 32], strides = [1, 1]} : vector<8x96xf32> to vector<8x32xf32>
    %891 = vector.extract_strided_slice %888 {offsets = [0, 64], sizes = [8, 32], strides = [1, 1]} : vector<8x96xf32> to vector<8x32xf32>
    %c1_479 = arith.constant 1 : index
    %c0_480 = arith.constant 0 : index
    %c0_481 = arith.constant 0 : index
    %892 = vector.load %arg14[%c1_479, %c0_480, %c0_481] : memref<2x32x32xf32, #tpu.memory_space<vmem>>, vector<1x32x32xf32>
    %893 = vector.shape_cast %892 : vector<1x32x32xf32> to vector<32x32xf32>
    %c1_482 = arith.constant 1 : index
    %c0_483 = arith.constant 0 : index
    %c0_484 = arith.constant 0 : index
    %894 = vector.load %arg15[%c1_482, %c0_483, %c0_484] : memref<2x1x32xf32, #tpu.memory_space<vmem>>, vector<1x1x32xf32>
    %895 = vector.shape_cast %894 : vector<1x1x32xf32> to vector<1x32xf32>
    %896 = vector.extract_strided_slice %889 {offsets = [0, 0], sizes = [8, 16], strides = [1, 1]} : vector<8x32xf32> to vector<8x16xf32>
    %897 = vector.extract_strided_slice %890 {offsets = [0, 0], sizes = [8, 16], strides = [1, 1]} : vector<8x32xf32> to vector<8x16xf32>
    %cst_485 = arith.constant dense<0.000000e+00> : vector<8x8xf32>
    %898 = tpu.matmul %896, %897, %cst_485 {dimension_numbers = #tpu.dot_dimension_numbers<[1], [1], [0], [0], [0, 0, 1, 0], [], []>} : vector<8x16xf32>, vector<8x16xf32>, vector<8x8xf32> -> vector<8x8xf32>
    %cst_486 = arith.constant 2.500000e-01 : f32
    %899 = vector.broadcast %cst_486 : f32 to vector<8x8xf32>
    %900 = arith.mulf %898, %899 : vector<8x8xf32>
    %901 = arith.addf %900, %754 : vector<8x8xf32>
    %cst_487 = arith.constant dense<0xFF800000> : vector<8xf32>
    %902 = vector.multi_reduction <maximumf>, %901, %cst_487 [1] : vector<8x8xf32> to vector<8xf32>
    %903 = vector.shape_cast %902 : vector<8xf32> to vector<8x1xf32>
    %904 = vector.broadcast %903 : vector<8x1xf32> to vector<8x8xf32>
    %905 = arith.subf %901, %904 : vector<8x8xf32>
    %906 = math.exp %905 : vector<8x8xf32>
    %cst_488 = arith.constant dense<0.000000e+00> : vector<8xf32>
    %907 = vector.multi_reduction <add>, %906, %cst_488 [1] : vector<8x8xf32> to vector<8xf32>
    %908 = vector.shape_cast %907 : vector<8xf32> to vector<8x1xf32>
    %909 = tpu.reciprocal %908 {approx = true} : vector<8x1xf32> -> vector<8x1xf32>
    %910 = vector.broadcast %909 : vector<8x1xf32> to vector<8x8xf32>
    %911 = arith.mulf %906, %910 : vector<8x8xf32>
    %912 = vector.extract_strided_slice %891 {offsets = [0, 0], sizes = [8, 16], strides = [1, 1]} : vector<8x32xf32> to vector<8x16xf32>
    %cst_489 = arith.constant dense<0.000000e+00> : vector<8x16xf32>
    %913 = tpu.matmul %911, %912, %cst_489 {dimension_numbers = #tpu.dot_dimension_numbers<[1], [0], [0], [1], [0, 0, 1, 1], [], []>} : vector<8x8xf32>, vector<8x16xf32>, vector<8x16xf32> -> vector<8x16xf32>
    %914 = vector.extract_strided_slice %893 {offsets = [0, 0], sizes = [16, 32], strides = [1, 1]} : vector<32x32xf32> to vector<16x32xf32>
    %cst_490 = arith.constant dense<0.000000e+00> : vector<8x32xf32>
    %915 = tpu.matmul %913, %914, %cst_490 {dimension_numbers = #tpu.dot_dimension_numbers<[1], [0], [0], [1], [0, 0, 1, 1], [], []>} : vector<8x16xf32>, vector<16x32xf32>, vector<8x32xf32> -> vector<8x32xf32>
    %916 = vector.broadcast %895 : vector<1x32xf32> to vector<8x32xf32>
    %917 = arith.addf %916, %915 : vector<8x32xf32>
    %918 = vector.extract_strided_slice %889 {offsets = [0, 16], sizes = [8, 16], strides = [1, 1]} : vector<8x32xf32> to vector<8x16xf32>
    %919 = vector.extract_strided_slice %890 {offsets = [0, 16], sizes = [8, 16], strides = [1, 1]} : vector<8x32xf32> to vector<8x16xf32>
    %cst_491 = arith.constant dense<0.000000e+00> : vector<8x8xf32>
    %920 = tpu.matmul %918, %919, %cst_491 {dimension_numbers = #tpu.dot_dimension_numbers<[1], [1], [0], [0], [0, 0, 1, 0], [], []>} : vector<8x16xf32>, vector<8x16xf32>, vector<8x8xf32> -> vector<8x8xf32>
    %cst_492 = arith.constant 2.500000e-01 : f32
    %921 = vector.broadcast %cst_492 : f32 to vector<8x8xf32>
    %922 = arith.mulf %920, %921 : vector<8x8xf32>
    %923 = arith.addf %922, %754 : vector<8x8xf32>
    %cst_493 = arith.constant dense<0xFF800000> : vector<8xf32>
    %924 = vector.multi_reduction <maximumf>, %923, %cst_493 [1] : vector<8x8xf32> to vector<8xf32>
    %925 = vector.shape_cast %924 : vector<8xf32> to vector<8x1xf32>
    %926 = vector.broadcast %925 : vector<8x1xf32> to vector<8x8xf32>
    %927 = arith.subf %923, %926 : vector<8x8xf32>
    %928 = math.exp %927 : vector<8x8xf32>
    %cst_494 = arith.constant dense<0.000000e+00> : vector<8xf32>
    %929 = vector.multi_reduction <add>, %928, %cst_494 [1] : vector<8x8xf32> to vector<8xf32>
    %930 = vector.shape_cast %929 : vector<8xf32> to vector<8x1xf32>
    %931 = tpu.reciprocal %930 {approx = true} : vector<8x1xf32> -> vector<8x1xf32>
    %932 = vector.broadcast %931 : vector<8x1xf32> to vector<8x8xf32>
    %933 = arith.mulf %928, %932 : vector<8x8xf32>
    %934 = vector.extract_strided_slice %891 {offsets = [0, 16], sizes = [8, 16], strides = [1, 1]} : vector<8x32xf32> to vector<8x16xf32>
    %cst_495 = arith.constant dense<0.000000e+00> : vector<8x16xf32>
    %935 = tpu.matmul %933, %934, %cst_495 {dimension_numbers = #tpu.dot_dimension_numbers<[1], [0], [0], [1], [0, 0, 1, 1], [], []>} : vector<8x8xf32>, vector<8x16xf32>, vector<8x16xf32> -> vector<8x16xf32>
    %936 = vector.extract_strided_slice %893 {offsets = [16, 0], sizes = [16, 32], strides = [1, 1]} : vector<32x32xf32> to vector<16x32xf32>
    %cst_496 = arith.constant dense<0.000000e+00> : vector<8x32xf32>
    %937 = tpu.matmul %935, %936, %cst_496 {dimension_numbers = #tpu.dot_dimension_numbers<[1], [0], [0], [1], [0, 0, 1, 1], [], []>} : vector<8x16xf32>, vector<16x32xf32>, vector<8x32xf32> -> vector<8x32xf32>
    %938 = arith.addf %917, %937 : vector<8x32xf32>
    %939 = arith.addf %881, %938 : vector<8x32xf32>
    %c1_497 = arith.constant 1 : index
    %c0_498 = arith.constant 0 : index
    %c0_499 = arith.constant 0 : index
    %940 = vector.load %arg20[%c1_497, %c0_498, %c0_499] : memref<2x1x32xf32, #tpu.memory_space<vmem>>, vector<1x1x32xf32>
    %941 = vector.shape_cast %940 : vector<1x1x32xf32> to vector<1x32xf32>
    %c1_500 = arith.constant 1 : index
    %c0_501 = arith.constant 0 : index
    %c0_502 = arith.constant 0 : index
    %942 = vector.load %arg21[%c1_500, %c0_501, %c0_502] : memref<2x1x32xf32, #tpu.memory_space<vmem>>, vector<1x1x32xf32>
    %943 = vector.shape_cast %942 : vector<1x1x32xf32> to vector<1x32xf32>
    %cst_503 = arith.constant dense<0.000000e+00> : vector<8xf32>
    %944 = vector.multi_reduction <add>, %939, %cst_503 [1] : vector<8x32xf32> to vector<8xf32>
    %945 = vector.shape_cast %944 : vector<8xf32> to vector<8x1xf32>
    %cst_504 = arith.constant 3.200000e+01 : f32
    %946 = vector.broadcast %cst_504 : f32 to vector<8x1xf32>
    %947 = arith.divf %945, %946 : vector<8x1xf32>
    %948 = vector.broadcast %947 : vector<8x1xf32> to vector<8x32xf32>
    %949 = arith.subf %939, %948 : vector<8x32xf32>
    %950 = arith.mulf %949, %949 : vector<8x32xf32>
    %cst_505 = arith.constant dense<0.000000e+00> : vector<8xf32>
    %951 = vector.multi_reduction <add>, %950, %cst_505 [1] : vector<8x32xf32> to vector<8xf32>
    %952 = vector.shape_cast %951 : vector<8xf32> to vector<8x1xf32>
    %cst_506 = arith.constant 3.200000e+01 : f32
    %953 = vector.broadcast %cst_506 : f32 to vector<8x1xf32>
    %954 = arith.divf %952, %953 : vector<8x1xf32>
    %955 = vector.broadcast %947 : vector<8x1xf32> to vector<8x32xf32>
    %956 = arith.subf %939, %955 : vector<8x32xf32>
    %cst_507 = arith.constant 9.99999974E-6 : f32
    %957 = vector.broadcast %cst_507 : f32 to vector<8x1xf32>
    %958 = arith.addf %954, %957 : vector<8x1xf32>
    %959 = math.rsqrt %958 : vector<8x1xf32>
    %960 = vector.broadcast %959 : vector<8x1xf32> to vector<8x32xf32>
    %961 = arith.mulf %956, %960 : vector<8x32xf32>
    %962 = vector.broadcast %941 : vector<1x32xf32> to vector<8x32xf32>
    %963 = arith.mulf %961, %962 : vector<8x32xf32>
    %964 = vector.broadcast %943 : vector<1x32xf32> to vector<8x32xf32>
    %965 = arith.addf %963, %964 : vector<8x32xf32>
    %c1_508 = arith.constant 1 : index
    %c0_509 = arith.constant 0 : index
    %c0_510 = arith.constant 0 : index
    %966 = vector.load %arg16[%c1_508, %c0_509, %c0_510] : memref<2x32x32xf32, #tpu.memory_space<vmem>>, vector<1x32x32xf32>
    %967 = vector.shape_cast %966 : vector<1x32x32xf32> to vector<32x32xf32>
    %cst_511 = arith.constant dense<0.000000e+00> : vector<8x32xf32>
    %968 = tpu.matmul %965, %967, %cst_511 {dimension_numbers = #tpu.dot_dimension_numbers<[1], [0], [0], [1], [0, 0, 1, 1], [], []>} : vector<8x32xf32>, vector<32x32xf32>, vector<8x32xf32> -> vector<8x32xf32>
    %c1_512 = arith.constant 1 : index
    %c0_513 = arith.constant 0 : index
    %c0_514 = arith.constant 0 : index
    %969 = vector.load %arg17[%c1_512, %c0_513, %c0_514] : memref<2x1x32xf32, #tpu.memory_space<vmem>>, vector<1x1x32xf32>
    %970 = vector.shape_cast %969 : vector<1x1x32xf32> to vector<1x32xf32>
    %971 = vector.broadcast %970 : vector<1x32xf32> to vector<8x32xf32>
    %972 = arith.addf %968, %971 : vector<8x32xf32>
    %cst_515 = arith.constant 0.000000e+00 : f32
    %973 = vector.broadcast %cst_515 : f32 to vector<8x32xf32>
    %974 = arith.maximumf %972, %973 : vector<8x32xf32>
    %c1_516 = arith.constant 1 : index
    %c0_517 = arith.constant 0 : index
    %c0_518 = arith.constant 0 : index
    %975 = vector.load %arg18[%c1_516, %c0_517, %c0_518] : memref<2x32x32xf32, #tpu.memory_space<vmem>>, vector<1x32x32xf32>
    %976 = vector.shape_cast %975 : vector<1x32x32xf32> to vector<32x32xf32>
    %cst_519 = arith.constant dense<0.000000e+00> : vector<8x32xf32>
    %977 = tpu.matmul %974, %976, %cst_519 {dimension_numbers = #tpu.dot_dimension_numbers<[1], [0], [0], [1], [0, 0, 1, 1], [], []>} : vector<8x32xf32>, vector<32x32xf32>, vector<8x32xf32> -> vector<8x32xf32>
    %c1_520 = arith.constant 1 : index
    %c0_521 = arith.constant 0 : index
    %c0_522 = arith.constant 0 : index
    %978 = vector.load %arg19[%c1_520, %c0_521, %c0_522] : memref<2x1x32xf32, #tpu.memory_space<vmem>>, vector<1x1x32xf32>
    %979 = vector.shape_cast %978 : vector<1x1x32xf32> to vector<1x32xf32>
    %980 = vector.broadcast %979 : vector<1x32xf32> to vector<8x32xf32>
    %981 = arith.addf %977, %980 : vector<8x32xf32>
    %982 = arith.addf %965, %981 : vector<8x32xf32>
    %c1_523 = arith.constant 1 : index
    %c0_524 = arith.constant 0 : index
    %c0_525 = arith.constant 0 : index
    %983 = vector.load %arg22[%c1_523, %c0_524, %c0_525] : memref<2x1x32xf32, #tpu.memory_space<vmem>>, vector<1x1x32xf32>
    %984 = vector.shape_cast %983 : vector<1x1x32xf32> to vector<1x32xf32>
    %c1_526 = arith.constant 1 : index
    %c0_527 = arith.constant 0 : index
    %c0_528 = arith.constant 0 : index
    %985 = vector.load %arg23[%c1_526, %c0_527, %c0_528] : memref<2x1x32xf32, #tpu.memory_space<vmem>>, vector<1x1x32xf32>
    %986 = vector.shape_cast %985 : vector<1x1x32xf32> to vector<1x32xf32>
    %cst_529 = arith.constant dense<0.000000e+00> : vector<8xf32>
    %987 = vector.multi_reduction <add>, %982, %cst_529 [1] : vector<8x32xf32> to vector<8xf32>
    %988 = vector.shape_cast %987 : vector<8xf32> to vector<8x1xf32>
    %cst_530 = arith.constant 3.200000e+01 : f32
    %989 = vector.broadcast %cst_530 : f32 to vector<8x1xf32>
    %990 = arith.divf %988, %989 : vector<8x1xf32>
    %991 = vector.broadcast %990 : vector<8x1xf32> to vector<8x32xf32>
    %992 = arith.subf %982, %991 : vector<8x32xf32>
    %993 = arith.mulf %992, %992 : vector<8x32xf32>
    %cst_531 = arith.constant dense<0.000000e+00> : vector<8xf32>
    %994 = vector.multi_reduction <add>, %993, %cst_531 [1] : vector<8x32xf32> to vector<8xf32>
    %995 = vector.shape_cast %994 : vector<8xf32> to vector<8x1xf32>
    %cst_532 = arith.constant 3.200000e+01 : f32
    %996 = vector.broadcast %cst_532 : f32 to vector<8x1xf32>
    %997 = arith.divf %995, %996 : vector<8x1xf32>
    %998 = vector.broadcast %990 : vector<8x1xf32> to vector<8x32xf32>
    %999 = arith.subf %982, %998 : vector<8x32xf32>
    %cst_533 = arith.constant 9.99999974E-6 : f32
    %1000 = vector.broadcast %cst_533 : f32 to vector<8x1xf32>
    %1001 = arith.addf %997, %1000 : vector<8x1xf32>
    %1002 = math.rsqrt %1001 : vector<8x1xf32>
    %1003 = vector.broadcast %1002 : vector<8x1xf32> to vector<8x32xf32>
    %1004 = arith.mulf %999, %1003 : vector<8x32xf32>
    %1005 = vector.broadcast %984 : vector<1x32xf32> to vector<8x32xf32>
    %1006 = arith.mulf %1004, %1005 : vector<8x32xf32>
    %1007 = vector.broadcast %986 : vector<1x32xf32> to vector<8x32xf32>
    %1008 = arith.addf %1006, %1007 : vector<8x32xf32>
    %c0_534 = arith.constant 0 : index
    %c0_535 = arith.constant 0 : index
    %1009 = vector.load %arg24[%c0_534, %c0_535] : memref<32x128xf32, #tpu.memory_space<vmem>>, vector<32x128xf32>
    %cst_536 = arith.constant dense<0.000000e+00> : vector<8x128xf32>
    %1010 = tpu.matmul %1008, %1009, %cst_536 {dimension_numbers = #tpu.dot_dimension_numbers<[1], [0], [0], [1], [0, 0, 1, 1], [], []>} : vector<8x32xf32>, vector<32x128xf32>, vector<8x128xf32> -> vector<8x128xf32>
    %c0_537 = arith.constant 0 : index
    %c0_538 = arith.constant 0 : index
    %1011 = vector.load %arg25[%c0_537, %c0_538] : memref<1x128xf32, #tpu.memory_space<vmem>>, vector<1x128xf32>
    %1012 = vector.broadcast %1011 : vector<1x128xf32> to vector<8x128xf32>
    %1013 = arith.addf %1010, %1012 : vector<8x128xf32>
    %cst_539 = arith.constant dense<0xFF800000> : vector<8xf32>
    %1014 = vector.multi_reduction <maximumf>, %1013, %cst_539 [1] : vector<8x128xf32> to vector<8xf32>
    %1015 = vector.shape_cast %1014 : vector<8xf32> to vector<8x1xf32>
    %1016 = vector.broadcast %1015 : vector<8x1xf32> to vector<8x128xf32>
    %1017 = arith.subf %1013, %1016 : vector<8x128xf32>
    %1018 = math.exp %1017 : vector<8x128xf32>
    %cst_540 = arith.constant dense<0.000000e+00> : vector<8xf32>
    %1019 = vector.multi_reduction <add>, %1018, %cst_540 [1] : vector<8x128xf32> to vector<8xf32>
    %1020 = vector.shape_cast %1019 : vector<8xf32> to vector<8x1xf32>
    %1021 = math.log %1020 : vector<8x1xf32>
    %1022 = vector.broadcast %1021 : vector<8x1xf32> to vector<8x128xf32>
    %1023 = arith.subf %1017, %1022 : vector<8x128xf32>
    %c0_541 = arith.constant 0 : index
    %c0_542 = arith.constant 0 : index
    %c0_543 = arith.constant 0 : index
    %1024 = vector.load %arg26[%c0_541, %c0_542, %c0_543] : memref<1x8x128xf32, #tpu.memory_space<vmem>>, vector<1x8x128xf32>
    %1025 = vector.shape_cast %1024 : vector<1x8x128xf32> to vector<8x128xf32>
    %1026 = vector.shape_cast %1023 : vector<8x128xf32> to vector<1x8x128xf32>
    tpu.vector_store %arg26[%c0_541, %c0_542, %c0_543], %1026 {strides = array<i32>} : memref<1x8x128xf32, #tpu.memory_space<vmem>>, vector<1x8x128xf32>,
    return
  }
  func.func @transform_0(%arg0: i32) -> (i32, i32, i32) {
    %c0_i32 = arith.constant 0 : i32
    %c0_i32_0 = arith.constant 0 : i32
    %c0_i32_1 = arith.constant 0 : i32
    return %arg0, %c0_i32, %c0_i32_0 : i32, i32, i32
  }
  func.func @transform_1(%arg0: i32) -> (i32, i32, i32) {
    %c0_i32 = arith.constant 0 : i32
    %c0_i32_0 = arith.constant 0 : i32
    %c0_i32_1 = arith.constant 0 : i32
    return %arg0, %c0_i32, %c0_i32_0 : i32, i32, i32
  }
  func.func @transform_2(%arg0: i32) -> (i32, i32, i32) {
    %c0_i32 = arith.constant 0 : i32
    %c0_i32_0 = arith.constant 0 : i32
    %c0_i32_1 = arith.constant 0 : i32
    return %arg0, %c0_i32, %c0_i32_0 : i32, i32, i32
  }
  func.func @transform_3(%arg0: i32) -> (i32, i32, i32) {
    %c0_i32 = arith.constant 0 : i32
    %c0_i32_0 = arith.constant 0 : i32
    %c0_i32_1 = arith.constant 0 : i32
    %c0_i32_2 = arith.constant 0 : i32
    return %c0_i32, %c0_i32_0, %c0_i32_1 : i32, i32, i32
  }
  func.func @transform_4(%arg0: i32) -> (i32, i32, i32) {
    %c0_i32 = arith.constant 0 : i32
    %c0_i32_0 = arith.constant 0 : i32
    %c0_i32_1 = arith.constant 0 : i32
    %c0_i32_2 = arith.constant 0 : i32
    return %c0_i32, %c0_i32_0, %c0_i32_1 : i32, i32, i32
  }
  func.func @transform_5(%arg0: i32) -> (i32, i32, i32) {
    %c0_i32 = arith.constant 0 : i32
    %c0_i32_0 = arith.constant 0 : i32
    %c0_i32_1 = arith.constant 0 : i32
    %c0_i32_2 = arith.constant 0 : i32
    return %c0_i32, %c0_i32_0, %c0_i32_1 : i32, i32, i32
  }
  func.func @transform_6(%arg0: i32) -> (i32, i32) {
    %c0_i32 = arith.constant 0 : i32
    %c0_i32_0 = arith.constant 0 : i32
    %c0_i32_1 = arith.constant 0 : i32
    return %c0_i32, %c0_i32_0 : i32, i32
  }
  func.func @transform_7(%arg0: i32) -> (i32, i32) {
    %c0_i32 = arith.constant 0 : i32
    %c0_i32_0 = arith.constant 0 : i32
    %c0_i32_1 = arith.constant 0 : i32
    return %c0_i32, %c0_i32_0 : i32, i32
  }
  func.func @transform_8(%arg0: i32) -> (i32, i32) {
    %c0_i32 = arith.constant 0 : i32
    %c0_i32_0 = arith.constant 0 : i32
    %c0_i32_1 = arith.constant 0 : i32
    return %c0_i32, %c0_i32_0 : i32, i32
  }
  func.func @transform_9(%arg0: i32) -> (i32, i32) {
    %c0_i32 = arith.constant 0 : i32
    %c0_i32_0 = arith.constant 0 : i32
    %c0_i32_1 = arith.constant 0 : i32
    return %c0_i32, %c0_i32_0 : i32, i32
  }
  func.func @transform_10(%arg0: i32) -> (i32, i32) {
    %c0_i32 = arith.constant 0 : i32
    %c0_i32_0 = arith.constant 0 : i32
    %c0_i32_1 = arith.constant 0 : i32
    return %c0_i32, %c0_i32_0 : i32, i32
  }
  func.func @transform_11(%arg0: i32) -> (i32, i32, i32) {
    %c0_i32 = arith.constant 0 : i32
    %c0_i32_0 = arith.constant 0 : i32
    %c0_i32_1 = arith.constant 0 : i32
    %c0_i32_2 = arith.constant 0 : i32
    return %c0_i32, %c0_i32_0, %c0_i32_1 : i32, i32, i32
  }
  func.func @transform_12(%arg0: i32) -> (i32, i32, i32) {
    %c0_i32 = arith.constant 0 : i32
    %c0_i32_0 = arith.constant 0 : i32
    %c0_i32_1 = arith.constant 0 : i32
    %c0_i32_2 = arith.constant 0 : i32
    return %c0_i32, %c0_i32_0, %c0_i32_1 : i32, i32, i32
  }
  func.func @transform_13(%arg0: i32) -> (i32, i32, i32) {
    %c0_i32 = arith.constant 0 : i32
    %c0_i32_0 = arith.constant 0 : i32
    %c0_i32_1 = arith.constant 0 : i32
    %c0_i32_2 = arith.constant 0 : i32
    return %c0_i32, %c0_i32_0, %c0_i32_1 : i32, i32, i32
  }
  func.func @transform_14(%arg0: i32) -> (i32, i32, i32) {
    %c0_i32 = arith.constant 0 : i32
    %c0_i32_0 = arith.constant 0 : i32
    %c0_i32_1 = arith.constant 0 : i32
    %c0_i32_2 = arith.constant 0 : i32
    return %c0_i32, %c0_i32_0, %c0_i32_1 : i32, i32, i32
  }
  func.func @transform_15(%arg0: i32) -> (i32, i32, i32) {
    %c0_i32 = arith.constant 0 : i32
    %c0_i32_0 = arith.constant 0 : i32
    %c0_i32_1 = arith.constant 0 : i32
    %c0_i32_2 = arith.constant 0 : i32
    return %c0_i32, %c0_i32_0, %c0_i32_1 : i32, i32, i32
  }
  func.func @transform_16(%arg0: i32) -> (i32, i32, i32) {
    %c0_i32 = arith.constant 0 : i32
    %c0_i32_0 = arith.constant 0 : i32
    %c0_i32_1 = arith.constant 0 : i32
    %c0_i32_2 = arith.constant 0 : i32
    return %c0_i32, %c0_i32_0, %c0_i32_1 : i32, i32, i32
  }
  func.func @transform_17(%arg0: i32) -> (i32, i32, i32) {
    %c0_i32 = arith.constant 0 : i32
    %c0_i32_0 = arith.constant 0 : i32
    %c0_i32_1 = arith.constant 0 : i32
    %c0_i32_2 = arith.constant 0 : i32
    return %c0_i32, %c0_i32_0, %c0_i32_1 : i32, i32, i32
  }
  func.func @transform_18(%arg0: i32) -> (i32, i32, i32) {
    %c0_i32 = arith.constant 0 : i32
    %c0_i32_0 = arith.constant 0 : i32
    %c0_i32_1 = arith.constant 0 : i32
    %c0_i32_2 = arith.constant 0 : i32
    return %c0_i32, %c0_i32_0, %c0_i32_1 : i32, i32, i32
  }
  func.func @transform_19(%arg0: i32) -> (i32, i32, i32) {
    %c0_i32 = arith.constant 0 : i32
    %c0_i32_0 = arith.constant 0 : i32
    %c0_i32_1 = arith.constant 0 : i32
    %c0_i32_2 = arith.constant 0 : i32
    return %c0_i32, %c0_i32_0, %c0_i32_1 : i32, i32, i32
  }
  func.func @transform_20(%arg0: i32) -> (i32, i32, i32) {
    %c0_i32 = arith.constant 0 : i32
    %c0_i32_0 = arith.constant 0 : i32
    %c0_i32_1 = arith.constant 0 : i32
    %c0_i32_2 = arith.constant 0 : i32
    return %c0_i32, %c0_i32_0, %c0_i32_1 : i32, i32, i32
  }
  func.func @transform_21(%arg0: i32) -> (i32, i32, i32) {
    %c0_i32 = arith.constant 0 : i32
    %c0_i32_0 = arith.constant 0 : i32
    %c0_i32_1 = arith.constant 0 : i32
    %c0_i32_2 = arith.constant 0 : i32
    return %c0_i32, %c0_i32_0, %c0_i32_1 : i32, i32, i32
  }
  func.func @transform_22(%arg0: i32) -> (i32, i32, i32) {
    %c0_i32 = arith.constant 0 : i32
    %c0_i32_0 = arith.constant 0 : i32
    %c0_i32_1 = arith.constant 0 : i32
    %c0_i32_2 = arith.constant 0 : i32
    return %c0_i32, %c0_i32_0, %c0_i32_1 : i32, i32, i32
  }
  func.func @transform_23(%arg0: i32) -> (i32, i32) {
    %c0_i32 = arith.constant 0 : i32
    %c0_i32_0 = arith.constant 0 : i32
    %c0_i32_1 = arith.constant 0 : i32
    return %c0_i32, %c0_i32_0 : i32, i32
  }
  func.func @transform_24(%arg0: i32) -> (i32, i32) {
    %c0_i32 = arith.constant 0 : i32
    %c0_i32_0 = arith.constant 0 : i32
    %c0_i32_1 = arith.constant 0 : i32
    return %c0_i32, %c0_i32_0 : i32, i32
  }
  func.func @transform_25(%arg0: i32) -> (i32, i32, i32) {
    %c0_i32 = arith.constant 0 : i32
    %c0_i32_0 = arith.constant 0 : i32
    %c0_i32_1 = arith.constant 0 : i32
    return %arg0, %c0_i32, %c0_i32_0 : i32, i32, i32
  }
}

</mosaic_0001>

<bundles_post_ra>
// kernel: mem_transformer_forward.1
= control target key start
LH: loop header
LB: loop body
LE: loop exit
PB: predicated region body
PF: predicated region fallthrough
CT: control target
= control target key end

     0   :  { %s7007_s0 = inlined_call_operand.vmem [shape: f32[2,8,32], index: 0, kind: input, shape index: {}]   ;;  %s7008_s1 = inlined_call_operand.vmem [shape: f32[2,2,32], index: 1, kind: input, shape index: {}]   ;;  %s7009_s2 = inlined_call_operand.vmem [shape: f32[2,2,32], index: 2, kind: input, shape index: {}]   ;;  %s7010_s3 = inlined_call_operand.vmem [shape: f32[8,32,32], index: 3, kind: input, shape index: {}]   ;;  %s7011_s4 = inlined_call_operand.hbm [shape: f32[8,32,32], index: 4, kind: input, shape index: {}]   ;;  %s7012_s5 = inlined_call_operand.vmem [shape: f32[8,1,32], index: 5, kind: input, shape index: {}]   ;;  %s7013_s6 = inlined_call_operand.vmem [shape: f32[32,32], index: 6, kind: input, shape index: {}]   ;;  %s7014_s7 = inlined_call_operand.vmem [shape: f32[32,32], index: 7, kind: input, shape index: {}]   ;;  %s7015_s8 = inlined_call_operand.vmem [shape: f32[1,32], index: 8, kind: input, shape index: {}]   ;;  %s7016_s9 = inlined_call_operand.vmem [shape: f32[8,32], index: 9, kind: input, shape index: {}]   ;;  %s7017_s10 = inlined_call_operand.vmem [shape: f32[8,8], index: 10, kind: input, shape index: {}]   ;;  %s7018_s11 = inlined_call_operand.hbm [shape: f32[2,32,96], index: 11, kind: input, shape index: {}]   ;;  %s7019_s12 = inlined_call_operand.vmem [shape: f32[2,1,96], index: 12, kind: input, shape index: {}]   ;;  %s7020_s13 = inlined_call_operand.hbm [shape: f32[2,32,32], index: 13, kind: input, shape index: {}]   ;;  %s7021_s14 = inlined_call_operand.vmem [shape: f32[2,1,32], index: 14, kind: input, shape index: {}]   ;;  %s7022_s15 = inlined_call_operand.hbm [shape: f32[2,32,32], index: 15, kind: input, shape index: {}]   ;;  %s7023_s16 = inlined_call_operand.vmem [shape: f32[2,1,32], index: 16, kind: input, shape index: {}]   ;;  %s7024_s17 = inlined_call_operand.hbm [shape: f32[2,32,32], index: 17, kind: input, shape index: {}]   ;;  %s7025_s18 = inlined_call_operand.vmem [shape: f32[2,1,32], index: 18, kind: input, shape index: {}]   ;;  %s7026_s19 = inlined_call_operand.vmem [shape: f32[2,1,32], index: 19, kind: input, shape index: {}]   ;;  %s7027_s20 = inlined_call_operand.vmem [shape: f32[2,1,32], index: 20, kind: input, shape index: {}]   ;;  %s7028_s21 = inlined_call_operand.vmem [shape: f32[2,1,32], index: 21, kind: input, shape index: {}]   ;;  %s7029_s22 = inlined_call_operand.vmem [shape: f32[2,1,32], index: 22, kind: input, shape index: {}]   ;;  %s7030_s23 = inlined_call_operand.hbm [shape: f32[32,128], index: 23, kind: input, shape index: {}]   ;;  %s7031_s24 = inlined_call_operand.vmem [shape: f32[1,128], index: 24, kind: input, shape index: {}]   ;;  %s7032_s25 = inlined_call_operand.vmem [shape: f32[2,8,128], index: 25, kind: output, shape index: {}]  }
   0x1   :  { %7040 = sst [smem:[#allocation18_spill]] %s7007_s0 }
   0x2   :  { %7041 = sst [smem:[#allocation19_spill]] %s7008_s1 }
   0x3   :  { %7042 = sst [smem:[#allocation20_spill]] %s7009_s2 }
   0x4   :  { %7043 = sst [smem:[#allocation21_spill]] %s7010_s3 }
   0x5   :  { %7044 = sst [smem:[#allocation22_spill]] %s7011_s4 }
   0x6   :  { %7045 = sst [smem:[#allocation23_spill]] %s7012_s5 }
   0x7   :  { %7046 = sst [smem:[#allocation24_spill]] %s7013_s6 }
   0x8   :  { %7047 = sst [smem:[#allocation25_spill]] %s7014_s7 }
   0x9   :  { %7048 = sst [smem:[#allocation26_spill]] %s7015_s8 }
   0xa   :  { %7049 = sst [smem:[#allocation27_spill]] %s7016_s9 }
   0xb   :  { %7050 = sst [smem:[#allocation28_spill]] %s7018_s11 }
   0xc   :  { %7051 = sst [smem:[#allocation29_spill]] %s7022_s15 }
   0xd   :  { %7052 = sst [smem:[#allocation30_spill]] %s7032_s25 }
   0xe   :  { %30 = vsyncpa [#allocation4], 0 }
   0xf   :  { %31 = vsyncpa [#allocation6], 0 }
  0x10   :  { %32 = vsyncpa [#allocation9], 0 }
  0x11   :  { %33 = vsyncpa [#allocation12], 0  ;;  %s5969_s29 = smov 0  }
  0x12 LB: > { %7053 = sst [smem:[#allocation17_spill]] %s5823_s29  ;;  %s5975_s2 = sadd.s32 4294967295, %s5823_s29   ;;  %s5823_s29 = sphi %s5969_s29, %s39_s29  }
  0x13   : > { %p5020_p0 = scmp.ge.s32.totalorder %s5823_s29, 1  ;;  %p610_p1 = scmp.lt.s32.totalorder %s5823_s29, 3 }
  0x14   : > { %p5272_p2 = scmp.eq.s32.totalorder %s5975_s2, 0  ;;  %s7054_s11 = sld [smem:[#allocation28_spill]] }
  0x15   : > { %p5983_p3 = pnand %p5020_p0, %p610_p1  ;;  %s7056_s15 = sld [smem:[#allocation29_spill]] }
  0x16   : > { %s5825_s27 = smov [#allocation5]   ;;  %s5826_s9 = smov [#allocation8]  }
  0x17   : > { %p5253_p4 = pneg %p5983_p3  ;;  %s658_s4 = sshll.u32 %s5825_s27, 4  ;;  %s659_s4 = int_to_ptr.vmem [resolvable:$true] %s658_s4 }
  0x18   : > { %s692_s5 = sshll.u32 %s5826_s9, 4  ;;  %s7058_s30 = sld [smem:[#allocation22_spill]]  ;;  %s693_s5 = int_to_ptr.vmem [resolvable:$true] %s692_s5 }
  0x19   : > { %p5994_p5 = pnand %p5272_p2, %p5253_p4  ;;  %s5827_s1 = smov 128  }
  0x1a   : > { %s656_s7 = sshll.u32 %s7054_s11, 4  ;;  %s5828_s27 = smov 8   ;;  %s657_s7 = int_to_ptr.hbm [resolvable:$true] %s656_s7 }
  0x1b   : > { %s690_s8 = sshll.u32 %s7056_s15, 4  ;;  %s5829_s11 = smov [#allocation3]   ;;  %s691_s8 = int_to_ptr.hbm [resolvable:$true] %s690_s8 }
  0x1c   : > { %5259 = dma.hbm_to_vmem [thread:$0]  (!%p5994_p5), %s657_s7, 1024, %s659_s4, [#allocation6], %s5827_s1, %s5827_s1, %s5828_s27  }
  0x1d   : > { %5265 = dma.hbm_to_vmem [thread:$0]  (!%p5994_p5), %s691_s8, 1024, %s693_s5, [#allocation9], %s5827_s1, %s5827_s1, %s5828_s27  }
  0x1e   : > { %s624_s26 = sshll.u32 %s7058_s30, 4  ;;  %s626_s15 = sshll.u32 %s5829_s11, 4  ;;  %s625_s26 = int_to_ptr.hbm [resolvable:$true] %s624_s26  ;;  %s627_s15 = int_to_ptr.vmem [resolvable:$true] %s626_s15 }
  0x1f   : > { %s673_s9 = sshll.u32 %s7020_s13, 4  ;;  %s707_s30 = sshll.u32 %s7024_s17, 4  ;;  %s674_s9 = int_to_ptr.hbm [resolvable:$true] %s673_s9  ;;  %s708_s30 = int_to_ptr.hbm [resolvable:$true] %s707_s30 }
  0x20   : > { %5256 = dma.hbm_to_vmem [thread:$0]  (!%p5994_p5), %s625_s26, 4096, %s627_s15, [#allocation4], %s5827_s1, %s5827_s1, %s5828_s27  }
  0x21   : > { %s5830_s7 = smov [#allocation7]   ;;  %s5831_s11 = smov [#allocation10]  }
  0x22   : > { %s675_s4 = sshll.u32 %s5830_s7, 4  ;;  %s709_s8 = sshll.u32 %s5831_s11, 4  ;;  %s676_s4 = int_to_ptr.vmem [resolvable:$true] %s675_s4  ;;  %s710_s8 = int_to_ptr.vmem [resolvable:$true] %s709_s8 }
  0x23   : > { %5262 = dma.hbm_to_vmem [thread:$0]  (!%p5994_p5), %s674_s9, 1024, %s676_s4, [#allocation6], %s5827_s1, %s5827_s1, %s5828_s27  }
  0x24   : > { %s736_s29 = sshll.u32 %s7030_s23, 4  ;;  %s5832_s15 = smov [#allocation11]   ;;  %s737_s29 = int_to_ptr.hbm [resolvable:$true] %s736_s29 }
  0x25   : > { %5268 = dma.hbm_to_vmem [thread:$0]  (!%p5994_p5), %s708_s30, 1024, %s710_s8, [#allocation9], %s5827_s1, %s5827_s1, %s5828_s27  }
  0x26   : > { %s738_s26 = sshll.u32 %s5832_s15, 4  ;;  %778 = sbr.rel (%p5983_p3) target bundleno = 6813 (0x1a9d), region = 120  ;;  %s739_s26 = int_to_ptr.vmem [resolvable:$true] %s738_s26 }
  0x27   : > { %5271 = dma.hbm_to_vmem [thread:$0]  (!%p5994_p5), %s737_s29, 512, %s739_s26, [#allocation12], %s5827_s1, %s5827_s1, %s5828_s27  }
  0x2b   : > { %5806 = dma.done.wait (%p5272_p2), [#allocation4], 4096  }
  0x2c   : > { %5808 = vsyncadd (%p5272_p2), [#allocation4], 4294963200 }
  0x2d   : > { %5810 = dma.done.wait (%p5272_p2), [#allocation6], 2048  }
  0x2e   : > { %5812 = vsyncadd (%p5272_p2), [#allocation6], 4294965248 }
  0x2f   : > { %5814 = dma.done.wait (%p5272_p2), [#allocation9], 2048  }
  0x30   : > { %5816 = vsyncadd (%p5272_p2), [#allocation9], 4294965248 }
  0x31   : > { %5818 = dma.done.wait (%p5272_p2), [#allocation12], 512  }
  0x32   : > { %5820 = vsyncadd (%p5272_p2), [#allocation12], 4294966784  ;;  %p878_p6 = scmp.lt.s32.totalorder %s5975_s2, 1  ;;  %s7059_s27 = sld [smem:[#allocation21_spill]]  ;;  %vm905_vm0 = vcmask 261120   ;;  %v6093_v14 = vld [vmem:[#allocation3 + $0x18] sm:$0xff] }
  0x33   : > { %s7060_s0 = sld [smem:[#allocation18_spill]]  ;;  %v6095_v15 = vld [vmem:[#allocation3 + $0x38] sm:$0xff]  ;;  %v6100_v17 = vld [vmem:[#allocation3 + $0x10] sm:$0xff]  ;;  %v6111_v21 = vld [vmem:[#allocation3 + $0x8] sm:$0xff]  ;;  %vm1188_vm13 = vcmask 253952   ;;  %s5834_s8 = smov 80  }
  0x34   : > { %s7073_s2 = smov (!%p878_p6, %s5975_s2), 1  ;;  %v6098_v16 = vld [vmem:[#allocation3 + $0x78] sm:$0xff]  ;;  %v6107_v19 = vld [vmem:[#allocation3 + $0x30] sm:$0xff]  ;;  %s7061_s7 = sld [smem:[#allocation19_spill]]  ;;  %v6122_v22 = vld [vmem:[#allocation3 + $0x28] sm:$0xff] }
  0x35   : > { %s5035_s3 = sshll.u32 %s7073_s2, 3  ;;  %s5036_s28 = sshll.u32 %s7073_s2, 1  ;;  %v6109_v20 = vld [vmem:[#allocation3 + $0x70] sm:$0xff]  ;;  %v6124_v23 = vld [vmem:[#allocation3 + $0x68] sm:$0xff]  ;;  %v6130_v25 = vld [vmem:[#allocation3] sm:$0xff] }
  0x36   : > { %v6132_v26 = vld [vmem:[#allocation3 + $0x20] sm:$0xff]  ;;  %v6146_v30 = vld [vmem:[#allocation3 + $0x58] sm:$0xff]  ;;  %v6152_v31 = vld [vmem:[#allocation3 + $0x50] sm:$0xff]  ;;  %s7062_s26 = sld [smem:[#allocation23_spill]]  ;;  %s5835_s5 = smov 112  }
  0x37   : > { %v6139_v28 = vld [vmem:[#allocation3 + $0x60] sm:$0xff]  ;;  %v6160_v32 = vld [vmem:[#allocation3 + $0x48] sm:$0xff]  ;;  %s7063_s25 = sld [smem:[#allocation20_spill]] }
  0x38   : > { %v900_v0 = vld [vmem:[%s7059_s27 + $0x18] sm:$0xff]  ;;  %v899_v3 = vld [vmem:[%s7059_s27 + $0x10] sm:$0xff]  ;;  %v898_v6 = vld [vmem:[%s7059_s27 + $0x8] sm:$0xff]  ;;  %s7065_s11 = sld [smem:[#allocation25_spill]] }
  0x39   : > { %v5043_v1 = vld [vmem:[%s7059_s27 + $0x38] sm:$0xff]  ;;  %921 = vmatpush.msra.mxu0 %v900_v0  ;;  %v5042_v4 = vld [vmem:[%s7059_s27 + $0x30] sm:$0xff]  ;;  %v5041_v7 = vld [vmem:[%s7059_s27 + $0x28] sm:$0xff]  ;;  %s6074_s6 = scalar_lea.vmem %s7060_s0, %s5035_s3  ;;  %s7068_s15 = sld [smem:[#allocation26_spill]] }
  0x3a   : > { %v5055_v2 = vld [vmem:[%s7059_s27 + $0x78] sm:$0xff]  ;;  %951 = vmatpush.msra.mxu1 %v5043_v1  ;;  %v5054_v5 = vld [vmem:[%s7059_s27 + $0x70] sm:$0xff]  ;;  %v5053_v8 = vld [vmem:[%s7059_s27 + $0x68] sm:$0xff]  ;;  %s6118_s4 = scalar_lea.vmem %s7061_s7, %s5036_s28  ;;  %s7069_s0 = sld [smem:[#allocation27_spill]] }
  0x3b   : > { %1011 = vmatpush.msra.mxu3 %v5055_v2  ;;  %922 = vmatpush.msra.mxu0 %v899_v3  ;;  %v897_v9 = vld [vmem:[%s7059_s27] sm:$0xff]  ;;  %v5049_v13 = vld [vmem:[%s7059_s27 + $0x58] sm:$0xff]  ;;  %v5048_v18 = vld [vmem:[%s7059_s27 + $0x50] sm:$0xff]  ;;  %s5833_s7 = smov 96   ;;  %s7070_s30 = sld [smem:[#allocation30_spill]] }
  0x3c   : > { %952 = vmatpush.msra.mxu1 %v5042_v4  ;;  %v5040_v10 = vld [vmem:[%s7059_s27 + $0x20] sm:$0xff]  ;;  %981 = vmatpush.msra.mxu2 %v5049_v13  ;;  %v5047_v24 = vld [vmem:[%s7059_s27 + $0x48] sm:$0xff] }
  0x3d   : > { %1012 = vmatpush.msra.mxu3 %v5054_v5  ;;  %923 = vmatpush.msra.mxu0 %v898_v6  ;;  %v5052_v11 = vld [vmem:[%s7059_s27 + $0x60] sm:$0xff]  ;;  %v6166_v33 = vld [vmem:[#allocation3 + $0x40] sm:$0xff]  ;;  %s6227_s29 = scalar_lea.vmem %s7063_s25, %s5036_s28  ;;  %s5836_s28 = smov 48  }
  0x3e   : > { %953 = vmatpush.msra.mxu1 %v5041_v7  ;;  %v894_v12 = vld [vmem:[%s6074_s6] sm:$0xff]  ;;  %982 = vmatpush.msra.mxu2 %v5048_v18 }
  0x3f   : > { %1013 = vmatpush.msra.mxu3 %v5053_v8  ;;  %924 = vmatpush.msra.mxu0 %v897_v9  ;;  %v5046_v27 = vld [vmem:[%s7059_s27 + $0x40] sm:$0xff] }
  0x40   : > { %954 = vmatpush.msra.mxu1 %v5040_v10  ;;  %5039 = vmatmul.msk.f32.vlgmr.msra.gmra.mxu0 %vm905_vm0, %v894_v12  ;;  %v895_v29 = vld [vmem:[%s6118_s4] sm:$0x3]  ;;  %v5308_v41 = vld [vmem:[%s7062_s26 + $0x3] ss:$0 sm:$0xff]  ;;  %v5309_v56 = vld [vmem:[%s7062_s26 + $0x2] ss:$0 sm:$0xff] }
  0x41   : > { %1014 = vmatpush.msra.mxu3 %v5052_v11  ;;  %5045 = vmatmul.msk.f32.vlgmr.msra.gmra.mxu1 %vm905_vm0, %v894_v12  ;;  %v5306_v36 = vld [vmem:[%s7062_s26] ss:$0 sm:$0xff]  ;;  %v5307_v37 = vld [vmem:[%s7062_s26 + $0x1] ss:$0 sm:$0xff] }
  0x42   : > { %5057 = vmatmul.msk.f32.vlgmr.msra.gmra.mxu3 %vm905_vm0, %v894_v12  ;;  %1038 = vmatpush.msrb.mxu0 %v6093_v14 }
  0x43   : > { %1083 = vmatpush.msrb.mxu1 %v6095_v15  ;;  %1155 = vmatpush.msrb.mxu3 %v6098_v16 }
  0x44   : > { %1039 = vmatpush.msrb.mxu0 %v6100_v17  ;;  %983 = vmatpush.msra.mxu2 %v5047_v24 }
  0x45   : > { %1084 = vmatpush.msrb.mxu1 %v6107_v19  ;;  %1156 = vmatpush.msrb.mxu3 %v6109_v20 }
  0x46   : > { %1040 = vmatpush.msrb.mxu0 %v6111_v21  ;;  %984 = vmatpush.msra.mxu2 %v5046_v27  ;;  %v896_v27 = vld [vmem:[%s6227_s29] sm:$0x3] }
  0x47   : > { %1085 = vmatpush.msrb.mxu1 %v6122_v22  ;;  %1157 = vmatpush.msrb.mxu3 %v6124_v23 }
  0x48   : > { %1041 = vmatpush.msrb.mxu0 %v6130_v25  ;;  %5051 = vmatmul.msk.f32.vlgmr.msra.gmra.mxu2 %vm905_vm0, %v894_v12 }
  0x49   : > { %1086 = vmatpush.msrb.mxu1 %v6132_v26  ;;  %1158 = vmatpush.msrb.mxu3 %v6139_v28 }
  0x4a   : > { %5058 = vmatmul.msk.f32.vlgmr.msrb.gmra.mxu0 %vm905_vm0, %v895_v29  ;;  %5060 = vmatmul.msk.f32.vlgmr.msrb.gmra.mxu1 %vm905_vm0, %v895_v29 }
  0x4b   : > { %5063 = vmatmul.msk.f32.vlgmr.msrb.gmra.mxu3 %vm905_vm0, %v895_v29  ;;  %1209 = vmatpush.msra.mxu0 %v6093_v14 }
  0x4c   : > { %1128 = vmatpush.msrb.mxu2 %v6146_v30  ;;  %1256 = vmatpush.msra.mxu1 %v6095_v15 }
  0x4d   : > { %1332 = vmatpush.msra.mxu3 %v6098_v16  ;;  %1210 = vmatpush.msra.mxu0 %v6100_v17 }
  0x4e   : > { %1129 = vmatpush.msrb.mxu2 %v6152_v31  ;;  %1257 = vmatpush.msra.mxu1 %v6107_v19 }
  0x4f   : > { %1333 = vmatpush.msra.mxu3 %v6109_v20  ;;  %1211 = vmatpush.msra.mxu0 %v6111_v21 }
  0x50   : > { %1130 = vmatpush.msrb.mxu2 %v6160_v32  ;;  %1258 = vmatpush.msra.mxu1 %v6122_v22 }
  0x51   : > { %1334 = vmatpush.msra.mxu3 %v6124_v23  ;;  %1212 = vmatpush.msra.mxu0 %v6130_v25 }
  0x52   : > { %1131 = vmatpush.msrb.mxu2 %v6166_v33  ;;  %1259 = vmatpush.msra.mxu1 %v6132_v26 }
  0x53   : > { %5062 = vmatmul.msk.f32.vlgmr.msrb.gmra.mxu2 %vm905_vm0, %v895_v29  ;;  %1335 = vmatpush.msra.mxu3 %v6139_v28 }
  0x54   : > { %1303 = vmatpush.msra.mxu2 %v6146_v30  ;;  %1393 = vmatpush.msrb.mxu0 %v6093_v14 }
  0x55   : > { %1440 = vmatpush.msrb.mxu1 %v6095_v15  ;;  %1516 = vmatpush.msrb.mxu3 %v6098_v16 }
  0x56   : > { %1304 = vmatpush.msra.mxu2 %v6152_v31  ;;  %1394 = vmatpush.msrb.mxu0 %v6100_v17 }
  0x57   : > { %1441 = vmatpush.msrb.mxu1 %v6107_v19  ;;  %1517 = vmatpush.msrb.mxu3 %v6109_v20 }
  0x58   : > { %1305 = vmatpush.msra.mxu2 %v6160_v32  ;;  %1395 = vmatpush.msrb.mxu0 %v6111_v21 }
  0x59   : > { %1442 = vmatpush.msrb.mxu1 %v6122_v22  ;;  %1518 = vmatpush.msrb.mxu3 %v6124_v23 }
  0x5a   : > { %1306 = vmatpush.msra.mxu2 %v6166_v33  ;;  %1396 = vmatpush.msrb.mxu0 %v6130_v25 }
  0x5b   : > { %1443 = vmatpush.msrb.mxu1 %v6132_v26  ;;  %1519 = vmatpush.msrb.mxu3 %v6139_v28 }
  0x5c   : > { %1487 = vmatpush.msrb.mxu2 %v6146_v30 }
  0x5e   : > { %1488 = vmatpush.msrb.mxu2 %v6152_v31 }
  0x60   : > { %1489 = vmatpush.msrb.mxu2 %v6160_v32 }
  0x62   : > { %1490 = vmatpush.msrb.mxu2 %v6166_v33 }
  0xbd   : > { %v926_v34 = vpop.f32.mrf.mxu0 }
  0xbe   : > { %v956_v35 = vpop.f32.mrf.mxu1  ;;  %v6204_v39 = vadd.f32 %v5306_v36, %v926_v34 }
  0xbf   : > { %v6206_v40 = vadd.f32 %v5307_v37, %v956_v35 }
  0xc5   : > { %v1016_v38 = vpop.f32.mrf.mxu3 }
  0xc6   : > { %v6213_v47 = vadd.f32 %v5308_v41, %v1016_v38 }
  0xc7   : > { %v1043_v42 = vpop.f32.mrf.mxu0  ;;  %v1088_v44 = vpop.f32.mrf.mxu1 }
  0xc8   : > { %v1046_v43 = vadd.f32 %v1043_v42, %v6204_v39  ;;  %v1091_v45 = vadd.f32 %v1088_v44, %v6206_v40 }
  0xca   : > { %v5059_v46 = vmul.f32 -1.442695, %v1046_v43  ;;  %v5061_v48 = vmul.f32 -1.442695, %v1091_v45 }
  0xcb   : > { %v986_v51 = vpop.f32.mrf.mxu2 }
  0xcc   : > { %5332 = vpow2.f32 %v5059_v46  ;;  %v6219_v58 = vadd.f32 %v5309_v56, %v986_v51 }
  0xcd   : > { %5334 = vpow2.f32 %v5061_v48 }
  0xce   : > { %v1160_v49 = vpop.f32.mrf.mxu3 }
  0xcf   : > { %v1163_v50 = vadd.f32 %v1160_v49, %v6213_v47 }
  0xd1   : > { %v5064_v52 = vmul.f32 -1.442695, %v1163_v50 }
  0xd2   : > { %v5333_v53 = vpop.eup %5332 }
  0xd3   : > { %v5335_v54 = vpop.eup %5334  ;;  %v1050_v55 = vadd.f32 1.0, %v5333_v53  ;;  %5336 = vpow2.f32 %v5064_v52 }
  0xd4   : > { %v1095_v57 = vadd.f32 1.0, %v5335_v54 }
  0xd5   : > { %5338 = vrcp.f32 %v1050_v55  ;;  %v1062_v5 = vand.u32 2147483648, %v1050_v55  ;;  %v1060_v8 = vand.u32 2147483647, %v1050_v55  ;;  %vm1056_vm3 = vweird.f32 %v1050_v55 }
  0xd6   : > { %5340 = vrcp.f32 %v1095_v57  ;;  %v1133_v59 = vpop.f32.mrf.mxu2  ;;  %v1107_v6 = vand.u32 2147483648, %v1095_v57  ;;  %v1105_v10 = vand.u32 2147483647, %v1095_v57  ;;  %vm1101_vm4 = vweird.f32 %v1095_v57 }
  0xd7   : > { %v1136_v63 = vadd.f32 %v1133_v59, %v6219_v58  ;;  %v1063_v18 = vor.u32 1.1754944e-38, %v1062_v5  ;;  %vm1061_vm7 = vcmp.eq.f32.partialorder %v1060_v8, 8.507059e+37 }
  0xd8   : > { %v1108_v29 = vor.u32 1.1754944e-38, %v1107_v6  ;;  %vm1106_vm8 = vcmp.eq.f32.partialorder %v1105_v10, 8.507059e+37 }
  0xd9   : > { %v5337_v60 = vpop.eup %5336 }
  0xda   : > { %v1167_v61 = vadd.f32 1.0, %v5337_v60 }
  0xdb   : > { %v5339_v62 = vpop.eup %5338 }
  0xdc   : > { %v5341_v0 = vpop.eup %5340  ;;  %v1052_v1 = vmul.f32 %v5339_v62, %v1050_v55  ;;  %5342 = vrcp.f32 %v1167_v61  ;;  %vm1057_vm1 = vweird.f32 %v5339_v62  ;;  %v1179_v48 = vand.u32 2147483648, %v1167_v61 }
  0xdd   : > { %v1097_v2 = vmul.f32 %v5341_v0, %v1095_v57  ;;  %5344 = vtanh.f32 %v1136_v63  ;;  %vm1102_vm2 = vweird.f32 %v5341_v0  ;;  %vm1058_vm5 = vmor %vm1056_vm3, %vm1057_vm1  ;;  %vm1173_vm10 = vweird.f32 %v1167_v61 }
  0xde   : > { %v1053_v3 = vsub.f32 1.0, %v1052_v1  ;;  %vm1103_vm6 = vmor %vm1101_vm4, %vm1102_vm2  ;;  %v1177_v49 = vand.u32 2147483647, %v1167_v61  ;;  %v1180_v51 = vor.u32 1.1754944e-38, %v1179_v48 }
  0xdf   : > { %v1098_v4 = vsub.f32 1.0, %v1097_v2 }
  0xe0   : > { %v1054_v7 = vmul.f32 %v5339_v62, %v1053_v3  ;;  %vm1178_vm12 = vcmp.eq.f32.partialorder %v1177_v49, 8.507059e+37 }
  0xe1   : > { %v1099_v9 = vmul.f32 %v5341_v0, %v1098_v4 }
  0xe2   : > { %v5343_v11 = vpop.eup %5342  ;;  %v1055_v12 = vadd.f32 %v5339_v62, %v1054_v7 }
  0xe3   : > { %v1169_v13 = vmul.f32 %v5343_v11, %v1167_v61  ;;  %v1100_v24 = vadd.f32 %v5341_v0, %v1099_v9  ;;  %v5345_v35 = vpop.eup %5344  ;;  %vm1174_vm9 = vweird.f32 %v5343_v11 }
  0xe4   : > { %v1059_v34 = vsel %vm1058_vm5, %v5339_v62, %v1055_v12  ;;  %vm1175_vm11 = vmor %vm1173_vm10, %vm1174_vm9 }
  0xe5   : > { %v1170_v36 = vsub.f32 1.0, %v1169_v13  ;;  %v1064_v37 = vsel %vm1061_vm7, %v1063_v18, %v1059_v34  ;;  %v1104_v38 = vsel %vm1103_vm6, %v5341_v0, %v1100_v24 }
  0xe6   : > { %v1109_v41 = vsel %vm1106_vm8, %v1108_v29, %v1104_v38  ;;  %v1184_v42 = vmul.f32 %v5345_v35, %v1064_v37 }
  0xe7   : > { %v1171_v43 = vmul.f32 %v5343_v11, %v1170_v36  ;;  %v1183_v44 = vmul.f32 %v1109_v41, %v896_v27 }
  0xe9   : > { %v6230_v45 = vadd.f32 %v1184_v42, %v1183_v44  ;;  %v1172_v46 = vadd.f32 %v5343_v11, %v1171_v43 }
  0xeb   : > { %5346 = vtanh.f32 %v6230_v45  ;;  %v1176_v50 = vsel %vm1175_vm11, %v5343_v11, %v1172_v46  ;;  %vm1371_vm11 = vcmask 254977  }
  0xec   : > { %v1181_v53 = vsel %vm1178_vm12, %v1180_v51, %v1176_v50  ;;  %v1364_v50 = vrot.slane %v6230_v45, 7 }
  0xf1   : > { %v5347_v52 = vpop.eup %5346 }
  0xf2   : > { %v1187_v54 = vmul.f32 %v5347_v52, %v1181_v53 }
  0xf4   : > { %1189 = vst.msk [vmem:[#allocation2] sm:$0x1] %vm1188_vm13, %v1187_v54  ;;  %5065 = vmatmul.msk.f32.vlgmr.msra.gmra.mxu0 %vm905_vm0, %v1187_v54  ;;  %5067 = vmatmul.msk.f32.vlgmr.msra.gmra.mxu1 %vm905_vm0, %v1187_v54 }
  0xf5   : > { %5069 = vmatmul.msk.f32.vlgmr.msra.gmra.mxu2 %vm905_vm0, %v1187_v54  ;;  %5070 = vmatmul.msk.f32.vlgmr.msra.gmra.mxu3 %vm905_vm0, %v1187_v54 }
  0xf6   : > { %1577 = vmatpush.msra.mxu0 %v6093_v14  ;;  %1624 = vmatpush.msra.mxu1 %v6095_v15 }
  0xf7   : > { %1671 = vmatpush.msra.mxu2 %v6146_v30  ;;  %1700 = vmatpush.msra.mxu3 %v6098_v16 }
  0xf8   : > { %1578 = vmatpush.msra.mxu0 %v6100_v17  ;;  %1625 = vmatpush.msra.mxu1 %v6107_v19 }
  0xf9   : > { %1672 = vmatpush.msra.mxu2 %v6152_v31  ;;  %1701 = vmatpush.msra.mxu3 %v6109_v20 }
  0xfa   : > { %1579 = vmatpush.msra.mxu0 %v6111_v21  ;;  %1626 = vmatpush.msra.mxu1 %v6122_v22 }
  0xfb   : > { %1673 = vmatpush.msra.mxu2 %v6160_v32  ;;  %1702 = vmatpush.msra.mxu3 %v6124_v23 }
  0xfc   : > { %1580 = vmatpush.msra.mxu0 %v6130_v25  ;;  %1627 = vmatpush.msra.mxu1 %v6132_v26 }
  0xfd   : > { %1674 = vmatpush.msra.mxu2 %v6166_v33  ;;  %1703 = vmatpush.msra.mxu3 %v6139_v28 }
 0x171   : > { %v1214_v55 = vpop.f32.mrf.mxu0  ;;  %v1261_v56 = vpop.f32.mrf.mxu1 }
 0x172   : > { %v1218_v57 = vrot.slane %v1214_v55, 7  ;;  %v1265_v59 = vrot.slane %v1261_v56, 7 }
 0x174   : > { %v1220_v60 = vadd.f32 %v1218_v57, %v6204_v39  ;;  %v1267_v61 = vadd.f32 %v1265_v59, %v6206_v40 }
 0x176   : > { %v5066_v62 = vmul.f32 -1.442695, %v1220_v60  ;;  %v5068_v63 = vmul.f32 -1.442695, %v1267_v61 }
 0x178   : > { %5348 = vpow2.f32 %v5066_v62  ;;  %v1337_v0 = vpop.f32.mrf.mxu3  ;;  %v1308_v8 = vpop.f32.mrf.mxu2 }
 0x179   : > { %5350 = vpow2.f32 %v5068_v63  ;;  %v1341_v1 = vrot.slane %v1337_v0, 7  ;;  %v1312_v9 = vrot.slane %v1308_v8, 7 }
 0x17b   : > { %v1343_v2 = vadd.f32 %v1341_v1, %v6213_v47  ;;  %v1314_v13 = vadd.f32 %v1312_v9, %v6219_v58 }
 0x17d   : > { %v5071_v3 = vmul.f32 -1.442695, %v1343_v2 }
 0x17e   : > { %v5349_v4 = vpop.eup %5348 }
 0x17f   : > { %v5351_v5 = vpop.eup %5350  ;;  %v1224_v6 = vadd.f32 1.0, %v5349_v4  ;;  %5352 = vpow2.f32 %v5071_v3 }
 0x180   : > { %v1271_v7 = vadd.f32 1.0, %v5351_v5 }
 0x181   : > { %5354 = vrcp.f32 %v1224_v6  ;;  %v1236_v35 = vand.u32 2147483648, %v1224_v6  ;;  %v1234_v38 = vand.u32 2147483647, %v1224_v6  ;;  %vm1230_vm1 = vweird.f32 %v1224_v6 }
 0x182   : > { %5356 = vrcp.f32 %v1271_v7  ;;  %v1283_v36 = vand.u32 2147483648, %v1271_v7  ;;  %v1281_v42 = vand.u32 2147483647, %v1271_v7  ;;  %vm1277_vm2 = vweird.f32 %v1271_v7 }
 0x183   : > { %v1237_v46 = vor.u32 1.1754944e-38, %v1236_v35  ;;  %vm1235_vm5 = vcmp.eq.f32.partialorder %v1234_v38, 8.507059e+37 }
 0x184   : > { %v1284_v51 = vor.u32 1.1754944e-38, %v1283_v36  ;;  %vm1282_vm6 = vcmp.eq.f32.partialorder %v1281_v42, 8.507059e+37 }
 0x185   : > { %v5353_v10 = vpop.eup %5352 }
 0x186   : > { %v1347_v11 = vadd.f32 1.0, %v5353_v10 }
 0x187   : > { %v5355_v12 = vpop.eup %5354 }
 0x188   : > { %v5357_v18 = vpop.eup %5356  ;;  %v1226_v24 = vmul.f32 %v5355_v12, %v1224_v6  ;;  %5358 = vrcp.f32 %v1347_v11  ;;  %vm1231_vm14 = vweird.f32 %v5355_v12  ;;  %v1359_v45 = vand.u32 2147483648, %v1347_v11 }
 0x189   : > { %v1273_v27 = vmul.f32 %v5357_v18, %v1271_v7  ;;  %5360 = vtanh.f32 %v1314_v13  ;;  %vm1278_vm15 = vweird.f32 %v5357_v18  ;;  %vm1232_vm3 = vmor %vm1230_vm1, %vm1231_vm14  ;;  %vm1353_vm8 = vweird.f32 %v1347_v11 }
 0x18a   : > { %v1227_v29 = vsub.f32 1.0, %v1226_v24  ;;  %vm1279_vm4 = vmor %vm1277_vm2, %vm1278_vm15  ;;  %v1357_v0 = vand.u32 2147483647, %v1347_v11  ;;  %v1360_v2 = vor.u32 1.1754944e-38, %v1359_v45 }
 0x18b   : > { %v1274_v34 = vsub.f32 1.0, %v1273_v27 }
 0x18c   : > { %v1228_v37 = vmul.f32 %v5355_v12, %v1227_v29  ;;  %vm1358_vm10 = vcmp.eq.f32.partialorder %v1357_v0, 8.507059e+37 }
 0x18d   : > { %v1275_v41 = vmul.f32 %v5357_v18, %v1274_v34 }
 0x18e   : > { %v5359_v43 = vpop.eup %5358  ;;  %v1229_v44 = vadd.f32 %v5355_v12, %v1228_v37 }
 0x18f   : > { %v1276_v48 = vadd.f32 %v5357_v18, %v1275_v41  ;;  %v1349_v49 = vmul.f32 %v5359_v43, %v1347_v11  ;;  %v5361_v53 = vpop.eup %5360  ;;  %vm1354_vm7 = vweird.f32 %v5359_v43 }
 0x190   : > { %v1233_v52 = vsel %vm1232_vm3, %v5355_v12, %v1229_v44  ;;  %vm1355_vm9 = vmor %vm1353_vm8, %vm1354_vm7 }
 0x191   : > { %v1238_v54 = vsel %vm1235_vm5, %v1237_v46, %v1233_v52  ;;  %v1280_v55 = vsel %vm1279_vm4, %v5357_v18, %v1276_v48  ;;  %v1350_v56 = vsub.f32 1.0, %v1349_v49 }
 0x192   : > { %v1285_v57 = vsel %vm1282_vm6, %v1284_v51, %v1280_v55  ;;  %v1367_v59 = vmul.f32 %v5361_v53, %v1238_v54 }
 0x193   : > { %v1366_v60 = vmul.f32 %v1364_v50, %v1285_v57  ;;  %v1351_v61 = vmul.f32 %v5359_v43, %v1350_v56 }
 0x195   : > { %v6259_v62 = vadd.f32 %v1367_v59, %v1366_v60  ;;  %v1352_v63 = vadd.f32 %v5359_v43, %v1351_v61 }
 0x197   : > { %5362 = vtanh.f32 %v6259_v62  ;;  %v1356_v1 = vsel %vm1355_vm9, %v5359_v43, %v1352_v63  ;;  %v1548_v49 = vrot.slane %v6259_v62, 7 }
 0x198   : > { %v1361_v4 = vsel %vm1358_vm10, %v1360_v2, %v1356_v1  ;;  %vm1555_vm10 = vcmask 256002  }
 0x19d   : > { %v5363_v3 = vpop.eup %5362 }
 0x19e   : > { %v1370_v5 = vmul.f32 %v5363_v3, %v1361_v4 }
 0x1a0   : > { %1372 = vst.msk [vmem:[#allocation2] sm:$0x2] %vm1371_vm11, %v1370_v5  ;;  %v1378_v6 = vrot.slane %v1370_v5, 1 }
 0x1a2   : > { %5072 = vmatmul.msk.f32.vlgmr.msrb.gmra.mxu0 %vm905_vm0, %v1378_v6  ;;  %5074 = vmatmul.msk.f32.vlgmr.msrb.gmra.mxu1 %vm905_vm0, %v1378_v6 }
 0x1a3   : > { %5076 = vmatmul.msk.f32.vlgmr.msrb.gmra.mxu2 %vm905_vm0, %v1378_v6  ;;  %5077 = vmatmul.msk.f32.vlgmr.msrb.gmra.mxu3 %vm905_vm0, %v1378_v6 }
 0x1a4   : > { %1761 = vmatpush.msrb.mxu0 %v6093_v14  ;;  %1808 = vmatpush.msrb.mxu1 %v6095_v15 }
 0x1a5   : > { %1855 = vmatpush.msrb.mxu2 %v6146_v30  ;;  %1884 = vmatpush.msrb.mxu3 %v6098_v16 }
 0x1a6   : > { %1762 = vmatpush.msrb.mxu0 %v6100_v17  ;;  %1809 = vmatpush.msrb.mxu1 %v6107_v19 }
 0x1a7   : > { %1856 = vmatpush.msrb.mxu2 %v6152_v31  ;;  %1885 = vmatpush.msrb.mxu3 %v6109_v20 }
 0x1a8   : > { %1763 = vmatpush.msrb.mxu0 %v6111_v21  ;;  %1810 = vmatpush.msrb.mxu1 %v6122_v22 }
 0x1a9   : > { %1857 = vmatpush.msrb.mxu2 %v6160_v32  ;;  %1886 = vmatpush.msrb.mxu3 %v6124_v23 }
 0x1aa   : > { %1764 = vmatpush.msrb.mxu0 %v6130_v25  ;;  %1811 = vmatpush.msrb.mxu1 %v6132_v26 }
 0x1ab   : > { %1858 = vmatpush.msrb.mxu2 %v6166_v33  ;;  %1887 = vmatpush.msrb.mxu3 %v6139_v28 }
 0x21f   : > { %v1398_v14 = vpop.f32.mrf.mxu0  ;;  %v1445_v15 = vpop.f32.mrf.mxu1 }
 0x220   : > { %v1402_v16 = vrot.slane %v1398_v14, 6  ;;  %v1449_v17 = vrot.slane %v1445_v15, 6 }
 0x222   : > { %v1404_v19 = vadd.f32 %v1402_v16, %v6204_v39  ;;  %v1451_v20 = vadd.f32 %v1449_v17, %v6206_v40 }
 0x224   : > { %v5073_v21 = vmul.f32 -1.442695, %v1404_v19  ;;  %v5075_v22 = vmul.f32 -1.442695, %v1451_v20 }
 0x226   : > { %5364 = vpow2.f32 %v5073_v21  ;;  %v1521_v23 = vpop.f32.mrf.mxu3  ;;  %v1492_v7 = vpop.f32.mrf.mxu2 }
 0x227   : > { %5366 = vpow2.f32 %v5075_v22  ;;  %v1525_v25 = vrot.slane %v1521_v23, 6  ;;  %v1496_v8 = vrot.slane %v1492_v7, 6 }
 0x229   : > { %v1527_v26 = vadd.f32 %v1525_v25, %v6213_v47  ;;  %v1498_v12 = vadd.f32 %v1496_v8, %v6219_v58 }
 0x22b   : > { %v5078_v30 = vmul.f32 -1.442695, %v1527_v26 }
 0x22c   : > { %v5365_v31 = vpop.eup %5364 }
 0x22d   : > { %v5367_v32 = vpop.eup %5366  ;;  %v1408_v28 = vadd.f32 1.0, %v5365_v31  ;;  %5368 = vpow2.f32 %v5078_v30 }
 0x22e   : > { %v1455_v33 = vadd.f32 1.0, %v5367_v32 }
 0x22f   : > { %5370 = vrcp.f32 %v1408_v28  ;;  %v1420_v34 = vand.u32 2147483648, %v1408_v28  ;;  %v1418_v37 = vand.u32 2147483647, %v1408_v28  ;;  %vm1414_vm15 = vweird.f32 %v1408_v28 }
 0x230   : > { %5372 = vrcp.f32 %v1455_v33  ;;  %v1467_v35 = vand.u32 2147483648, %v1455_v33  ;;  %v1465_v41 = vand.u32 2147483647, %v1455_v33  ;;  %vm1461_vm1 = vweird.f32 %v1455_v33 }
 0x231   : > { %v1421_v44 = vor.u32 1.1754944e-38, %v1420_v34  ;;  %vm1419_vm4 = vcmp.eq.f32.partialorder %v1418_v37, 8.507059e+37 }
 0x232   : > { %v1468_v50 = vor.u32 1.1754944e-38, %v1467_v35  ;;  %vm1466_vm5 = vcmp.eq.f32.partialorder %v1465_v41, 8.507059e+37 }
 0x233   : > { %v5369_v9 = vpop.eup %5368 }
 0x234   : > { %v1531_v10 = vadd.f32 1.0, %v5369_v9 }
 0x235   : > { %v5371_v11 = vpop.eup %5370 }
 0x236   : > { %v5373_v13 = vpop.eup %5372  ;;  %v1410_v18 = vmul.f32 %v5371_v11, %v1408_v28  ;;  %5374 = vrcp.f32 %v1531_v10  ;;  %vm1415_vm12 = vweird.f32 %v5371_v11  ;;  %v1543_v62 = vand.u32 2147483648, %v1531_v10 }
 0x237   : > { %v1457_v24 = vmul.f32 %v5373_v13, %v1455_v33  ;;  %5376 = vtanh.f32 %v1498_v12  ;;  %vm1462_vm14 = vweird.f32 %v5373_v13  ;;  %vm1416_vm2 = vmor %vm1414_vm15, %vm1415_vm12  ;;  %vm1537_vm7 = vweird.f32 %v1531_v10 }
 0x238   : > { %v1411_v27 = vsub.f32 1.0, %v1410_v18  ;;  %vm1463_vm3 = vmor %vm1461_vm1, %vm1462_vm14  ;;  %v1541_v45 = vand.u32 2147483647, %v1531_v10  ;;  %v1544_v1 = vor.u32 1.1754944e-38, %v1543_v62 }
 0x239   : > { %v1458_v29 = vsub.f32 1.0, %v1457_v24 }
 0x23a   : > { %v1412_v36 = vmul.f32 %v5371_v11, %v1411_v27  ;;  %vm1542_vm9 = vcmp.eq.f32.partialorder %v1541_v45, 8.507059e+37 }
 0x23b   : > { %v1459_v38 = vmul.f32 %v5373_v13, %v1458_v29 }
 0x23c   : > { %v5375_v42 = vpop.eup %5374  ;;  %v1413_v43 = vadd.f32 %v5371_v11, %v1412_v36 }
 0x23d   : > { %v1460_v46 = vadd.f32 %v5373_v13, %v1459_v38  ;;  %v1533_v48 = vmul.f32 %v5375_v42, %v1531_v10  ;;  %v5377_v52 = vpop.eup %5376  ;;  %vm1538_vm6 = vweird.f32 %v5375_v42 }
 0x23e   : > { %v1417_v51 = vsel %vm1416_vm2, %v5371_v11, %v1413_v43  ;;  %vm1539_vm8 = vmor %vm1537_vm7, %vm1538_vm6 }
 0x23f   : > { %v1422_v53 = vsel %vm1419_vm4, %v1421_v44, %v1417_v51  ;;  %v1464_v54 = vsel %vm1463_vm3, %v5373_v13, %v1460_v46  ;;  %v1534_v55 = vsub.f32 1.0, %v1533_v48 }
 0x240   : > { %v1469_v56 = vsel %vm1466_vm5, %v1468_v50, %v1464_v54  ;;  %v1551_v57 = vmul.f32 %v5377_v52, %v1422_v53 }
 0x241   : > { %v1550_v59 = vmul.f32 %v1548_v49, %v1469_v56  ;;  %v1535_v60 = vmul.f32 %v5375_v42, %v1534_v55 }
 0x243   : > { %v6288_v61 = vadd.f32 %v1551_v57, %v1550_v59  ;;  %v1536_v63 = vadd.f32 %v5375_v42, %v1535_v60 }
 0x245   : > { %5378 = vtanh.f32 %v6288_v61  ;;  %v1540_v0 = vsel %vm1539_vm8, %v5375_v42, %v1536_v63  ;;  %v1732_v48 = vrot.slane %v6288_v61, 7 }
 0x246   : > { %v1545_v3 = vsel %vm1542_vm9, %v1544_v1, %v1540_v0 }
 0x24b   : > { %v5379_v2 = vpop.eup %5378 }
 0x24c   : > { %v1554_v4 = vmul.f32 %v5379_v2, %v1545_v3 }
 0x24e   : > { %1556 = vst.msk [vmem:[#allocation2] sm:$0x4] %vm1555_vm10, %v1554_v4  ;;  %v1562_v5 = vrot.slane %v1554_v4, 2 }
 0x250   : > { %5079 = vmatmul.msk.f32.vlgmr.msra.gmra.mxu0 %vm905_vm0, %v1562_v5  ;;  %5081 = vmatmul.msk.f32.vlgmr.msra.gmra.mxu1 %vm905_vm0, %v1562_v5 }
 0x251   : > { %5083 = vmatmul.msk.f32.vlgmr.msra.gmra.mxu2 %vm905_vm0, %v1562_v5  ;;  %5084 = vmatmul.msk.f32.vlgmr.msra.gmra.mxu3 %vm905_vm0, %v1562_v5 }
 0x2cd   : > { %v1582_v6 = vpop.f32.mrf.mxu0  ;;  %v1629_v14 = vpop.f32.mrf.mxu1 }
 0x2ce   : > { %v1586_v15 = vrot.slane %v1582_v6, 5  ;;  %v1633_v16 = vrot.slane %v1629_v14, 5 }
 0x2d0   : > { %v1588_v17 = vadd.f32 %v1586_v15, %v6204_v39  ;;  %v1635_v19 = vadd.f32 %v1633_v16, %v6206_v40 }
 0x2d2   : > { %v5080_v20 = vmul.f32 -1.442695, %v1588_v17  ;;  %v5082_v21 = vmul.f32 -1.442695, %v1635_v19 }
 0x2d4   : > { %5380 = vpow2.f32 %v5080_v20  ;;  %v1705_v22 = vpop.f32.mrf.mxu3  ;;  %v1676_v33 = vpop.f32.mrf.mxu2 }
 0x2d5   : > { %5382 = vpow2.f32 %v5082_v21  ;;  %v1709_v23 = vrot.slane %v1705_v22, 5  ;;  %v1680_v7 = vrot.slane %v1676_v33, 5  ;;  %v6311_v21 = vld [vmem:[#allocation3 + $0x18] sm:$0xff]  ;;  %v6329_v33 = vld [vmem:[#allocation3 + $0x70] sm:$0xff] }
 0x2d6   : > { %v6313_v22 = vld [vmem:[#allocation3 + $0x38] sm:$0xff]  ;;  %1945 = vmatpush.msra.mxu0 %v6311_v21 }
 0x2d7   : > { %v1711_v25 = vadd.f32 %v1709_v23, %v6213_v47  ;;  %v1682_v11 = vadd.f32 %v1680_v7, %v6219_v58  ;;  %v6315_v23 = vld [vmem:[#allocation3 + $0x58] sm:$0xff]  ;;  %1992 = vmatpush.msra.mxu1 %v6313_v22  ;;  %v6331_v7 = vld [vmem:[#allocation3 + $0x8] sm:$0xff] }
 0x2d8   : > { %2039 = vmatpush.msra.mxu2 %v6315_v23 }
 0x2d9   : > { %v5085_v26 = vmul.f32 -1.442695, %v1711_v25 }
 0x2da   : > { %v5381_v30 = vpop.eup %5380 }
 0x2db   : > { %v5383_v31 = vpop.eup %5382  ;;  %v1592_v32 = vadd.f32 1.0, %v5381_v30  ;;  %5384 = vpow2.f32 %v5085_v26  ;;  %v6319_v26 = vld [vmem:[#allocation3 + $0x78] sm:$0xff]  ;;  %v6321_v30 = vld [vmem:[#allocation3 + $0x10] sm:$0xff] }
 0x2dc   : > { %v1639_v28 = vadd.f32 1.0, %v5383_v31  ;;  %v6323_v31 = vld [vmem:[#allocation3 + $0x30] sm:$0xff]  ;;  %2068 = vmatpush.msra.mxu3 %v6319_v26  ;;  %1946 = vmatpush.msra.mxu0 %v6321_v30 }
 0x2dd   : > { %5386 = vrcp.f32 %v1592_v32  ;;  %v1604_v29 = vand.u32 2147483648, %v1592_v32  ;;  %v1602_v36 = vand.u32 2147483647, %v1592_v32  ;;  %vm1598_vm15 = vweird.f32 %v1592_v32  ;;  %1993 = vmatpush.msra.mxu1 %v6323_v31 }
 0x2de   : > { %5388 = vrcp.f32 %v1639_v28  ;;  %v1651_v34 = vand.u32 2147483648, %v1639_v28  ;;  %v1649_v38 = vand.u32 2147483647, %v1639_v28  ;;  %vm1645_vm1 = vweird.f32 %v1639_v28  ;;  %2069 = vmatpush.msra.mxu3 %v6329_v33  ;;  %1947 = vmatpush.msra.mxu0 %v6331_v7 }
 0x2df   : > { %v1605_v43 = vor.u32 1.1754944e-38, %v1604_v29  ;;  %vm1603_vm4 = vcmp.eq.f32.partialorder %v1602_v36, 8.507059e+37 }
 0x2e0   : > { %v1652_v49 = vor.u32 1.1754944e-38, %v1651_v34  ;;  %vm1650_vm5 = vcmp.eq.f32.partialorder %v1649_v38, 8.507059e+37 }
 0x2e1   : > { %v5385_v8 = vpop.eup %5384 }
 0x2e2   : > { %v1715_v9 = vadd.f32 1.0, %v5385_v8  ;;  %v6335_v8 = vld [vmem:[#allocation3 + $0x28] sm:$0xff] }
 0x2e3   : > { %v5387_v10 = vpop.eup %5386  ;;  %1994 = vmatpush.msra.mxu1 %v6335_v8 }
 0x2e4   : > { %v5389_v12 = vpop.eup %5388  ;;  %v1594_v13 = vmul.f32 %v5387_v10, %v1592_v32  ;;  %5390 = vrcp.f32 %v1715_v9  ;;  %vm1599_vm12 = vweird.f32 %v5387_v10  ;;  %v1727_v61 = vand.u32 2147483648, %v1715_v9 }
 0x2e5   : > { %v1641_v18 = vmul.f32 %v5389_v12, %v1639_v28  ;;  %5392 = vtanh.f32 %v1682_v11  ;;  %vm1646_vm14 = vweird.f32 %v5389_v12  ;;  %vm1600_vm2 = vmor %vm1598_vm15, %vm1599_vm12  ;;  %vm1721_vm7 = vweird.f32 %v1715_v9  ;;  %v6327_v28 = vld [vmem:[#allocation3 + $0x50] sm:$0xff] }
 0x2e6   : > { %v1595_v24 = vsub.f32 1.0, %v1594_v13  ;;  %vm1647_vm3 = vmor %vm1645_vm1, %vm1646_vm14  ;;  %v1725_v62 = vand.u32 2147483647, %v1715_v9  ;;  %v1728_v0 = vor.u32 1.1754944e-38, %v1727_v61  ;;  %vm1739_vm12 = vcmask 257027   ;;  %2040 = vmatpush.msra.mxu2 %v6327_v28  ;;  %v6346_v13 = vld [vmem:[#allocation3 + $0x20] sm:$0xff] }
 0x2e7   : > { %v1642_v27 = vsub.f32 1.0, %v1641_v18  ;;  %v6350_v18 = vld [vmem:[#allocation3 + $0x40] sm:$0xff]  ;;  %1995 = vmatpush.msra.mxu1 %v6346_v13 }
 0x2e8   : > { %v1596_v35 = vmul.f32 %v5387_v10, %v1595_v24  ;;  %vm1726_vm9 = vcmp.eq.f32.partialorder %v1725_v62, 8.507059e+37  ;;  %v6352_v24 = vld [vmem:[#allocation3 + $0x60] sm:$0xff] }
 0x2e9   : > { %v1643_v37 = vmul.f32 %v5389_v12, %v1642_v27 }
 0x2ea   : > { %v5391_v41 = vpop.eup %5390  ;;  %v1597_v42 = vadd.f32 %v5387_v10, %v1596_v35 }
 0x2eb   : > { %v1644_v44 = vadd.f32 %v5389_v12, %v1643_v37  ;;  %v1717_v46 = vmul.f32 %v5391_v41, %v1715_v9  ;;  %v5393_v51 = vpop.eup %5392  ;;  %vm1722_vm6 = vweird.f32 %v5391_v41  ;;  %v6337_v9 = vld [vmem:[#allocation3 + $0x48] sm:$0xff] }
 0x2ec   : > { %v1601_v50 = vsel %vm1600_vm2, %v5387_v10, %v1597_v42  ;;  %vm1723_vm8 = vmor %vm1721_vm7, %vm1722_vm6  ;;  %v6339_v10 = vld [vmem:[#allocation3 + $0x68] sm:$0xff]  ;;  %2041 = vmatpush.msra.mxu2 %v6337_v9 }
 0x2ed   : > { %v1606_v52 = vsel %vm1603_vm4, %v1605_v43, %v1601_v50  ;;  %v1648_v53 = vsel %vm1647_vm3, %v5389_v12, %v1644_v44  ;;  %v1718_v54 = vsub.f32 1.0, %v1717_v46  ;;  %v6344_v12 = vld [vmem:[#allocation3] sm:$0xff]  ;;  %2070 = vmatpush.msra.mxu3 %v6339_v10 }
 0x2ee   : > { %v1653_v55 = vsel %vm1650_vm5, %v1652_v49, %v1648_v53  ;;  %v1735_v56 = vmul.f32 %v5393_v51, %v1606_v52  ;;  %1948 = vmatpush.msra.mxu0 %v6344_v12  ;;  %2042 = vmatpush.msra.mxu2 %v6350_v18 }
 0x2ef   : > { %v1734_v57 = vmul.f32 %v1732_v48, %v1653_v55  ;;  %v1719_v59 = vmul.f32 %v5391_v41, %v1718_v54  ;;  %2071 = vmatpush.msra.mxu3 %v6352_v24 }
 0x2f1   : > { %v6301_v60 = vadd.f32 %v1735_v56, %v1734_v57  ;;  %v1720_v63 = vadd.f32 %v5391_v41, %v1719_v59 }
 0x2f3   : > { %5394 = vtanh.f32 %v6301_v60  ;;  %v1724_v45 = vsel %vm1723_vm8, %v5391_v41, %v1720_v63 }
 0x2f4   : > { %v1729_v2 = vsel %vm1726_vm9, %v1728_v0, %v1724_v45  ;;  %v1916_v0 = vrot.slane %v6301_v60, 7 }
 0x2f9   : > { %v5395_v1 = vpop.eup %5394 }
 0x2fa   : > { %v1738_v3 = vmul.f32 %v5395_v1, %v1729_v2 }
 0x2fc   : > { %1740 = vst.msk [vmem:[#allocation2] sm:$0x8] %vm1739_vm12, %v1738_v3  ;;  %v1746_v4 = vrot.slane %v1738_v3, 3 }
 0x2fe   : > { %5086 = vmatmul.msk.f32.vlgmr.msrb.gmra.mxu0 %vm905_vm0, %v1746_v4  ;;  %5088 = vmatmul.msk.f32.vlgmr.msrb.gmra.mxu1 %vm905_vm0, %v1746_v4 }
 0x2ff   : > { %5090 = vmatmul.msk.f32.vlgmr.msrb.gmra.mxu2 %vm905_vm0, %v1746_v4  ;;  %5091 = vmatmul.msk.f32.vlgmr.msrb.gmra.mxu3 %vm905_vm0, %v1746_v4 }
 0x300   : > { %2129 = vmatpush.msrb.mxu0 %v6311_v21  ;;  %2176 = vmatpush.msrb.mxu1 %v6313_v22 }
 0x301   : > { %2223 = vmatpush.msrb.mxu2 %v6315_v23  ;;  %2252 = vmatpush.msrb.mxu3 %v6319_v26 }
 0x302   : > { %2130 = vmatpush.msrb.mxu0 %v6321_v30  ;;  %2177 = vmatpush.msrb.mxu1 %v6323_v31 }
 0x303   : > { %2224 = vmatpush.msrb.mxu2 %v6327_v28  ;;  %2253 = vmatpush.msrb.mxu3 %v6329_v33 }
 0x304   : > { %2131 = vmatpush.msrb.mxu0 %v6331_v7  ;;  %2178 = vmatpush.msrb.mxu1 %v6335_v8 }
 0x305   : > { %2225 = vmatpush.msrb.mxu2 %v6337_v9  ;;  %2254 = vmatpush.msrb.mxu3 %v6339_v10 }
 0x306   : > { %2132 = vmatpush.msrb.mxu0 %v6344_v12  ;;  %2179 = vmatpush.msrb.mxu1 %v6346_v13 }
 0x307   : > { %2226 = vmatpush.msrb.mxu2 %v6350_v18  ;;  %2255 = vmatpush.msrb.mxu3 %v6352_v24 }
 0x37b   : > { %v1766_v5 = vpop.f32.mrf.mxu0  ;;  %v1813_v6 = vpop.f32.mrf.mxu1 }
 0x37c   : > { %v1770_v14 = vrot.slane %v1766_v5, 4  ;;  %v1817_v15 = vrot.slane %v1813_v6, 4 }
 0x37e   : > { %v1772_v16 = vadd.f32 %v1770_v14, %v6204_v39  ;;  %v1819_v17 = vadd.f32 %v1817_v15, %v6206_v40 }
 0x380   : > { %v5087_v19 = vmul.f32 -1.442695, %v1772_v16  ;;  %v5089_v20 = vmul.f32 -1.442695, %v1819_v17 }
 0x382   : > { %5396 = vpow2.f32 %v5087_v19  ;;  %v1889_v25 = vpop.f32.mrf.mxu3  ;;  %v1860_v37 = vpop.f32.mrf.mxu2 }
 0x383   : > { %5398 = vpow2.f32 %v5089_v20  ;;  %v1893_v32 = vrot.slane %v1889_v25, 4  ;;  %v1864_v38 = vrot.slane %v1860_v37, 4 }
 0x385   : > { %v1895_v11 = vadd.f32 %v1893_v32, %v6213_v47  ;;  %v1866_v44 = vadd.f32 %v1864_v38, %v6219_v58 }
 0x387   : > { %v5092_v27 = vmul.f32 -1.442695, %v1895_v11 }
 0x388   : > { %v5397_v29 = vpop.eup %5396 }
 0x389   : > { %v5399_v34 = vpop.eup %5398  ;;  %v1776_v35 = vadd.f32 1.0, %v5397_v29  ;;  %5400 = vpow2.f32 %v5092_v27 }
 0x38a   : > { %v1823_v36 = vadd.f32 1.0, %v5399_v34 }
 0x38b   : > { %5402 = vrcp.f32 %v1776_v35  ;;  %v1788_v52 = vand.u32 2147483648, %v1776_v35  ;;  %v1786_v55 = vand.u32 2147483647, %v1776_v35  ;;  %vm1782_vm1 = vweird.f32 %v1776_v35 }
 0x38c   : > { %5404 = vrcp.f32 %v1823_v36  ;;  %v1835_v53 = vand.u32 2147483648, %v1823_v36  ;;  %v1833_v57 = vand.u32 2147483647, %v1823_v36  ;;  %vm1829_vm2 = vweird.f32 %v1823_v36 }
 0x38d   : > { %v1789_v61 = vor.u32 1.1754944e-38, %v1788_v52  ;;  %vm1787_vm5 = vcmp.eq.f32.partialorder %v1786_v55, 8.507059e+37 }
 0x38e   : > { %v1836_v1 = vor.u32 1.1754944e-38, %v1835_v53  ;;  %vm1834_vm6 = vcmp.eq.f32.partialorder %v1833_v57, 8.507059e+37 }
 0x38f   : > { %v5401_v41 = vpop.eup %5400 }
 0x390   : > { %v1899_v42 = vadd.f32 1.0, %v5401_v41 }
 0x391   : > { %v5403_v43 = vpop.eup %5402 }
 0x392   : > { %v5405_v46 = vpop.eup %5404  ;;  %v1778_v48 = vmul.f32 %v5403_v43, %v1776_v35  ;;  %5406 = vrcp.f32 %v1899_v42  ;;  %vm1783_vm14 = vweird.f32 %v5403_v43  ;;  %v1911_v60 = vand.u32 2147483648, %v1899_v42 }
 0x393   : > { %v1825_v49 = vmul.f32 %v5405_v46, %v1823_v36  ;;  %5408 = vtanh.f32 %v1866_v44  ;;  %vm1830_vm15 = vweird.f32 %v5405_v46  ;;  %vm1784_vm3 = vmor %vm1782_vm1, %vm1783_vm14  ;;  %vm1905_vm8 = vweird.f32 %v1899_v42 }
 0x394   : > { %v1779_v50 = vsub.f32 1.0, %v1778_v48  ;;  %vm1831_vm4 = vmor %vm1829_vm2, %vm1830_vm15  ;;  %v1909_v25 = vand.u32 2147483647, %v1899_v42  ;;  %v1912_v11 = vor.u32 1.1754944e-38, %v1911_v60  ;;  %vm1923_vm15 = vcmask 258052  }
 0x395   : > { %v1826_v51 = vsub.f32 1.0, %v1825_v49 }
 0x396   : > { %v1780_v54 = vmul.f32 %v5403_v43, %v1779_v50  ;;  %vm1910_vm14 = vcmp.eq.f32.partialorder %v1909_v25, 8.507059e+37 }
 0x397   : > { %v1827_v56 = vmul.f32 %v5405_v46, %v1826_v51 }
 0x398   : > { %v5407_v59 = vpop.eup %5406  ;;  %v1781_v63 = vadd.f32 %v5403_v43, %v1780_v54 }
 0x399   : > { %v1828_v62 = vadd.f32 %v5405_v46, %v1827_v56  ;;  %v1901_v45 = vmul.f32 %v5407_v59, %v1899_v42  ;;  %v5409_v3 = vpop.eup %5408  ;;  %vm1906_vm7 = vweird.f32 %v5407_v59 }
 0x39a   : > { %v1785_v2 = vsel %vm1784_vm3, %v5403_v43, %v1781_v63  ;;  %vm1907_vm9 = vmor %vm1905_vm8, %vm1906_vm7 }
 0x39b   : > { %v1790_v4 = vsel %vm1787_vm5, %v1789_v61, %v1785_v2  ;;  %v1832_v5 = vsel %vm1831_vm4, %v5405_v46, %v1828_v62  ;;  %v1902_v6 = vsub.f32 1.0, %v1901_v45 }
 0x39c   : > { %v1837_v14 = vsel %vm1834_vm6, %v1836_v1, %v1832_v5  ;;  %v1919_v15 = vmul.f32 %v5409_v3, %v1790_v4 }
 0x39d   : > { %v1918_v16 = vmul.f32 %v1916_v0, %v1837_v14  ;;  %v1903_v17 = vmul.f32 %v5407_v59, %v1902_v6 }
 0x39f   : > { %v6378_v19 = vadd.f32 %v1919_v15, %v1918_v16  ;;  %v1904_v20 = vadd.f32 %v5407_v59, %v1903_v17 }
 0x3a1   : > { %5410 = vtanh.f32 %v6378_v19  ;;  %v1908_v32 = vsel %vm1907_vm9, %v5407_v59, %v1904_v20  ;;  %v2100_v45 = vrot.slane %v6378_v19, 7 }
 0x3a2   : > { %v1913_v29 = vsel %vm1910_vm14, %v1912_v11, %v1908_v32 }
 0x3a7   : > { %v5411_v27 = vpop.eup %5410 }
 0x3a8   : > { %v1922_v34 = vmul.f32 %v5411_v27, %v1913_v29 }
 0x3aa   : > { %1924 = vst.msk [vmem:[#allocation2] sm:$0x10] %vm1923_vm15, %v1922_v34  ;;  %v1930_v35 = vrot.slane %v1922_v34, 4 }
 0x3ac   : > { %5093 = vmatmul.msk.f32.vlgmr.msra.gmra.mxu0 %vm905_vm0, %v1930_v35  ;;  %5095 = vmatmul.msk.f32.vlgmr.msra.gmra.mxu1 %vm905_vm0, %v1930_v35 }
 0x3ad   : > { %5097 = vmatmul.msk.f32.vlgmr.msra.gmra.mxu2 %vm905_vm0, %v1930_v35  ;;  %5098 = vmatmul.msk.f32.vlgmr.msra.gmra.mxu3 %vm905_vm0, %v1930_v35 }
 0x3ae   : > { %2313 = vmatpush.msra.mxu0 %v6311_v21  ;;  %2360 = vmatpush.msra.mxu1 %v6313_v22 }
 0x3af   : > { %2407 = vmatpush.msra.mxu2 %v6315_v23  ;;  %2436 = vmatpush.msra.mxu3 %v6319_v26 }
 0x3b0   : > { %2314 = vmatpush.msra.mxu0 %v6321_v30  ;;  %2361 = vmatpush.msra.mxu1 %v6323_v31 }
 0x3b1   : > { %2408 = vmatpush.msra.mxu2 %v6327_v28  ;;  %2437 = vmatpush.msra.mxu3 %v6329_v33 }
 0x3b2   : > { %2315 = vmatpush.msra.mxu0 %v6331_v7  ;;  %2362 = vmatpush.msra.mxu1 %v6335_v8 }
 0x3b3   : > { %2409 = vmatpush.msra.mxu2 %v6337_v9  ;;  %2438 = vmatpush.msra.mxu3 %v6339_v10 }
 0x3b4   : > { %2316 = vmatpush.msra.mxu0 %v6344_v12  ;;  %2363 = vmatpush.msra.mxu1 %v6346_v13 }
 0x3b5   : > { %2410 = vmatpush.msra.mxu2 %v6350_v18  ;;  %2439 = vmatpush.msra.mxu3 %v6352_v24 }
 0x429   : > { %v1950_v21 = vpop.f32.mrf.mxu0  ;;  %v1997_v22 = vpop.f32.mrf.mxu1 }
 0x42a   : > { %v1954_v23 = vrot.slane %v1950_v21, 3  ;;  %v2001_v26 = vrot.slane %v1997_v22, 3 }
 0x42c   : > { %v1956_v30 = vadd.f32 %v1954_v23, %v6204_v39  ;;  %v2003_v31 = vadd.f32 %v2001_v26, %v6206_v40 }
 0x42e   : > { %v5094_v28 = vmul.f32 -1.442695, %v1956_v30  ;;  %v5096_v33 = vmul.f32 -1.442695, %v2003_v31 }
 0x430   : > { %5412 = vpow2.f32 %v5094_v28  ;;  %v2073_v7 = vpop.f32.mrf.mxu3  ;;  %v2044_v36 = vpop.f32.mrf.mxu2 }
 0x431   : > { %5414 = vpow2.f32 %v5096_v33  ;;  %v2077_v8 = vrot.slane %v2073_v7, 3  ;;  %v2048_v37 = vrot.slane %v2044_v36, 3 }
 0x433   : > { %v2079_v9 = vadd.f32 %v2077_v8, %v6213_v47  ;;  %v2050_v43 = vadd.f32 %v2048_v37, %v6219_v58 }
 0x435   : > { %v5099_v10 = vmul.f32 -1.442695, %v2079_v9 }
 0x436   : > { %v5413_v12 = vpop.eup %5412 }
 0x437   : > { %v5415_v13 = vpop.eup %5414  ;;  %v1960_v18 = vadd.f32 1.0, %v5413_v12  ;;  %5416 = vpow2.f32 %v5099_v10 }
 0x438   : > { %v2007_v24 = vadd.f32 1.0, %v5415_v13 }
 0x439   : > { %5418 = vrcp.f32 %v1960_v18  ;;  %v1972_v51 = vand.u32 2147483648, %v1960_v18  ;;  %v1970_v54 = vand.u32 2147483647, %v1960_v18  ;;  %vm1966_vm3 = vweird.f32 %v1960_v18 }
 0x43a   : > { %5420 = vrcp.f32 %v2007_v24  ;;  %v2019_v52 = vand.u32 2147483648, %v2007_v24  ;;  %v2017_v56 = vand.u32 2147483647, %v2007_v24  ;;  %vm2013_vm4 = vweird.f32 %v2007_v24 }
 0x43b   : > { %v1973_v63 = vor.u32 1.1754944e-38, %v1972_v51  ;;  %vm1971_vm7 = vcmp.eq.f32.partialorder %v1970_v54, 8.507059e+37 }
 0x43c   : > { %v2020_v0 = vor.u32 1.1754944e-38, %v2019_v52  ;;  %vm2018_vm8 = vcmp.eq.f32.partialorder %v2017_v56, 8.507059e+37 }
 0x43d   : > { %v5417_v38 = vpop.eup %5416 }
 0x43e   : > { %v2083_v41 = vadd.f32 1.0, %v5417_v38 }
 0x43f   : > { %v5419_v42 = vpop.eup %5418 }
 0x440   : > { %v5421_v44 = vpop.eup %5420  ;;  %v1962_v46 = vmul.f32 %v5419_v42, %v1960_v18  ;;  %5422 = vrcp.f32 %v2083_v41  ;;  %vm1967_vm1 = vweird.f32 %v5419_v42  ;;  %v2095_v19 = vand.u32 2147483648, %v2083_v41 }
 0x441   : > { %v2009_v48 = vmul.f32 %v5421_v44, %v2007_v24  ;;  %5424 = vtanh.f32 %v2050_v43  ;;  %vm2014_vm2 = vweird.f32 %v5421_v44  ;;  %vm1968_vm5 = vmor %vm1966_vm3, %vm1967_vm1  ;;  %vm2089_vm14 = vweird.f32 %v2083_v41 }
 0x442   : > { %v1963_v49 = vsub.f32 1.0, %v1962_v46  ;;  %vm2015_vm6 = vmor %vm2013_vm4, %vm2014_vm2  ;;  %v2093_v60 = vand.u32 2147483647, %v2083_v41  ;;  %v2096_v32 = vor.u32 1.1754944e-38, %v2095_v19  ;;  %vm2107_vm3 = vcmask 259077  }
 0x443   : > { %v2010_v50 = vsub.f32 1.0, %v2009_v48 }
 0x444   : > { %v1964_v53 = vmul.f32 %v5419_v42, %v1963_v49  ;;  %vm2094_vm2 = vcmp.eq.f32.partialorder %v2093_v60, 8.507059e+37 }
 0x445   : > { %v2011_v55 = vmul.f32 %v5421_v44, %v2010_v50 }
 0x446   : > { %v5423_v57 = vpop.eup %5422  ;;  %v1965_v59 = vadd.f32 %v5419_v42, %v1964_v53 }
 0x447   : > { %v2012_v61 = vadd.f32 %v5421_v44, %v2011_v55  ;;  %v2085_v62 = vmul.f32 %v5423_v57, %v2083_v41  ;;  %v5425_v2 = vpop.eup %5424  ;;  %vm2090_vm9 = vweird.f32 %v5423_v57 }
 0x448   : > { %v1969_v1 = vsel %vm1968_vm5, %v5419_v42, %v1965_v59  ;;  %vm2091_vm1 = vmor %vm2089_vm14, %vm2090_vm9 }
 0x449   : > { %v1974_v3 = vsel %vm1971_vm7, %v1973_v63, %v1969_v1  ;;  %v2016_v4 = vsel %vm2015_vm6, %v5421_v44, %v2012_v61  ;;  %v2086_v5 = vsub.f32 1.0, %v2085_v62 }
 0x44a   : > { %v2021_v6 = vsel %vm2018_vm8, %v2020_v0, %v2016_v4  ;;  %v2103_v14 = vmul.f32 %v5425_v2, %v1974_v3 }
 0x44b   : > { %v2102_v15 = vmul.f32 %v2100_v45, %v2021_v6  ;;  %v2087_v16 = vmul.f32 %v5423_v57, %v2086_v5 }
 0x44d   : > { %v6407_v17 = vadd.f32 %v2103_v14, %v2102_v15  ;;  %v2088_v20 = vadd.f32 %v5423_v57, %v2087_v16 }
 0x44f   : > { %5426 = vtanh.f32 %v6407_v17  ;;  %v2092_v25 = vsel %vm2091_vm1, %v5423_v57, %v2088_v20  ;;  %v2284_v62 = vrot.slane %v6407_v17, 7 }
 0x450   : > { %v2097_v27 = vsel %vm2094_vm2, %v2096_v32, %v2092_v25 }
 0x455   : > { %v5427_v11 = vpop.eup %5426 }
 0x456   : > { %v2106_v29 = vmul.f32 %v5427_v11, %v2097_v27 }
 0x458   : > { %2108 = vst.msk [vmem:[#allocation2] sm:$0x20] %vm2107_vm3, %v2106_v29  ;;  %v2114_v34 = vrot.slane %v2106_v29, 5 }
 0x45a   : > { %5100 = vmatmul.msk.f32.vlgmr.msrb.gmra.mxu0 %vm905_vm0, %v2114_v34  ;;  %5102 = vmatmul.msk.f32.vlgmr.msrb.gmra.mxu1 %vm905_vm0, %v2114_v34 }
 0x45b   : > { %5104 = vmatmul.msk.f32.vlgmr.msrb.gmra.mxu2 %vm905_vm0, %v2114_v34  ;;  %5105 = vmatmul.msk.f32.vlgmr.msrb.gmra.mxu3 %vm905_vm0, %v2114_v34 }
 0x4d7   : > { %v2134_v35 = vpop.f32.mrf.mxu0  ;;  %v2181_v21 = vpop.f32.mrf.mxu1 }
 0x4d8   : > { %v2138_v22 = vrot.slane %v2134_v35, 2  ;;  %v2185_v23 = vrot.slane %v2181_v21, 2 }
 0x4da   : > { %v2140_v26 = vadd.f32 %v2138_v22, %v6204_v39  ;;  %v2187_v30 = vadd.f32 %v2185_v23, %v6206_v40 }
 0x4dc   : > { %v5101_v31 = vmul.f32 -1.442695, %v2140_v26  ;;  %v5103_v28 = vmul.f32 -1.442695, %v2187_v30 }
 0x4de   : > { %5428 = vpow2.f32 %v5101_v31  ;;  %v2257_v33 = vpop.f32.mrf.mxu3  ;;  %v2228_v24 = vpop.f32.mrf.mxu2 }
 0x4df   : > { %5430 = vpow2.f32 %v5103_v28  ;;  %v2261_v7 = vrot.slane %v2257_v33, 2  ;;  %v2232_v36 = vrot.slane %v2228_v24, 2  ;;  %v5135_v24 = vld [vmem:[%s7059_s27 + $0xf8] sm:$0xff] }
 0x4e0   : > { %2593 = vmatpush.msrb.mxu3 %v5135_v24 }
 0x4e1   : > { %v2263_v8 = vadd.f32 %v2261_v7, %v6213_v47  ;;  %v2234_v42 = vadd.f32 %v2232_v36, %v6219_v58  ;;  %v5116_v36 = vld [vmem:[%s7059_s27 + $0x90] sm:$0xff] }
 0x4e3   : > { %v5106_v9 = vmul.f32 -1.442695, %v2263_v8 }
 0x4e4   : > { %v5429_v10 = vpop.eup %5428 }
 0x4e5   : > { %v5431_v12 = vpop.eup %5430  ;;  %v2144_v13 = vadd.f32 1.0, %v5429_v10  ;;  %5432 = vpow2.f32 %v5106_v9 }
 0x4e6   : > { %v2191_v18 = vadd.f32 1.0, %v5431_v12 }
 0x4e7   : > { %5434 = vrcp.f32 %v2144_v13  ;;  %v2156_v50 = vand.u32 2147483648, %v2144_v13  ;;  %v2154_v53 = vand.u32 2147483647, %v2144_v13  ;;  %vm2150_vm6 = vweird.f32 %v2144_v13 }
 0x4e8   : > { %5436 = vrcp.f32 %v2191_v18  ;;  %v2203_v51 = vand.u32 2147483648, %v2191_v18  ;;  %v2201_v55 = vand.u32 2147483647, %v2191_v18  ;;  %vm2197_vm7 = vweird.f32 %v2191_v18 }
 0x4e9   : > { %v2157_v59 = vor.u32 1.1754944e-38, %v2156_v50  ;;  %vm2155_vm14 = vcmp.eq.f32.partialorder %v2154_v53, 8.507059e+37  ;;  %v5120_v50 = vld [vmem:[%s7059_s27 + $0xa0] sm:$0xff] }
 0x4ea   : > { %v2204_v45 = vor.u32 1.1754944e-38, %v2203_v51  ;;  %vm2202_vm1 = vcmp.eq.f32.partialorder %v2201_v55, 8.507059e+37  ;;  %v5132_v53 = vld [vmem:[%s7059_s27 + $0xe0] sm:$0xff] }
 0x4eb   : > { %v5433_v37 = vpop.eup %5432 }
 0x4ec   : > { %v2267_v38 = vadd.f32 1.0, %v5433_v37  ;;  %v5122_v37 = vld [vmem:[%s7059_s27 + $0xb0] sm:$0xff] }
 0x4ed   : > { %v5435_v41 = vpop.eup %5434 }
 0x4ee   : > { %v5437_v43 = vpop.eup %5436  ;;  %v2146_v44 = vmul.f32 %v5435_v41, %v2144_v13  ;;  %5438 = vrcp.f32 %v2267_v38  ;;  %vm2151_vm4 = vweird.f32 %v5435_v41  ;;  %v2279_v17 = vand.u32 2147483648, %v2267_v38 }
 0x4ef   : > { %v2193_v46 = vmul.f32 %v5437_v43, %v2191_v18  ;;  %5440 = vtanh.f32 %v2234_v42  ;;  %vm2198_vm5 = vweird.f32 %v5437_v43  ;;  %vm2152_vm8 = vmor %vm2150_vm6, %vm2151_vm4  ;;  %vm2273_vm4 = vweird.f32 %v2267_v38  ;;  %v5115_v42 = vld [vmem:[%s7059_s27 + $0x88] sm:$0xff] }
 0x4f0   : > { %v2147_v48 = vsub.f32 1.0, %v2146_v44  ;;  %vm2199_vm9 = vmor %vm2197_vm7, %vm2198_vm5  ;;  %v2277_v19 = vand.u32 2147483647, %v2267_v38  ;;  %v2280_v25 = vor.u32 1.1754944e-38, %v2279_v17  ;;  %vm7039_vm7 = vcmask 260102   ;;  %v5121_v44 = vld [vmem:[%s7059_s27 + $0xa8] sm:$0xff] }
 0x4f1   : > { %v2194_v49 = vsub.f32 1.0, %v2193_v46  ;;  %v5127_v46 = vld [vmem:[%s7059_s27 + $0xc8] sm:$0xff]  ;;  %v6524_v17 = vld [vmem:[#allocation3 + $0x88] sm:$0xff] }
 0x4f2   : > { %v2148_v52 = vmul.f32 %v5435_v41, %v2147_v48  ;;  %vm2278_vm6 = vcmp.eq.f32.partialorder %v2277_v19, 8.507059e+37  ;;  %v5133_v48 = vld [vmem:[%s7059_s27 + $0xe8] sm:$0xff]  ;;  %v6526_v19 = vld [vmem:[#allocation3 + $0xa8] sm:$0xff] }
 0x4f3   : > { %v2195_v54 = vmul.f32 %v5437_v43, %v2194_v49  ;;  %v5114_v49 = vld [vmem:[%s7059_s27 + $0x80] sm:$0xff] }
 0x4f4   : > { %v5439_v56 = vpop.eup %5438  ;;  %v2149_v57 = vadd.f32 %v5435_v41, %v2148_v52  ;;  %v5126_v52 = vld [vmem:[%s7059_s27 + $0xc0] sm:$0xff] }
 0x4f5   : > { %v2196_v63 = vadd.f32 %v5437_v43, %v2195_v54  ;;  %v2269_v61 = vmul.f32 %v5439_v56, %v2267_v38  ;;  %v5441_v1 = vpop.eup %5440  ;;  %vm2274_vm2 = vweird.f32 %v5439_v56  ;;  %v5128_v38 = vld [vmem:[%s7059_s27 + $0xd0] sm:$0xff] }
 0x4f6   : > { %v2153_v0 = vsel %vm2152_vm8, %v5435_v41, %v2149_v57  ;;  %vm2275_vm5 = vmor %vm2273_vm4, %vm2274_vm2  ;;  %v5134_v41 = vld [vmem:[%s7059_s27 + $0xf0] sm:$0xff] }
 0x4f7   : > { %v2158_v2 = vsel %vm2155_vm14, %v2157_v59, %v2153_v0  ;;  %v2200_v3 = vsel %vm2199_vm9, %v5437_v43, %v2196_v63  ;;  %v2270_v4 = vsub.f32 1.0, %v2269_v61  ;;  %2594 = vmatpush.msrb.mxu3 %v5134_v41  ;;  %v6497_v61 = vld [vmem:[#allocation3 + $0x98] sm:$0xff] }
 0x4f8   : > { %v2205_v5 = vsel %vm2202_vm1, %v2204_v45, %v2200_v3  ;;  %v2287_v6 = vmul.f32 %v5441_v1, %v2158_v2  ;;  %v6505_v0 = vld [vmem:[#allocation3 + $0xf8] sm:$0xff]  ;;  %v6510_v3 = vld [vmem:[#allocation3 + $0x90] sm:$0xff] }
 0x4f9   : > { %v2286_v14 = vmul.f32 %v2284_v62, %v2205_v5  ;;  %v2271_v15 = vmul.f32 %v5439_v56, %v2270_v4  ;;  %2595 = vmatpush.msrb.mxu3 %v5133_v48  ;;  %v6499_v62 = vld [vmem:[#allocation3 + $0xb8] sm:$0xff]  ;;  %v6512_v4 = vld [vmem:[#allocation3 + $0xb0] sm:$0xff] }
 0x4fa   : > { %v6514_v5 = vld [vmem:[#allocation3 + $0xd0] sm:$0xff] }
 0x4fb   : > { %v6420_v16 = vadd.f32 %v2287_v6, %v2286_v14  ;;  %v2272_v20 = vadd.f32 %v5439_v56, %v2271_v15  ;;  %2596 = vmatpush.msrb.mxu3 %v5132_v53 }
 0x4fd   : > { %5442 = vtanh.f32 %v6420_v16  ;;  %v2276_v60 = vsel %vm2275_vm5, %v5439_v56, %v2272_v20  ;;  %v6522_v20 = vld [vmem:[#allocation3 + $0xf0] sm:$0xff] }
 0x4fe   : > { %v2281_v11 = vsel %vm2278_vm6, %v2280_v25, %v2276_v60 }
 0x503   : > { %v5443_v32 = vpop.eup %5442 }
 0x504   : > { %v2290_v27 = vmul.f32 %v5443_v32, %v2281_v11  ;;  %v6533_v32 = vld [vmem:[#allocation3 + $0xc8] sm:$0xff] }
 0x505   : > { %v6535_v11 = vld [vmem:[#allocation3 + $0xe8] sm:$0xff] }
 0x506   : > { %2292 = vst.msk [vmem:[#allocation2] sm:$0x40] %vm7039_vm7, %v2290_v27  ;;  %v2298_v29 = vrot.slane %v2290_v27, 6  ;;  %v6537_v27 = vld [vmem:[#allocation3 + $0x80] sm:$0xff] }
 0x508   : > { %5107 = vmatmul.msk.f32.vlgmr.msra.gmra.mxu0 %vm905_vm0, %v2298_v29  ;;  %5109 = vmatmul.msk.f32.vlgmr.msra.gmra.mxu1 %vm905_vm0, %v2298_v29 }
 0x509   : > { %5111 = vmatmul.msk.f32.vlgmr.msra.gmra.mxu2 %vm905_vm0, %v2298_v29  ;;  %5112 = vmatmul.msk.f32.vlgmr.msra.gmra.mxu3 %vm905_vm0, %v2298_v29 }
 0x50a   : > { %2738 = vmatpush.msra.mxu3 %v6505_v0 }
 0x50c   : > { %2739 = vmatpush.msra.mxu3 %v6522_v20 }
 0x50e   : > { %2740 = vmatpush.msra.mxu3 %v6535_v11 }
 0x585   : > { %v2318_v34 = vpop.f32.mrf.mxu0  ;;  %v2365_v35 = vpop.f32.mrf.mxu1 }
 0x586   : > { %v2322_v21 = vrot.slane %v2318_v34, 1  ;;  %v2369_v22 = vrot.slane %v2365_v35, 1  ;;  %v6543_v35 = vld [vmem:[#allocation3 + $0xa0] sm:$0xff] }
 0x588   : > { %v2324_v23 = vadd.f32 %v2322_v21, %v6204_v39  ;;  %v2371_v26 = vadd.f32 %v2369_v22, %v6206_v40  ;;  %v5117_v39 = vld [vmem:[%s7059_s27 + $0x98] sm:$0xff]  ;;  %v6545_v21 = vld [vmem:[#allocation3 + $0xc0] sm:$0xff] }
 0x589   : > { %v5123_v40 = vld [vmem:[%s7059_s27 + $0xb8] sm:$0xff]  ;;  %2503 = vmatpush.msrb.mxu0 %v5117_v39  ;;  %v6547_v22 = vld [vmem:[#allocation3 + $0xe0] sm:$0xff] }
 0x58a   : > { %v5108_v30 = vmul.f32 -1.442695, %v2324_v23  ;;  %v5110_v31 = vmul.f32 -1.442695, %v2371_v26  ;;  %2533 = vmatpush.msrb.mxu1 %v5123_v40  ;;  %2741 = vmatpush.msra.mxu3 %v6547_v22 }
 0x58b   : > { %2504 = vmatpush.msrb.mxu0 %v5116_v36 }
 0x58c   : > { %5444 = vpow2.f32 %v5108_v30  ;;  %v2441_v28 = vpop.f32.mrf.mxu3  ;;  %v2412_v18 = vpop.f32.mrf.mxu2  ;;  %2534 = vmatpush.msrb.mxu1 %v5122_v37 }
 0x58d   : > { %5446 = vpow2.f32 %v5110_v31  ;;  %v2445_v33 = vrot.slane %v2441_v28, 1  ;;  %v2416_v43 = vrot.slane %v2412_v18, 1  ;;  %2505 = vmatpush.msrb.mxu0 %v5115_v42  ;;  %v2468_v31 = vrot.slane %v6420_v16, 7 }
 0x58e   : > { %2535 = vmatpush.msrb.mxu1 %v5121_v44  ;;  %v5618_v44 = vld [vmem:[%s6118_s4] sm:$0x3]  ;;  %s7066_s4 = sld [smem:[#allocation24_spill]] }
 0x58f   : > { %v2447_v7 = vadd.f32 %v2445_v33, %v6213_v47  ;;  %v5129_v47 = vld [vmem:[%s7059_s27 + $0xd8] sm:$0xff]  ;;  %v2418_v56 = vadd.f32 %v2416_v43, %v6219_v58  ;;  %2506 = vmatpush.msrb.mxu0 %v5114_v49  ;;  %v6503_v58 = vld [vmem:[#allocation3 + $0xd8] sm:$0xff] }
 0x590   : > { %2563 = vmatpush.msrb.mxu2 %v5129_v47  ;;  %2536 = vmatpush.msrb.mxu1 %v5120_v50  ;;  %v5310_v50 = vld [vmem:[%s7062_s26 + $0x4] ss:$0 sm:$0xff] }
 0x591   : > { %v5113_v8 = vmul.f32 -1.442695, %v2447_v7  ;;  %2621 = vmatpush.msra.mxu0 %v6497_v61 }
 0x592   : > { %v5445_v9 = vpop.eup %5444  ;;  %2564 = vmatpush.msrb.mxu2 %v5128_v38  ;;  %2666 = vmatpush.msra.mxu1 %v6499_v62 }
 0x593   : > { %v5447_v10 = vpop.eup %5446  ;;  %v6431_v12 = vadd.f32 1.0, %v5445_v9  ;;  %5448 = vpow2.f32 %v5113_v8  ;;  %2622 = vmatpush.msra.mxu0 %v6510_v3 }
 0x594   : > { %v6433_v13 = vadd.f32 1.0, %v5447_v10  ;;  %2565 = vmatpush.msrb.mxu2 %v5127_v46  ;;  %2667 = vmatpush.msra.mxu1 %v6512_v4  ;;  %v2606_v46 = vrot.slane %v5618_v44, 1 }
 0x595   : > { %5450 = vrcp.f32 %v6431_v12  ;;  %v2340_v2 = vand.u32 2147483648, %v6431_v12  ;;  %v2338_v15 = vand.u32 2147483647, %v6431_v12  ;;  %vm2334_vm14 = vweird.f32 %v6431_v12  ;;  %2623 = vmatpush.msra.mxu0 %v6524_v17 }
 0x596   : > { %5452 = vrcp.f32 %v6433_v13  ;;  %2566 = vmatpush.msrb.mxu2 %v5126_v52  ;;  %v2387_v6 = vand.u32 2147483648, %v6433_v13  ;;  %v2385_v25 = vand.u32 2147483647, %v6433_v13  ;;  %2668 = vmatpush.msra.mxu1 %v6526_v19  ;;  %vm2381_vm1 = vweird.f32 %v6433_v13 }
 0x597   : > { %v2341_v23 = vor.u32 1.1754944e-38, %v2340_v2  ;;  %vm2339_vm5 = vcmp.eq.f32.partialorder %v2338_v15, 8.507059e+37  ;;  %2624 = vmatpush.msra.mxu0 %v6537_v27 }
 0x598   : > { %2711 = vmatpush.msra.mxu2 %v6503_v58  ;;  %v2388_v28 = vor.u32 1.1754944e-38, %v2387_v6  ;;  %2669 = vmatpush.msra.mxu1 %v6543_v35  ;;  %vm2386_vm6 = vcmp.eq.f32.partialorder %v2385_v25, 8.507059e+37 }
 0x599   : > { %v5449_v51 = vpop.eup %5448 }
 0x59a   : > { %v6485_v54 = vadd.f32 1.0, %v5449_v51  ;;  %2712 = vmatpush.msra.mxu2 %v6514_v5  ;;  %v5311_v51 = vld [vmem:[%s7062_s26 + $0x5] ss:$0 sm:$0xff] }
 0x59b   : > { %v6487_v55 = vpop.eup %5450 }
 0x59c   : > { %v6490_v57 = vpop.eup %5452  ;;  %v2330_v59 = vmul.f32 %v6487_v55, %v6431_v12  ;;  %5454 = vrcp.f32 %v6485_v54  ;;  %vm2335_vm8 = vweird.f32 %v6487_v55  ;;  %2713 = vmatpush.msra.mxu2 %v6533_v32  ;;  %v2463_v47 = vand.u32 2147483648, %v6485_v54 }
 0x59d   : > { %v2377_v63 = vmul.f32 %v6490_v57, %v6433_v13  ;;  %5456 = vtanh.f32 %v2418_v56  ;;  %vm2382_vm9 = vweird.f32 %v6490_v57  ;;  %vm2336_vm2 = vmor %vm2334_vm14, %vm2335_vm8  ;;  %v2461_v24 = vand.u32 2147483647, %v6485_v54 }
 0x59e   : > { %v2331_v45 = vsub.f32 1.0, %v2330_v59  ;;  %vm2383_vm4 = vmor %vm2381_vm1, %vm2382_vm9  ;;  %2714 = vmatpush.msra.mxu2 %v6545_v21  ;;  %vm2457_vm9 = vweird.f32 %v6485_v54  ;;  %v2464_v37 = vor.u32 1.1754944e-38, %v2463_v47 }
 0x59f   : > { %v2378_v1 = vsub.f32 1.0, %v2377_v63  ;;  %vm2462_vm1 = vcmp.eq.f32.partialorder %v2461_v24, 8.507059e+37  ;;  %v5313_v63 = vld [vmem:[%s7062_s26 + $0x7] ss:$0 sm:$0xff] }
 0x5a0   : > { %v2332_v14 = vmul.f32 %v6487_v55, %v2331_v45 }
 0x5a1   : > { %v2379_v60 = vmul.f32 %v6490_v57, %v2378_v1 }
 0x5a2   : > { %v5455_v29 = vpop.eup %5454  ;;  %v2333_v34 = vadd.f32 %v6487_v55, %v2332_v14 }
 0x5a3   : > { %v2380_v26 = vadd.f32 %v6490_v57, %v2379_v60  ;;  %v2453_v30 = vmul.f32 %v5455_v29, %v6485_v54  ;;  %v5457_v7 = vpop.eup %5456  ;;  %vm2458_vm8 = vweird.f32 %v5455_v29 }
 0x5a4   : > { %v2337_v33 = vsel %vm2336_vm2, %v6487_v55, %v2333_v34  ;;  %vm2459_vm14 = vmor %vm2457_vm9, %vm2458_vm8  ;;  %vm7038_vm2 = vcmask 261127  }
 0x5a5   : > { %v2342_v8 = vsel %vm2339_vm5, %v2341_v23, %v2337_v33  ;;  %v2384_v9 = vsel %vm2383_vm4, %v6490_v57, %v2380_v26  ;;  %v2454_v10 = vsub.f32 1.0, %v2453_v30  ;;  %v5312_v26 = vld [vmem:[%s7062_s26 + $0x6] ss:$0 sm:$0xff] }
 0x5a6   : > { %v2389_v16 = vsel %vm2386_vm6, %v2388_v28, %v2384_v9  ;;  %v2471_v12 = vmul.f32 %v5457_v7, %v2342_v8 }
 0x5a7   : > { %v2470_v13 = vmul.f32 %v2468_v31, %v2389_v16  ;;  %v2455_v18 = vmul.f32 %v5455_v29, %v2454_v10 }
 0x5a9   : > { %v2472_v39 = vadd.f32 %v2471_v12, %v2470_v13  ;;  %v2456_v40 = vadd.f32 %v5455_v29, %v2455_v18 }
 0x5ab   : > { %5458 = vtanh.f32 %v2472_v39  ;;  %v2460_v36 = vsel %vm2459_vm14, %v5455_v29, %v2456_v40 }
 0x5ac   : > { %v2465_v41 = vsel %vm2462_vm1, %v2464_v37, %v2460_v36 }
 0x5b1   : > { %v5459_v38 = vpop.eup %5458 }
 0x5b2   : > { %v2474_v42 = vmul.f32 %v5459_v38, %v2465_v41  ;;  %v5619_v38 = vld [vmem:[%s6227_s29] sm:$0x3]  ;;  %s893_s29 = scalar_lea.vmem %s7070_s30, %s5035_s3 }
 0x5b3   : > { %v2767_v41 = vrot.slane %v5619_v38, 1 }
 0x5b4   : > { %2476 = vst.msk [vmem:[#allocation2] sm:$0x80] %vm7038_vm2, %v2474_v42 }
 0x5bb   : > { %v2477_v43 = vld [vmem:[#allocation2] sm:$0xff] }
 0x5bc   : > { %5119 = vmatmul.msk.f32.vlgmr.msrb.gmra.mxu0 %vm905_vm0, %v2477_v43  ;;  %5125 = vmatmul.msk.f32.vlgmr.msrb.gmra.mxu1 %vm905_vm0, %v2477_v43 }
 0x5bd   : > { %5131 = vmatmul.msk.f32.vlgmr.msrb.gmra.mxu2 %vm905_vm0, %v2477_v43  ;;  %5137 = vmatmul.msk.f32.vlgmr.msrb.gmra.mxu3 %vm905_vm0, %v2477_v43 }
 0x5be   : > { %2794 = vmatpush.msrb.mxu0 %v6497_v61  ;;  %2841 = vmatpush.msrb.mxu1 %v6499_v62 }
 0x5bf   : > { %2888 = vmatpush.msrb.mxu2 %v6503_v58  ;;  %2917 = vmatpush.msrb.mxu3 %v6505_v0 }
 0x5c0   : > { %2795 = vmatpush.msrb.mxu0 %v6510_v3  ;;  %2842 = vmatpush.msrb.mxu1 %v6512_v4 }
 0x5c1   : > { %2889 = vmatpush.msrb.mxu2 %v6514_v5  ;;  %2918 = vmatpush.msrb.mxu3 %v6522_v20 }
 0x5c2   : > { %2796 = vmatpush.msrb.mxu0 %v6524_v17  ;;  %2843 = vmatpush.msrb.mxu1 %v6526_v19 }
 0x5c3   : > { %2890 = vmatpush.msrb.mxu2 %v6533_v32  ;;  %2919 = vmatpush.msrb.mxu3 %v6535_v11 }
 0x5c4   : > { %5138 = vmatmul.msk.f32.vlgmr.msra.gmra.mxu0 %vm905_vm0, %v2606_v46  ;;  %5140 = vmatmul.msk.f32.vlgmr.msra.gmra.mxu1 %vm905_vm0, %v2606_v46 }
 0x5c5   : > { %5142 = vmatmul.msk.f32.vlgmr.msra.gmra.mxu2 %vm905_vm0, %v2606_v46  ;;  %5143 = vmatmul.msk.f32.vlgmr.msra.gmra.mxu3 %vm905_vm0, %v2606_v46 }
 0x5c6   : > { %2797 = vmatpush.msrb.mxu0 %v6537_v27  ;;  %2844 = vmatpush.msrb.mxu1 %v6543_v35 }
 0x5c7   : > { %2891 = vmatpush.msrb.mxu2 %v6545_v21  ;;  %2920 = vmatpush.msrb.mxu3 %v6547_v22 }
 0x5c8   : > { %2977 = vmatpush.msra.mxu0 %v6497_v61  ;;  %3024 = vmatpush.msra.mxu1 %v6499_v62 }
 0x5c9   : > { %3071 = vmatpush.msra.mxu2 %v6503_v58  ;;  %3100 = vmatpush.msra.mxu3 %v6505_v0 }
 0x5ca   : > { %2978 = vmatpush.msra.mxu0 %v6510_v3  ;;  %3025 = vmatpush.msra.mxu1 %v6512_v4 }
 0x5cb   : > { %3072 = vmatpush.msra.mxu2 %v6514_v5  ;;  %3101 = vmatpush.msra.mxu3 %v6522_v20 }
 0x5cc   : > { %2979 = vmatpush.msra.mxu0 %v6524_v17  ;;  %3026 = vmatpush.msra.mxu1 %v6526_v19 }
 0x5cd   : > { %3073 = vmatpush.msra.mxu2 %v6533_v32  ;;  %3102 = vmatpush.msra.mxu3 %v6535_v11 }
 0x5ce   : > { %2980 = vmatpush.msra.mxu0 %v6537_v27  ;;  %3027 = vmatpush.msra.mxu1 %v6543_v35 }
 0x5cf   : > { %3074 = vmatpush.msra.mxu2 %v6545_v21  ;;  %3103 = vmatpush.msra.mxu3 %v6547_v22 }
 0x639   : > { %v2508_v48 = vpop.f32.mrf.mxu0  ;;  %v2538_v49 = vpop.f32.mrf.mxu1 }
 0x63a   : > { %v6616_v52 = vadd.f32 %v5310_v50, %v2508_v48  ;;  %v6618_v53 = vadd.f32 %v5311_v51, %v2538_v49 }
 0x640   : > { %v2598_v54 = vpop.f32.mrf.mxu3  ;;  %v2568_v6 = vpop.f32.mrf.mxu2 }
 0x641   : > { %v2626_v55 = vpop.f32.mrf.mxu0  ;;  %v2671_v56 = vpop.f32.mrf.mxu1  ;;  %v6625_v2 = vadd.f32 %v5313_v63, %v2598_v54  ;;  %v6631_v28 = vadd.f32 %v5312_v26, %v2568_v6 }
 0x642   : > { %v2629_v57 = vadd.f32 %v2626_v55, %v6616_v52  ;;  %v2674_v59 = vadd.f32 %v2671_v56, %v6618_v53 }
 0x644   : > { %v5139_v45 = vmul.f32 -1.442695, %v2629_v57  ;;  %v5141_v1 = vmul.f32 -1.442695, %v2674_v59 }
 0x646   : > { %5460 = vpow2.f32 %v5139_v45 }
 0x647   : > { %5462 = vpow2.f32 %v5141_v1 }
 0x648   : > { %v2743_v14 = vpop.f32.mrf.mxu3  ;;  %v2716_v30 = vpop.f32.mrf.mxu2 }
 0x649   : > { %v2746_v15 = vadd.f32 %v2743_v14, %v6625_v2  ;;  %v2719_v8 = vadd.f32 %v2716_v30, %v6631_v28 }
 0x64b   : > { %v5144_v60 = vmul.f32 -1.442695, %v2746_v15 }
 0x64c   : > { %v5461_v25 = vpop.eup %5460 }
 0x64d   : > { %v5463_v29 = vpop.eup %5462  ;;  %v2633_v34 = vadd.f32 1.0, %v5461_v25  ;;  %5464 = vpow2.f32 %v5144_v60 }
 0x64e   : > { %v2678_v23 = vadd.f32 1.0, %v5463_v29 }
 0x64f   : > { %5466 = vrcp.f32 %v2633_v34  ;;  %v2645_v18 = vand.u32 2147483648, %v2633_v34  ;;  %v2643_v47 = vand.u32 2147483647, %v2633_v34  ;;  %vm2639_vm6 = vweird.f32 %v2633_v34 }
 0x650   : > { %5468 = vrcp.f32 %v2678_v23  ;;  %v2690_v39 = vand.u32 2147483648, %v2678_v23  ;;  %v2688_v36 = vand.u32 2147483647, %v2678_v23  ;;  %vm2684_vm8 = vweird.f32 %v2678_v23 }
 0x651   : > { %v2646_v43 = vor.u32 1.1754944e-38, %v2645_v18  ;;  %vm2644_vm1 = vcmp.eq.f32.partialorder %v2643_v47, 8.507059e+37 }
 0x652   : > { %v2691_v48 = vor.u32 1.1754944e-38, %v2690_v39  ;;  %vm2689_vm2 = vcmp.eq.f32.partialorder %v2688_v36, 8.507059e+37 }
 0x653   : > { %v5465_v31 = vpop.eup %5464 }
 0x654   : > { %v2750_v33 = vadd.f32 1.0, %v5465_v31 }
 0x655   : > { %v5467_v7 = vpop.eup %5466 }
 0x656   : > { %v5469_v9 = vpop.eup %5468  ;;  %v2635_v10 = vmul.f32 %v5467_v7, %v2633_v34  ;;  %5470 = vrcp.f32 %v2750_v33  ;;  %vm2640_vm4 = vweird.f32 %v5467_v7  ;;  %v2762_v6 = vand.u32 2147483648, %v2750_v33 }
 0x657   : > { %v2680_v16 = vmul.f32 %v5469_v9, %v2678_v23  ;;  %5472 = vtanh.f32 %v2719_v8  ;;  %vm2685_vm5 = vweird.f32 %v5469_v9  ;;  %vm2641_vm9 = vmor %vm2639_vm6, %vm2640_vm4  ;;  %vm2756_vm4 = vweird.f32 %v2750_v33 }
 0x658   : > { %v2636_v12 = vsub.f32 1.0, %v2635_v10  ;;  %vm2686_vm14 = vmor %vm2684_vm8, %vm2685_vm5  ;;  %v2760_v14 = vand.u32 2147483647, %v2750_v33  ;;  %v2763_v60 = vor.u32 1.1754944e-38, %v2762_v6 }
 0x659   : > { %v2681_v13 = vsub.f32 1.0, %v2680_v16 }
 0x65a   : > { %v2637_v40 = vmul.f32 %v5467_v7, %v2636_v12  ;;  %vm2761_vm6 = vcmp.eq.f32.partialorder %v2760_v14, 8.507059e+37 }
 0x65b   : > { %v2682_v24 = vmul.f32 %v5469_v9, %v2681_v13 }
 0x65c   : > { %v5471_v37 = vpop.eup %5470  ;;  %v2638_v42 = vadd.f32 %v5467_v7, %v2637_v40 }
 0x65d   : > { %v2683_v44 = vadd.f32 %v5469_v9, %v2682_v24  ;;  %v2752_v46 = vmul.f32 %v5471_v37, %v2750_v33  ;;  %v5473_v50 = vpop.eup %5472  ;;  %vm2757_vm7 = vweird.f32 %v5471_v37 }
 0x65e   : > { %v2642_v49 = vsel %vm2641_vm9, %v5467_v7, %v2638_v42  ;;  %vm2758_vm5 = vmor %vm2756_vm4, %vm2757_vm7 }
 0x65f   : > { %v2647_v51 = vsel %vm2644_vm1, %v2646_v43, %v2642_v49  ;;  %v2687_v54 = vsel %vm2686_vm14, %v5469_v9, %v2683_v44  ;;  %v2753_v55 = vsub.f32 1.0, %v2752_v46 }
 0x660   : > { %v2692_v56 = vsel %vm2689_vm2, %v2691_v48, %v2687_v54  ;;  %v2770_v57 = vmul.f32 %v5473_v50, %v2647_v51 }
 0x661   : > { %v2769_v59 = vmul.f32 %v2767_v41, %v2692_v56  ;;  %v2754_v63 = vmul.f32 %v5471_v37, %v2753_v55 }
 0x663   : > { %v6635_v45 = vadd.f32 %v2770_v57, %v2769_v59  ;;  %v2755_v1 = vadd.f32 %v5471_v37, %v2754_v63 }
 0x665   : > { %5474 = vtanh.f32 %v6635_v45  ;;  %v2759_v15 = vsel %vm2758_vm5, %v5471_v37, %v2755_v1 }
 0x666   : > { %v2764_v29 = vsel %vm2761_vm6, %v2763_v60, %v2759_v15  ;;  %v2949_v15 = vrot.slane %v6635_v45, 7 }
 0x66b   : > { %v5475_v25 = vpop.eup %5474 }
 0x66c   : > { %v2773_v34 = vmul.f32 %v5475_v25, %v2764_v29 }
 0x66e   : > { %2774 = vst.msk [vmem:[#allocation2] sm:$0x1] %vm1188_vm13, %v2773_v34  ;;  %5145 = vmatmul.msk.f32.vlgmr.msrb.gmra.mxu0 %vm905_vm0, %v2773_v34  ;;  %5147 = vmatmul.msk.f32.vlgmr.msrb.gmra.mxu1 %vm905_vm0, %v2773_v34 }
 0x66f   : > { %5149 = vmatmul.msk.f32.vlgmr.msrb.gmra.mxu2 %vm905_vm0, %v2773_v34  ;;  %5150 = vmatmul.msk.f32.vlgmr.msrb.gmra.mxu3 %vm905_vm0, %v2773_v34 }
 0x670   : > { %3160 = vmatpush.msrb.mxu0 %v6497_v61  ;;  %3207 = vmatpush.msrb.mxu1 %v6499_v62 }
 0x671   : > { %3254 = vmatpush.msrb.mxu2 %v6503_v58  ;;  %3283 = vmatpush.msrb.mxu3 %v6505_v0 }
 0x672   : > { %3161 = vmatpush.msrb.mxu0 %v6510_v3  ;;  %3208 = vmatpush.msrb.mxu1 %v6512_v4 }
 0x673   : > { %3255 = vmatpush.msrb.mxu2 %v6514_v5  ;;  %3284 = vmatpush.msrb.mxu3 %v6522_v20 }
 0x674   : > { %3162 = vmatpush.msrb.mxu0 %v6524_v17  ;;  %3209 = vmatpush.msrb.mxu1 %v6526_v19 }
 0x675   : > { %3256 = vmatpush.msrb.mxu2 %v6533_v32  ;;  %3285 = vmatpush.msrb.mxu3 %v6535_v11 }
 0x676   : > { %3163 = vmatpush.msrb.mxu0 %v6537_v27  ;;  %3210 = vmatpush.msrb.mxu1 %v6543_v35 }
 0x677   : > { %3257 = vmatpush.msrb.mxu2 %v6545_v21  ;;  %3286 = vmatpush.msrb.mxu3 %v6547_v22 }
 0x6eb   : > { %v2799_v23 = vpop.f32.mrf.mxu0  ;;  %v2846_v26 = vpop.f32.mrf.mxu1 }
 0x6ec   : > { %v2803_v30 = vrot.slane %v2799_v23, 7  ;;  %v2850_v31 = vrot.slane %v2846_v26, 7 }
 0x6ee   : > { %v2805_v33 = vadd.f32 %v2803_v30, %v6616_v52  ;;  %v2852_v7 = vadd.f32 %v2850_v31, %v6618_v53 }
 0x6f0   : > { %v5146_v8 = vmul.f32 -1.442695, %v2805_v33  ;;  %v5148_v9 = vmul.f32 -1.442695, %v2852_v7 }
 0x6f2   : > { %5476 = vpow2.f32 %v5146_v8  ;;  %v2922_v10 = vpop.f32.mrf.mxu3  ;;  %v2893_v24 = vpop.f32.mrf.mxu2 }
 0x6f3   : > { %5478 = vpow2.f32 %v5148_v9  ;;  %v2926_v16 = vrot.slane %v2922_v10, 7  ;;  %v2897_v36 = vrot.slane %v2893_v24, 7 }
 0x6f5   : > { %v2928_v12 = vadd.f32 %v2926_v16, %v6625_v2  ;;  %v2899_v42 = vadd.f32 %v2897_v36, %v6631_v28 }
 0x6f7   : > { %v5151_v13 = vmul.f32 -1.442695, %v2928_v12 }
 0x6f8   : > { %v5477_v18 = vpop.eup %5476 }
 0x6f9   : > { %v5479_v39 = vpop.eup %5478  ;;  %v2809_v40 = vadd.f32 1.0, %v5477_v18  ;;  %5480 = vpow2.f32 %v5151_v13 }
 0x6fa   : > { %v2856_v47 = vadd.f32 1.0, %v5479_v39 }
 0x6fb   : > { %5482 = vrcp.f32 %v2809_v40  ;;  %v2821_v50 = vand.u32 2147483648, %v2809_v40  ;;  %v2819_v55 = vand.u32 2147483647, %v2809_v40  ;;  %vm2815_vm2 = vweird.f32 %v2809_v40 }
 0x6fc   : > { %5484 = vrcp.f32 %v2856_v47  ;;  %v2868_v51 = vand.u32 2147483648, %v2856_v47  ;;  %v2866_v57 = vand.u32 2147483647, %v2856_v47  ;;  %vm2862_vm8 = vweird.f32 %v2856_v47 }
 0x6fd   : > { %v2822_v1 = vor.u32 1.1754944e-38, %v2821_v50  ;;  %vm2820_vm1 = vcmp.eq.f32.partialorder %v2819_v55, 8.507059e+37 }
 0x6fe   : > { %v2869_v60 = vor.u32 1.1754944e-38, %v2868_v51  ;;  %vm2867_vm4 = vcmp.eq.f32.partialorder %v2866_v57, 8.507059e+37 }
 0x6ff   : > { %v5481_v37 = vpop.eup %5480 }
 0x700   : > { %v2932_v38 = vadd.f32 1.0, %v5481_v37 }
 0x701   : > { %v5483_v41 = vpop.eup %5482 }
 0x702   : > { %v5485_v43 = vpop.eup %5484  ;;  %v2811_v44 = vmul.f32 %v5483_v41, %v2809_v40  ;;  %5486 = vrcp.f32 %v2932_v38  ;;  %vm2816_vm13 = vweird.f32 %v5483_v41  ;;  %v2944_v45 = vand.u32 2147483648, %v2932_v38 }
 0x703   : > { %v2858_v46 = vmul.f32 %v5485_v43, %v2856_v47  ;;  %5488 = vtanh.f32 %v2899_v42  ;;  %vm2863_vm7 = vweird.f32 %v5485_v43  ;;  %vm2817_vm9 = vmor %vm2815_vm2, %vm2816_vm13  ;;  %vm2938_vm6 = vweird.f32 %v2932_v38 }
 0x704   : > { %v2812_v48 = vsub.f32 1.0, %v2811_v44  ;;  %vm2864_vm14 = vmor %vm2862_vm8, %vm2863_vm7  ;;  %v2942_v10 = vand.u32 2147483647, %v2932_v38  ;;  %v2945_v12 = vor.u32 1.1754944e-38, %v2944_v45 }
 0x705   : > { %v2859_v49 = vsub.f32 1.0, %v2858_v46 }
 0x706   : > { %v2813_v54 = vmul.f32 %v5483_v41, %v2812_v48  ;;  %vm2943_vm7 = vcmp.eq.f32.partialorder %v2942_v10, 8.507059e+37 }
 0x707   : > { %v2860_v56 = vmul.f32 %v5485_v43, %v2859_v49 }
 0x708   : > { %v5487_v59 = vpop.eup %5486  ;;  %v2814_v63 = vadd.f32 %v5483_v41, %v2813_v54 }
 0x709   : > { %v2861_v6 = vadd.f32 %v5485_v43, %v2860_v56  ;;  %v2934_v14 = vmul.f32 %v5487_v59, %v2932_v38  ;;  %v5489_v29 = vpop.eup %5488  ;;  %vm2939_vm5 = vweird.f32 %v5487_v59 }
 0x70a   : > { %v2818_v25 = vsel %vm2817_vm9, %v5483_v41, %v2814_v63  ;;  %vm2940_vm13 = vmor %vm2938_vm6, %vm2939_vm5 }
 0x70b   : > { %v2823_v34 = vsel %vm2820_vm1, %v2822_v1, %v2818_v25  ;;  %v2865_v23 = vsel %vm2864_vm14, %v5485_v43, %v2861_v6  ;;  %v2935_v26 = vsub.f32 1.0, %v2934_v14 }
 0x70c   : > { %v2870_v30 = vsel %vm2867_vm4, %v2869_v60, %v2865_v23  ;;  %v2952_v31 = vmul.f32 %v5489_v29, %v2823_v34 }
 0x70d   : > { %v2951_v33 = vmul.f32 %v2949_v15, %v2870_v30  ;;  %v2936_v7 = vmul.f32 %v5487_v59, %v2935_v26 }
 0x70f   : > { %v6664_v8 = vadd.f32 %v2952_v31, %v2951_v33  ;;  %v2937_v9 = vadd.f32 %v5487_v59, %v2936_v7 }
 0x711   : > { %5490 = vtanh.f32 %v6664_v8  ;;  %v2941_v16 = vsel %vm2940_vm13, %v5487_v59, %v2937_v9  ;;  %v3132_v14 = vrot.slane %v6664_v8, 7 }
 0x712   : > { %v2946_v18 = vsel %vm2943_vm7, %v2945_v12, %v2941_v16 }
 0x717   : > { %v5491_v13 = vpop.eup %5490 }
 0x718   : > { %v2955_v39 = vmul.f32 %v5491_v13, %v2946_v18 }
 0x71a   : > { %2956 = vst.msk [vmem:[#allocation2] sm:$0x2] %vm1371_vm11, %v2955_v39  ;;  %v2962_v40 = vrot.slane %v2955_v39, 1 }
 0x71c   : > { %5152 = vmatmul.msk.f32.vlgmr.msra.gmra.mxu0 %vm905_vm0, %v2962_v40  ;;  %5154 = vmatmul.msk.f32.vlgmr.msra.gmra.mxu1 %vm905_vm0, %v2962_v40 }
 0x71d   : > { %5156 = vmatmul.msk.f32.vlgmr.msra.gmra.mxu2 %vm905_vm0, %v2962_v40  ;;  %5157 = vmatmul.msk.f32.vlgmr.msra.gmra.mxu3 %vm905_vm0, %v2962_v40 }
 0x71e   : > { %3343 = vmatpush.msra.mxu0 %v6497_v61  ;;  %3390 = vmatpush.msra.mxu1 %v6499_v62 }
 0x71f   : > { %3437 = vmatpush.msra.mxu2 %v6503_v58  ;;  %3466 = vmatpush.msra.mxu3 %v6505_v0 }
 0x720   : > { %3344 = vmatpush.msra.mxu0 %v6510_v3  ;;  %3391 = vmatpush.msra.mxu1 %v6512_v4 }
 0x721   : > { %3438 = vmatpush.msra.mxu2 %v6514_v5  ;;  %3467 = vmatpush.msra.mxu3 %v6522_v20 }
 0x722   : > { %3345 = vmatpush.msra.mxu0 %v6524_v17  ;;  %3392 = vmatpush.msra.mxu1 %v6526_v19 }
 0x723   : > { %3439 = vmatpush.msra.mxu2 %v6533_v32  ;;  %3468 = vmatpush.msra.mxu3 %v6535_v11 }
 0x724   : > { %3346 = vmatpush.msra.mxu0 %v6537_v27  ;;  %3393 = vmatpush.msra.mxu1 %v6543_v35 }
 0x725   : > { %3440 = vmatpush.msra.mxu2 %v6545_v21  ;;  %3469 = vmatpush.msra.mxu3 %v6547_v22 }
 0x799   : > { %v2982_v61 = vpop.f32.mrf.mxu0  ;;  %v3029_v62 = vpop.f32.mrf.mxu1 }
 0x79a   : > { %v2986_v58 = vrot.slane %v2982_v61, 6  ;;  %v3033_v0 = vrot.slane %v3029_v62, 6 }
 0x79c   : > { %v2988_v3 = vadd.f32 %v2986_v58, %v6616_v52  ;;  %v3035_v4 = vadd.f32 %v3033_v0, %v6618_v53 }
 0x79e   : > { %v5153_v5 = vmul.f32 -1.442695, %v2988_v3  ;;  %v5155_v20 = vmul.f32 -1.442695, %v3035_v4 }
 0x7a0   : > { %5492 = vpow2.f32 %v5153_v5  ;;  %v3105_v17 = vpop.f32.mrf.mxu3  ;;  %v3076_v47 = vpop.f32.mrf.mxu2 }
 0x7a1   : > { %5494 = vpow2.f32 %v5155_v20  ;;  %v3109_v19 = vrot.slane %v3105_v17, 6  ;;  %v3080_v24 = vrot.slane %v3076_v47, 6 }
 0x7a3   : > { %v3111_v32 = vadd.f32 %v3109_v19, %v6625_v2  ;;  %v3082_v41 = vadd.f32 %v3080_v24, %v6631_v28 }
 0x7a5   : > { %v5158_v11 = vmul.f32 -1.442695, %v3111_v32 }
 0x7a6   : > { %v5493_v27 = vpop.eup %5492 }
 0x7a7   : > { %v5495_v35 = vpop.eup %5494  ;;  %v2992_v21 = vadd.f32 1.0, %v5493_v27  ;;  %5496 = vpow2.f32 %v5158_v11 }
 0x7a8   : > { %v3039_v22 = vadd.f32 1.0, %v5495_v35 }
 0x7a9   : > { %5498 = vrcp.f32 %v2992_v21  ;;  %v3004_v49 = vand.u32 2147483648, %v2992_v21  ;;  %v3002_v54 = vand.u32 2147483647, %v2992_v21  ;;  %vm2998_vm8 = vweird.f32 %v2992_v21 }
 0x7aa   : > { %5500 = vrcp.f32 %v3039_v22  ;;  %v3051_v50 = vand.u32 2147483648, %v3039_v22  ;;  %v3049_v56 = vand.u32 2147483647, %v3039_v22  ;;  %vm3045_vm9 = vweird.f32 %v3039_v22 }
 0x7ab   : > { %v3005_v63 = vor.u32 1.1754944e-38, %v3004_v49  ;;  %vm3003_vm4 = vcmp.eq.f32.partialorder %v3002_v54, 8.507059e+37 }
 0x7ac   : > { %v3052_v15 = vor.u32 1.1754944e-38, %v3051_v50  ;;  %vm3050_vm5 = vcmp.eq.f32.partialorder %v3049_v56, 8.507059e+37 }
 0x7ad   : > { %v5497_v36 = vpop.eup %5496 }
 0x7ae   : > { %v3115_v37 = vadd.f32 1.0, %v5497_v36 }
 0x7af   : > { %v5499_v38 = vpop.eup %5498 }
 0x7b0   : > { %v5501_v42 = vpop.eup %5500  ;;  %v2994_v43 = vmul.f32 %v5499_v38, %v2992_v21  ;;  %5502 = vrcp.f32 %v3115_v37  ;;  %vm2999_vm11 = vweird.f32 %v5499_v38  ;;  %v3127_v8 = vand.u32 2147483648, %v3115_v37 }
 0x7b1   : > { %v3041_v44 = vmul.f32 %v5501_v42, %v3039_v22  ;;  %5504 = vtanh.f32 %v3082_v41  ;;  %vm3046_vm2 = vweird.f32 %v5501_v42  ;;  %vm3000_vm14 = vmor %vm2998_vm8, %vm2999_vm11  ;;  %vm3121_vm13 = vweird.f32 %v3115_v37 }
 0x7b2   : > { %v2995_v46 = vsub.f32 1.0, %v2994_v43  ;;  %vm3047_vm1 = vmor %vm3045_vm9, %vm3046_vm2  ;;  %v3125_v45 = vand.u32 2147483647, %v3115_v37  ;;  %v3128_v16 = vor.u32 1.1754944e-38, %v3127_v8 }
 0x7b3   : > { %v3042_v48 = vsub.f32 1.0, %v3041_v44 }
 0x7b4   : > { %v2996_v51 = vmul.f32 %v5499_v38, %v2995_v46  ;;  %vm3126_vm11 = vcmp.eq.f32.partialorder %v3125_v45, 8.507059e+37 }
 0x7b5   : > { %v3043_v55 = vmul.f32 %v5501_v42, %v3042_v48 }
 0x7b6   : > { %v5503_v57 = vpop.eup %5502  ;;  %v2997_v59 = vadd.f32 %v5499_v38, %v2996_v51 }
 0x7b7   : > { %v3044_v1 = vadd.f32 %v5501_v42, %v3043_v55  ;;  %v3117_v6 = vmul.f32 %v5503_v57, %v3115_v37  ;;  %v5505_v25 = vpop.eup %5504  ;;  %vm3122_vm6 = vweird.f32 %v5503_v57 }
 0x7b8   : > { %v3001_v60 = vsel %vm3000_vm14, %v5499_v38, %v2997_v59  ;;  %vm3123_vm7 = vmor %vm3121_vm13, %vm3122_vm6 }
 0x7b9   : > { %v3006_v29 = vsel %vm3003_vm4, %v3005_v63, %v3001_v60  ;;  %v3048_v34 = vsel %vm3047_vm1, %v5501_v42, %v3044_v1  ;;  %v3118_v23 = vsub.f32 1.0, %v3117_v6 }
 0x7ba   : > { %v3053_v26 = vsel %vm3050_vm5, %v3052_v15, %v3048_v34  ;;  %v3135_v30 = vmul.f32 %v5505_v25, %v3006_v29 }
 0x7bb   : > { %v3134_v31 = vmul.f32 %v3132_v14, %v3053_v26  ;;  %v3119_v33 = vmul.f32 %v5503_v57, %v3118_v23 }
 0x7bd   : > { %v6693_v7 = vadd.f32 %v3135_v30, %v3134_v31  ;;  %v3120_v9 = vadd.f32 %v5503_v57, %v3119_v33 }
 0x7bf   : > { %5506 = vtanh.f32 %v6693_v7  ;;  %v3124_v10 = vsel %vm3123_vm7, %v5503_v57, %v3120_v9  ;;  %v3315_v6 = vrot.slane %v6693_v7, 7 }
 0x7c0   : > { %v3129_v13 = vsel %vm3126_vm11, %v3128_v16, %v3124_v10 }
 0x7c5   : > { %v5507_v12 = vpop.eup %5506 }
 0x7c6   : > { %v3138_v18 = vmul.f32 %v5507_v12, %v3129_v13 }
 0x7c8   : > { %3139 = vst.msk [vmem:[#allocation2] sm:$0x4] %vm1555_vm10, %v3138_v18  ;;  %v3145_v39 = vrot.slane %v3138_v18, 2 }
 0x7ca   : > { %5159 = vmatmul.msk.f32.vlgmr.msrb.gmra.mxu0 %vm905_vm0, %v3145_v39  ;;  %5161 = vmatmul.msk.f32.vlgmr.msrb.gmra.mxu1 %vm905_vm0, %v3145_v39 }
 0x7cb   : > { %5163 = vmatmul.msk.f32.vlgmr.msrb.gmra.mxu2 %vm905_vm0, %v3145_v39  ;;  %5164 = vmatmul.msk.f32.vlgmr.msrb.gmra.mxu3 %vm905_vm0, %v3145_v39 }
 0x847   : > { %v3165_v40 = vpop.f32.mrf.mxu0  ;;  %v3212_v61 = vpop.f32.mrf.mxu1 }
 0x848   : > { %v3169_v62 = vrot.slane %v3165_v40, 5  ;;  %v3216_v58 = vrot.slane %v3212_v61, 5 }
 0x84a   : > { %v3171_v0 = vadd.f32 %v3169_v62, %v6616_v52  ;;  %v3218_v3 = vadd.f32 %v3216_v58, %v6618_v53 }
 0x84c   : > { %v5160_v4 = vmul.f32 -1.442695, %v3171_v0  ;;  %v5162_v5 = vmul.f32 -1.442695, %v3218_v3 }
 0x84e   : > { %5508 = vpow2.f32 %v5160_v4  ;;  %v3288_v20 = vpop.f32.mrf.mxu3  ;;  %v3259_v22 = vpop.f32.mrf.mxu2 }
 0x84f   : > { %5510 = vpow2.f32 %v5162_v5  ;;  %v3292_v17 = vrot.slane %v3288_v20, 5  ;;  %v3263_v47 = vrot.slane %v3259_v22, 5  ;;  %v6716_v5 = vld [vmem:[#allocation3 + $0x98] sm:$0xff]  ;;  %v6734_v22 = vld [vmem:[#allocation3 + $0xf0] sm:$0xff] }
 0x850   : > { %v6718_v20 = vld [vmem:[#allocation3 + $0xb8] sm:$0xff]  ;;  %3526 = vmatpush.msrb.mxu0 %v6716_v5 }
 0x851   : > { %v3294_v19 = vadd.f32 %v3292_v17, %v6625_v2  ;;  %v3265_v38 = vadd.f32 %v3263_v47, %v6631_v28  ;;  %v6720_v17 = vld [vmem:[#allocation3 + $0xd8] sm:$0xff]  ;;  %3573 = vmatpush.msrb.mxu1 %v6718_v20  ;;  %v6736_v47 = vld [vmem:[#allocation3 + $0x88] sm:$0xff] }
 0x852   : > { %3620 = vmatpush.msrb.mxu2 %v6720_v17 }
 0x853   : > { %v5165_v32 = vmul.f32 -1.442695, %v3294_v19 }
 0x854   : > { %v5509_v11 = vpop.eup %5508 }
 0x855   : > { %v5511_v27 = vpop.eup %5510  ;;  %v3175_v35 = vadd.f32 1.0, %v5509_v11  ;;  %5512 = vpow2.f32 %v5165_v32  ;;  %v6724_v32 = vld [vmem:[#allocation3 + $0xf8] sm:$0xff]  ;;  %v6726_v11 = vld [vmem:[#allocation3 + $0x90] sm:$0xff] }
 0x856   : > { %v3222_v21 = vadd.f32 1.0, %v5511_v27  ;;  %v6728_v27 = vld [vmem:[#allocation3 + $0xb0] sm:$0xff]  ;;  %3649 = vmatpush.msrb.mxu3 %v6724_v32  ;;  %3527 = vmatpush.msrb.mxu0 %v6726_v11 }
 0x857   : > { %5514 = vrcp.f32 %v3175_v35  ;;  %v3187_v48 = vand.u32 2147483648, %v3175_v35  ;;  %v3185_v51 = vand.u32 2147483647, %v3175_v35  ;;  %vm3181_vm8 = vweird.f32 %v3175_v35  ;;  %3574 = vmatpush.msrb.mxu1 %v6728_v27 }
 0x858   : > { %5516 = vrcp.f32 %v3222_v21  ;;  %v3234_v49 = vand.u32 2147483648, %v3222_v21  ;;  %v3232_v55 = vand.u32 2147483647, %v3222_v21  ;;  %vm3228_vm9 = vweird.f32 %v3222_v21  ;;  %3650 = vmatpush.msrb.mxu3 %v6734_v22  ;;  %3528 = vmatpush.msrb.mxu0 %v6736_v47 }
 0x859   : > { %v3188_v59 = vor.u32 1.1754944e-38, %v3187_v48  ;;  %vm3186_vm4 = vcmp.eq.f32.partialorder %v3185_v51, 8.507059e+37 }
 0x85a   : > { %v3235_v14 = vor.u32 1.1754944e-38, %v3234_v49  ;;  %vm3233_vm5 = vcmp.eq.f32.partialorder %v3232_v55, 8.507059e+37 }
 0x85b   : > { %v5513_v24 = vpop.eup %5512 }
 0x85c   : > { %v3298_v36 = vadd.f32 1.0, %v5513_v24  ;;  %v6740_v24 = vld [vmem:[#allocation3 + $0xa8] sm:$0xff] }
 0x85d   : > { %v5515_v37 = vpop.eup %5514  ;;  %3575 = vmatpush.msrb.mxu1 %v6740_v24 }
 0x85e   : > { %v5517_v41 = vpop.eup %5516  ;;  %v3177_v42 = vmul.f32 %v5515_v37, %v3175_v35  ;;  %5518 = vrcp.f32 %v3298_v36  ;;  %vm3182_vm10 = vweird.f32 %v5515_v37  ;;  %v3310_v7 = vand.u32 2147483648, %v3298_v36 }
 0x85f   : > { %v3224_v43 = vmul.f32 %v5517_v41, %v3222_v21  ;;  %5520 = vtanh.f32 %v3265_v38  ;;  %vm3229_vm2 = vweird.f32 %v5517_v41  ;;  %vm3183_vm14 = vmor %vm3181_vm8, %vm3182_vm10  ;;  %vm3304_vm13 = vweird.f32 %v3298_v36  ;;  %v6732_v21 = vld [vmem:[#allocation3 + $0xd0] sm:$0xff] }
 0x860   : > { %v3178_v44 = vsub.f32 1.0, %v3177_v42  ;;  %vm3230_vm1 = vmor %vm3228_vm9, %vm3229_vm2  ;;  %v3308_v8 = vand.u32 2147483647, %v3298_v36  ;;  %v3311_v10 = vor.u32 1.1754944e-38, %v3310_v7  ;;  %3621 = vmatpush.msrb.mxu2 %v6732_v21  ;;  %v6751_v42 = vld [vmem:[#allocation3 + $0xa0] sm:$0xff] }
 0x861   : > { %v3225_v46 = vsub.f32 1.0, %v3224_v43  ;;  %v6755_v43 = vld [vmem:[#allocation3 + $0xc0] sm:$0xff]  ;;  %3576 = vmatpush.msrb.mxu1 %v6751_v42 }
 0x862   : > { %v3179_v50 = vmul.f32 %v5515_v37, %v3178_v44  ;;  %vm3309_vm11 = vcmp.eq.f32.partialorder %v3308_v8, 8.507059e+37  ;;  %v6757_v44 = vld [vmem:[#allocation3 + $0xe0] sm:$0xff] }
 0x863   : > { %v3226_v54 = vmul.f32 %v5517_v41, %v3225_v46 }
 0x864   : > { %v5519_v56 = vpop.eup %5518  ;;  %v3180_v57 = vadd.f32 %v5515_v37, %v3179_v50 }
 0x865   : > { %v3227_v63 = vadd.f32 %v5517_v41, %v3226_v54  ;;  %v3300_v1 = vmul.f32 %v5519_v56, %v3298_v36  ;;  %v5521_v60 = vpop.eup %5520  ;;  %vm3305_vm6 = vweird.f32 %v5519_v56  ;;  %v6742_v36 = vld [vmem:[#allocation3 + $0xc8] sm:$0xff] }
 0x866   : > { %v3184_v15 = vsel %vm3183_vm14, %v5515_v37, %v3180_v57  ;;  %vm3306_vm7 = vmor %vm3304_vm13, %vm3305_vm6  ;;  %v6744_v37 = vld [vmem:[#allocation3 + $0xe8] sm:$0xff]  ;;  %3622 = vmatpush.msrb.mxu2 %v6742_v36 }
 0x867   : > { %v3189_v25 = vsel %vm3186_vm4, %v3188_v59, %v3184_v15  ;;  %v3231_v29 = vsel %vm3230_vm1, %v5517_v41, %v3227_v63  ;;  %v3301_v34 = vsub.f32 1.0, %v3300_v1  ;;  %v6749_v41 = vld [vmem:[#allocation3 + $0x80] sm:$0xff]  ;;  %3651 = vmatpush.msrb.mxu3 %v6744_v37 }
 0x868   : > { %v3236_v23 = vsel %vm3233_vm5, %v3235_v14, %v3231_v29  ;;  %v3318_v26 = vmul.f32 %v5521_v60, %v3189_v25  ;;  %3529 = vmatpush.msrb.mxu0 %v6749_v41  ;;  %3623 = vmatpush.msrb.mxu2 %v6755_v43 }
 0x869   : > { %v3317_v30 = vmul.f32 %v3315_v6, %v3236_v23  ;;  %v3302_v31 = vmul.f32 %v5519_v56, %v3301_v34  ;;  %3652 = vmatpush.msrb.mxu3 %v6757_v44 }
 0x86b   : > { %v6706_v33 = vadd.f32 %v3318_v26, %v3317_v30  ;;  %v3303_v9 = vadd.f32 %v5519_v56, %v3302_v31 }
 0x86d   : > { %5522 = vtanh.f32 %v6706_v33  ;;  %v3307_v45 = vsel %vm3306_vm7, %v5519_v56, %v3303_v9 }
 0x86e   : > { %v3312_v12 = vsel %vm3309_vm11, %v3311_v10, %v3307_v45  ;;  %v3498_v10 = vrot.slane %v6706_v33, 7 }
 0x873   : > { %v5523_v16 = vpop.eup %5522 }
 0x874   : > { %v3321_v13 = vmul.f32 %v5523_v16, %v3312_v12 }
 0x876   : > { %3322 = vst.msk [vmem:[#allocation2] sm:$0x8] %vm1739_vm12, %v3321_v13  ;;  %v3328_v18 = vrot.slane %v3321_v13, 3 }
 0x878   : > { %5166 = vmatmul.msk.f32.vlgmr.msra.gmra.mxu0 %vm905_vm0, %v3328_v18  ;;  %5168 = vmatmul.msk.f32.vlgmr.msra.gmra.mxu1 %vm905_vm0, %v3328_v18 }
 0x879   : > { %5170 = vmatmul.msk.f32.vlgmr.msra.gmra.mxu2 %vm905_vm0, %v3328_v18  ;;  %5171 = vmatmul.msk.f32.vlgmr.msra.gmra.mxu3 %vm905_vm0, %v3328_v18 }
 0x87a   : > { %3709 = vmatpush.msra.mxu0 %v6716_v5  ;;  %3756 = vmatpush.msra.mxu1 %v6718_v20 }
 0x87b   : > { %3803 = vmatpush.msra.mxu2 %v6720_v17  ;;  %3832 = vmatpush.msra.mxu3 %v6724_v32 }
 0x87c   : > { %3710 = vmatpush.msra.mxu0 %v6726_v11  ;;  %3757 = vmatpush.msra.mxu1 %v6728_v27 }
 0x87d   : > { %3804 = vmatpush.msra.mxu2 %v6732_v21  ;;  %3833 = vmatpush.msra.mxu3 %v6734_v22 }
 0x87e   : > { %3711 = vmatpush.msra.mxu0 %v6736_v47  ;;  %3758 = vmatpush.msra.mxu1 %v6740_v24 }
 0x87f   : > { %3805 = vmatpush.msra.mxu2 %v6742_v36  ;;  %3834 = vmatpush.msra.mxu3 %v6744_v37 }
 0x880   : > { %3712 = vmatpush.msra.mxu0 %v6749_v41  ;;  %3759 = vmatpush.msra.mxu1 %v6751_v42 }
 0x881   : > { %3806 = vmatpush.msra.mxu2 %v6755_v43  ;;  %3835 = vmatpush.msra.mxu3 %v6757_v44 }
 0x8f5   : > { %v3348_v39 = vpop.f32.mrf.mxu0  ;;  %v3395_v40 = vpop.f32.mrf.mxu1 }
 0x8f6   : > { %v3352_v61 = vrot.slane %v3348_v39, 4  ;;  %v3399_v62 = vrot.slane %v3395_v40, 4 }
 0x8f8   : > { %v3354_v58 = vadd.f32 %v3352_v61, %v6616_v52  ;;  %v3401_v0 = vadd.f32 %v3399_v62, %v6618_v53 }
 0x8fa   : > { %v5167_v3 = vmul.f32 -1.442695, %v3354_v58  ;;  %v5169_v4 = vmul.f32 -1.442695, %v3401_v0 }
 0x8fc   : > { %5524 = vpow2.f32 %v5167_v3  ;;  %v3471_v19 = vpop.f32.mrf.mxu3  ;;  %v3442_v54 = vpop.f32.mrf.mxu2 }
 0x8fd   : > { %5526 = vpow2.f32 %v5169_v4  ;;  %v3475_v35 = vrot.slane %v3471_v19, 4  ;;  %v3446_v55 = vrot.slane %v3442_v54, 4 }
 0x8ff   : > { %v3477_v38 = vadd.f32 %v3475_v35, %v6625_v2  ;;  %v3448_v63 = vadd.f32 %v3446_v55, %v6631_v28 }
 0x901   : > { %v5172_v46 = vmul.f32 -1.442695, %v3477_v38 }
 0x902   : > { %v5525_v48 = vpop.eup %5524 }
 0x903   : > { %v5527_v49 = vpop.eup %5526  ;;  %v3358_v50 = vadd.f32 1.0, %v5525_v48  ;;  %5528 = vpow2.f32 %v5172_v46 }
 0x904   : > { %v3405_v51 = vadd.f32 1.0, %v5527_v49 }
 0x905   : > { %5530 = vrcp.f32 %v3358_v50  ;;  %v3370_v25 = vand.u32 2147483648, %v3358_v50  ;;  %v3368_v23 = vand.u32 2147483647, %v3358_v50  ;;  %vm3364_vm2 = vweird.f32 %v3358_v50 }
 0x906   : > { %5532 = vrcp.f32 %v3405_v51  ;;  %v3417_v29 = vand.u32 2147483648, %v3405_v51  ;;  %v3415_v30 = vand.u32 2147483647, %v3405_v51  ;;  %vm3411_vm8 = vweird.f32 %v3405_v51 }
 0x907   : > { %v3371_v7 = vor.u32 1.1754944e-38, %v3370_v25  ;;  %vm3369_vm1 = vcmp.eq.f32.partialorder %v3368_v23, 8.507059e+37 }
 0x908   : > { %v3418_v16 = vor.u32 1.1754944e-38, %v3417_v29  ;;  %vm3416_vm4 = vcmp.eq.f32.partialorder %v3415_v30, 8.507059e+37 }
 0x909   : > { %v5529_v56 = vpop.eup %5528 }
 0x90a   : > { %v3481_v57 = vadd.f32 1.0, %v5529_v56 }
 0x90b   : > { %v5531_v59 = vpop.eup %5530 }
 0x90c   : > { %v5533_v1 = vpop.eup %5532  ;;  %v3360_v6 = vmul.f32 %v5531_v59, %v3358_v50  ;;  %5534 = vrcp.f32 %v3481_v57  ;;  %vm3365_vm12 = vweird.f32 %v5531_v59  ;;  %v3493_v33 = vand.u32 2147483648, %v3481_v57 }
 0x90d   : > { %v3407_v14 = vmul.f32 %v5533_v1, %v3405_v51  ;;  %5536 = vtanh.f32 %v3448_v63  ;;  %vm3412_vm10 = vweird.f32 %v5533_v1  ;;  %vm3366_vm9 = vmor %vm3364_vm2, %vm3365_vm12  ;;  %vm3487_vm6 = vweird.f32 %v3481_v57 }
 0x90e   : > { %v3361_v15 = vsub.f32 1.0, %v3360_v6  ;;  %vm3413_vm14 = vmor %vm3411_vm8, %vm3412_vm10  ;;  %v3491_v19 = vand.u32 2147483647, %v3481_v57  ;;  %v3494_v38 = vor.u32 1.1754944e-38, %v3493_v33 }
 0x90f   : > { %v3408_v60 = vsub.f32 1.0, %v3407_v14 }
 0x910   : > { %v3362_v34 = vmul.f32 %v5531_v59, %v3361_v15  ;;  %vm3492_vm7 = vcmp.eq.f32.partialorder %v3491_v19, 8.507059e+37 }
 0x911   : > { %v3409_v26 = vmul.f32 %v5533_v1, %v3408_v60 }
 0x912   : > { %v5535_v31 = vpop.eup %5534  ;;  %v3363_v9 = vadd.f32 %v5531_v59, %v3362_v34 }
 0x913   : > { %v3410_v8 = vadd.f32 %v5533_v1, %v3409_v26  ;;  %v3483_v45 = vmul.f32 %v5535_v31, %v3481_v57  ;;  %v5537_v13 = vpop.eup %5536  ;;  %vm3488_vm5 = vweird.f32 %v5535_v31 }
 0x914   : > { %v3367_v12 = vsel %vm3366_vm9, %v5531_v59, %v3363_v9  ;;  %vm3489_vm13 = vmor %vm3487_vm6, %vm3488_vm5 }
 0x915   : > { %v3372_v18 = vsel %vm3369_vm1, %v3371_v7, %v3367_v12  ;;  %v3414_v39 = vsel %vm3413_vm14, %v5533_v1, %v3410_v8  ;;  %v3484_v40 = vsub.f32 1.0, %v3483_v45 }
 0x916   : > { %v3419_v61 = vsel %vm3416_vm4, %v3418_v16, %v3414_v39  ;;  %v3501_v62 = vmul.f32 %v5537_v13, %v3372_v18 }
 0x917   : > { %v3500_v58 = vmul.f32 %v3498_v10, %v3419_v61  ;;  %v3485_v0 = vmul.f32 %v5535_v31, %v3484_v40 }
 0x919   : > { %v6783_v3 = vadd.f32 %v3501_v62, %v3500_v58  ;;  %v3486_v4 = vadd.f32 %v5535_v31, %v3485_v0 }
 0x91b   : > { %5538 = vtanh.f32 %v6783_v3  ;;  %v3490_v35 = vsel %vm3489_vm13, %v5535_v31, %v3486_v4  ;;  %v3681_v45 = vrot.slane %v6783_v3, 7 }
 0x91c   : > { %v3495_v48 = vsel %vm3492_vm7, %v3494_v38, %v3490_v35 }
 0x921   : > { %v5539_v46 = vpop.eup %5538 }
 0x922   : > { %v3504_v49 = vmul.f32 %v5539_v46, %v3495_v48 }
 0x924   : > { %3505 = vst.msk [vmem:[#allocation2] sm:$0x10] %vm1923_vm15, %v3504_v49  ;;  %v3511_v50 = vrot.slane %v3504_v49, 4 }
 0x926   : > { %5173 = vmatmul.msk.f32.vlgmr.msrb.gmra.mxu0 %vm905_vm0, %v3511_v50  ;;  %5175 = vmatmul.msk.f32.vlgmr.msrb.gmra.mxu1 %vm905_vm0, %v3511_v50 }
 0x927   : > { %5177 = vmatmul.msk.f32.vlgmr.msrb.gmra.mxu2 %vm905_vm0, %v3511_v50  ;;  %5178 = vmatmul.msk.f32.vlgmr.msrb.gmra.mxu3 %vm905_vm0, %v3511_v50 }
 0x928   : > { %3892 = vmatpush.msrb.mxu0 %v6716_v5  ;;  %3939 = vmatpush.msrb.mxu1 %v6718_v20 }
 0x929   : > { %3986 = vmatpush.msrb.mxu2 %v6720_v17  ;;  %4015 = vmatpush.msrb.mxu3 %v6724_v32 }
 0x92a   : > { %3893 = vmatpush.msrb.mxu0 %v6726_v11  ;;  %3940 = vmatpush.msrb.mxu1 %v6728_v27 }
 0x92b   : > { %3987 = vmatpush.msrb.mxu2 %v6732_v21  ;;  %4016 = vmatpush.msrb.mxu3 %v6734_v22 }
 0x92c   : > { %3894 = vmatpush.msrb.mxu0 %v6736_v47  ;;  %3941 = vmatpush.msrb.mxu1 %v6740_v24 }
 0x92d   : > { %3988 = vmatpush.msrb.mxu2 %v6742_v36  ;;  %4017 = vmatpush.msrb.mxu3 %v6744_v37 }
 0x92e   : > { %3895 = vmatpush.msrb.mxu0 %v6749_v41  ;;  %3942 = vmatpush.msrb.mxu1 %v6751_v42 }
 0x92f   : > { %3989 = vmatpush.msrb.mxu2 %v6755_v43  ;;  %4018 = vmatpush.msrb.mxu3 %v6757_v44 }
 0x9a3   : > { %v3531_v5 = vpop.f32.mrf.mxu0  ;;  %v3578_v20 = vpop.f32.mrf.mxu1 }
 0x9a4   : > { %v3535_v17 = vrot.slane %v3531_v5, 3  ;;  %v3582_v32 = vrot.slane %v3578_v20, 3 }
 0x9a6   : > { %v3537_v11 = vadd.f32 %v3535_v17, %v6616_v52  ;;  %v3584_v27 = vadd.f32 %v3582_v32, %v6618_v53 }
 0x9a8   : > { %v5174_v21 = vmul.f32 -1.442695, %v3537_v11  ;;  %v5176_v22 = vmul.f32 -1.442695, %v3584_v27 }
 0x9aa   : > { %5540 = vpow2.f32 %v5174_v21  ;;  %v3654_v47 = vpop.f32.mrf.mxu3  ;;  %v3625_v51 = vpop.f32.mrf.mxu2 }
 0x9ab   : > { %5542 = vpow2.f32 %v5176_v22  ;;  %v3658_v24 = vrot.slane %v3654_v47, 3  ;;  %v3629_v54 = vrot.slane %v3625_v51, 3 }
 0x9ad   : > { %v3660_v36 = vadd.f32 %v3658_v24, %v6625_v2  ;;  %v3631_v59 = vadd.f32 %v3629_v54, %v6631_v28 }
 0x9af   : > { %v5179_v37 = vmul.f32 -1.442695, %v3660_v36 }
 0x9b0   : > { %v5541_v41 = vpop.eup %5540 }
 0x9b1   : > { %v5543_v42 = vpop.eup %5542  ;;  %v3541_v43 = vadd.f32 1.0, %v5541_v41  ;;  %5544 = vpow2.f32 %v5179_v37 }
 0x9b2   : > { %v3588_v44 = vadd.f32 1.0, %v5543_v42 }
 0x9b3   : > { %5546 = vrcp.f32 %v3541_v43  ;;  %v3553_v60 = vand.u32 2147483648, %v3541_v43  ;;  %v3551_v34 = vand.u32 2147483647, %v3541_v43  ;;  %vm3547_vm12 = vweird.f32 %v3541_v43 }
 0x9b4   : > { %5548 = vrcp.f32 %v3588_v44  ;;  %v3600_v25 = vand.u32 2147483648, %v3588_v44  ;;  %v3598_v26 = vand.u32 2147483647, %v3588_v44  ;;  %vm3594_vm10 = vweird.f32 %v3588_v44 }
 0x9b5   : > { %v3554_v9 = vor.u32 1.1754944e-38, %v3553_v60  ;;  %vm3552_vm9 = vcmp.eq.f32.partialorder %v3551_v34, 8.507059e+37 }
 0x9b6   : > { %v3601_v10 = vor.u32 1.1754944e-38, %v3600_v25  ;;  %vm3599_vm14 = vcmp.eq.f32.partialorder %v3598_v26, 8.507059e+37 }
 0x9b7   : > { %v5545_v55 = vpop.eup %5544 }
 0x9b8   : > { %v3664_v56 = vadd.f32 1.0, %v5545_v55 }
 0x9b9   : > { %v5547_v57 = vpop.eup %5546 }
 0x9ba   : > { %v5549_v63 = vpop.eup %5548  ;;  %v3543_v1 = vmul.f32 %v5547_v57, %v3541_v43  ;;  %5550 = vrcp.f32 %v3664_v56  ;;  %vm3548_vm15 = vweird.f32 %v5547_v57  ;;  %v3676_v3 = vand.u32 2147483648, %v3664_v56 }
 0x9bb   : > { %v3590_v6 = vmul.f32 %v5549_v63, %v3588_v44  ;;  %5552 = vtanh.f32 %v3631_v59  ;;  %vm3595_vm11 = vweird.f32 %v5549_v63  ;;  %vm3549_vm2 = vmor %vm3547_vm12, %vm3548_vm15  ;;  %vm3670_vm4 = vweird.f32 %v3664_v56 }
 0x9bc   : > { %v3544_v14 = vsub.f32 1.0, %v3543_v1  ;;  %vm3596_vm8 = vmor %vm3594_vm10, %vm3595_vm11  ;;  %v3674_v33 = vand.u32 2147483647, %v3664_v56  ;;  %v3677_v35 = vor.u32 1.1754944e-38, %v3676_v3 }
 0x9bd   : > { %v3591_v15 = vsub.f32 1.0, %v3590_v6 }
 0x9be   : > { %v3545_v29 = vmul.f32 %v5547_v57, %v3544_v14  ;;  %vm3675_vm6 = vcmp.eq.f32.partialorder %v3674_v33, 8.507059e+37 }
 0x9bf   : > { %v3592_v23 = vmul.f32 %v5549_v63, %v3591_v15 }
 0x9c0   : > { %v5551_v30 = vpop.eup %5550  ;;  %v3546_v31 = vadd.f32 %v5547_v57, %v3545_v29 }
 0x9c1   : > { %v3593_v7 = vadd.f32 %v5549_v63, %v3592_v23  ;;  %v3666_v8 = vmul.f32 %v5551_v30, %v3664_v56  ;;  %v5553_v12 = vpop.eup %5552  ;;  %vm3671_vm1 = vweird.f32 %v5551_v30 }
 0x9c2   : > { %v3550_v16 = vsel %vm3549_vm2, %v5547_v57, %v3546_v31  ;;  %vm3672_vm5 = vmor %vm3670_vm4, %vm3671_vm1  ;;  %vm7064_vm4 = vcmask 260102  }
 0x9c3   : > { %v3555_v13 = vsel %vm3552_vm9, %v3554_v9, %v3550_v16  ;;  %v3597_v18 = vsel %vm3596_vm8, %v5549_v63, %v3593_v7  ;;  %v3667_v39 = vsub.f32 1.0, %v3666_v8 }
 0x9c4   : > { %v3602_v40 = vsel %vm3599_vm14, %v3601_v10, %v3597_v18  ;;  %v3684_v61 = vmul.f32 %v5553_v12, %v3555_v13 }
 0x9c5   : > { %v3683_v62 = vmul.f32 %v3681_v45, %v3602_v40  ;;  %v3668_v58 = vmul.f32 %v5551_v30, %v3667_v39 }
 0x9c7   : > { %v6812_v0 = vadd.f32 %v3684_v61, %v3683_v62  ;;  %v3669_v4 = vadd.f32 %v5551_v30, %v3668_v58 }
 0x9c9   : > { %5554 = vtanh.f32 %v6812_v0  ;;  %v3673_v19 = vsel %vm3672_vm5, %v5551_v30, %v3669_v4  ;;  %v3864_v8 = vrot.slane %v6812_v0, 7 }
 0x9ca   : > { %v3678_v46 = vsel %vm3675_vm6, %v3677_v35, %v3673_v19 }
 0x9cf   : > { %v5555_v38 = vpop.eup %5554 }
 0x9d0   : > { %v3687_v48 = vmul.f32 %v5555_v38, %v3678_v46 }
 0x9d2   : > { %3688 = vst.msk [vmem:[#allocation2] sm:$0x20] %vm2107_vm3, %v3687_v48  ;;  %v3694_v49 = vrot.slane %v3687_v48, 5 }
 0x9d4   : > { %5180 = vmatmul.msk.f32.vlgmr.msra.gmra.mxu0 %vm905_vm0, %v3694_v49  ;;  %5182 = vmatmul.msk.f32.vlgmr.msra.gmra.mxu1 %vm905_vm0, %v3694_v49 }
 0x9d5   : > { %5184 = vmatmul.msk.f32.vlgmr.msra.gmra.mxu2 %vm905_vm0, %v3694_v49  ;;  %5185 = vmatmul.msk.f32.vlgmr.msra.gmra.mxu3 %vm905_vm0, %v3694_v49 }
 0xa51   : > { %v3714_v50 = vpop.f32.mrf.mxu0  ;;  %v3761_v5 = vpop.f32.mrf.mxu1 }
 0xa52   : > { %v3718_v20 = vrot.slane %v3714_v50, 2  ;;  %v3765_v17 = vrot.slane %v3761_v5, 2 }
 0xa54   : > { %v3720_v32 = vadd.f32 %v3718_v20, %v6616_v52  ;;  %v3767_v11 = vadd.f32 %v3765_v17, %v6618_v53 }
 0xa56   : > { %v5181_v27 = vmul.f32 -1.442695, %v3720_v32  ;;  %v5183_v21 = vmul.f32 -1.442695, %v3767_v11 }
 0xa58   : > { %5556 = vpow2.f32 %v5181_v27  ;;  %v3837_v22 = vpop.f32.mrf.mxu3  ;;  %v3808_v44 = vpop.f32.mrf.mxu2 }
 0xa59   : > { %5558 = vpow2.f32 %v5183_v21  ;;  %v3841_v47 = vrot.slane %v3837_v22, 2  ;;  %v3812_v51 = vrot.slane %v3808_v44, 2  ;;  %v4059_v44 = vld [vmem:[%s7066_s4 + $0x10] sm:$0xff] }
 0xa5b   : > { %v3843_v24 = vadd.f32 %v3841_v47, %v6625_v2  ;;  %v3814_v57 = vadd.f32 %v3812_v51, %v6631_v28  ;;  %v4062_v51 = vld [vmem:[%s7065_s11 + $0x8] sm:$0xff] }
 0xa5d   : > { %v5186_v36 = vmul.f32 -1.442695, %v3843_v24 }
 0xa5e   : > { %v5557_v37 = vpop.eup %5556 }
 0xa5f   : > { %v5559_v41 = vpop.eup %5558  ;;  %v3724_v42 = vadd.f32 1.0, %v5557_v37  ;;  %5560 = vpow2.f32 %v5186_v36 }
 0xa60   : > { %v3771_v43 = vadd.f32 1.0, %v5559_v41 }
 0xa61   : > { %5562 = vrcp.f32 %v3724_v42  ;;  %v3736_v15 = vand.u32 2147483648, %v3724_v42  ;;  %v3734_v29 = vand.u32 2147483647, %v3724_v42  ;;  %vm3730_vm7 = vweird.f32 %v3724_v42 }
 0xa62   : > { %5564 = vrcp.f32 %v3771_v43  ;;  %v3783_v60 = vand.u32 2147483648, %v3771_v43  ;;  %v3781_v23 = vand.u32 2147483647, %v3771_v43  ;;  %vm3777_vm15 = vweird.f32 %v3771_v43 }
 0xa63   : > { %v3737_v31 = vor.u32 1.1754944e-38, %v3736_v15  ;;  %vm3735_vm10 = vcmp.eq.f32.partialorder %v3734_v29, 8.507059e+37 }
 0xa64   : > { %v3784_v45 = vor.u32 1.1754944e-38, %v3783_v60  ;;  %vm3782_vm2 = vcmp.eq.f32.partialorder %v3781_v23, 8.507059e+37 }
 0xa65   : > { %v5561_v54 = vpop.eup %5560 }
 0xa66   : > { %v3847_v55 = vadd.f32 1.0, %v5561_v54  ;;  %v4058_v54 = vld [vmem:[%s7066_s4 + $0x8] sm:$0xff] }
 0xa67   : > { %v5563_v56 = vpop.eup %5562 }
 0xa68   : > { %v5565_v59 = vpop.eup %5564  ;;  %v3726_v63 = vmul.f32 %v5563_v56, %v3724_v42  ;;  %5566 = vrcp.f32 %v3847_v55  ;;  %vm3731_vm3 = vweird.f32 %v5563_v56  ;;  %v3859_v0 = vand.u32 2147483648, %v3847_v55 }
 0xa69   : > { %v3773_v1 = vmul.f32 %v5565_v59, %v3771_v43  ;;  %5568 = vtanh.f32 %v3814_v57  ;;  %vm3778_vm13 = vweird.f32 %v5565_v59  ;;  %vm3732_vm11 = vmor %vm3730_vm7, %vm3731_vm3  ;;  %vm3853_vm9 = vweird.f32 %v3847_v55  ;;  %v4057_v57 = vld [vmem:[%s7066_s4] sm:$0xff] }
 0xa6a   : > { %v3727_v6 = vsub.f32 1.0, %v3726_v63  ;;  %vm3779_vm12 = vmor %vm3777_vm15, %vm3778_vm13  ;;  %v3857_v3 = vand.u32 2147483647, %v3847_v55  ;;  %v3860_v19 = vor.u32 1.1754944e-38, %v3859_v0 }
 0xa6b   : > { %v3774_v14 = vsub.f32 1.0, %v3773_v1 }
 0xa6c   : > { %v3728_v25 = vmul.f32 %v5563_v56, %v3727_v6  ;;  %vm3858_vm1 = vcmp.eq.f32.partialorder %v3857_v3, 8.507059e+37 }
 0xa6d   : > { %v3775_v34 = vmul.f32 %v5565_v59, %v3774_v14 }
 0xa6e   : > { %v5567_v26 = vpop.eup %5566  ;;  %v3729_v30 = vadd.f32 %v5563_v56, %v3728_v25 }
 0xa6f   : > { %v3776_v9 = vadd.f32 %v5565_v59, %v3775_v34  ;;  %v3849_v7 = vmul.f32 %v5567_v26, %v3847_v55  ;;  %v5569_v16 = vpop.eup %5568  ;;  %vm3854_vm8 = vweird.f32 %v5567_v26 }
 0xa70   : > { %v3733_v10 = vsel %vm3732_vm11, %v5563_v56, %v3729_v30  ;;  %vm3855_vm14 = vmor %vm3853_vm9, %vm3854_vm8  ;;  %v4061_v56 = vld [vmem:[%s7065_s11] sm:$0xff] }
 0xa71   : > { %v3738_v12 = vsel %vm3735_vm10, %v3737_v31, %v3733_v10  ;;  %v3780_v13 = vsel %vm3779_vm12, %v5565_v59, %v3776_v9  ;;  %v3850_v18 = vsub.f32 1.0, %v3849_v7  ;;  %v5620_v59 = vld [vmem:[%s6074_s6] sm:$0xff] }
 0xa72   : > { %v3785_v39 = vsel %vm3782_vm2, %v3784_v45, %v3780_v13  ;;  %v3867_v40 = vmul.f32 %v5569_v16, %v3738_v12  ;;  %v4056_v63 = vmul.f32 5.656854, %v5620_v59 }
 0xa73   : > { %v3866_v61 = vmul.f32 %v3864_v8, %v3785_v39  ;;  %v3851_v62 = vmul.f32 %v5567_v26, %v3850_v18 }
 0xa75   : > { %v6825_v58 = vadd.f32 %v3867_v40, %v3866_v61  ;;  %v3852_v4 = vadd.f32 %v5567_v26, %v3851_v62 }
 0xa77   : > { %5570 = vtanh.f32 %v6825_v58  ;;  %v3856_v33 = vsel %vm3855_vm14, %v5567_v26, %v3852_v4  ;;  %v4047_v13 = vrot.slane %v6825_v58, 7  ;;  %vm7067_vm14 = vcmask 261127  }
 0xa78   : > { %v3861_v38 = vsel %vm3858_vm1, %v3860_v19, %v3856_v33  ;;  %vm4159_vm1 = vcmask 130048  }
 0xa7d   : > { %v5571_v35 = vpop.eup %5570 }
 0xa7e   : > { %v3870_v46 = vmul.f32 %v5571_v35, %v3861_v38 }
 0xa80   : > { %3871 = vst.msk [vmem:[#allocation2] sm:$0x40] %vm7064_vm4, %v3870_v46  ;;  %v3877_v48 = vrot.slane %v3870_v46, 6  ;;  %vm4186_vm4 = vcmask 64512  }
 0xa82   : > { %5187 = vmatmul.msk.f32.vlgmr.msrb.gmra.mxu0 %vm905_vm0, %v3877_v48  ;;  %5189 = vmatmul.msk.f32.vlgmr.msrb.gmra.mxu1 %vm905_vm0, %v3877_v48 }
 0xa83   : > { %5191 = vmatmul.msk.f32.vlgmr.msrb.gmra.mxu2 %vm905_vm0, %v3877_v48  ;;  %5192 = vmatmul.msk.f32.vlgmr.msrb.gmra.mxu3 %vm905_vm0, %v3877_v48 }
 0xaff   : > { %v3897_v49 = vpop.f32.mrf.mxu0  ;;  %v3944_v50 = vpop.f32.mrf.mxu1 }
 0xb00   : > { %v3901_v5 = vrot.slane %v3897_v49, 1  ;;  %v3948_v20 = vrot.slane %v3944_v50, 1 }
 0xb02   : > { %v3903_v17 = vadd.f32 %v3901_v5, %v6616_v52  ;;  %v3950_v32 = vadd.f32 %v3948_v20, %v6618_v53  ;;  %v4064_v52 = vld [vmem:[%s7065_s11 + $0x18] sm:$0xff] }
 0xb03   : > { %v4060_v53 = vld [vmem:[%s7066_s4 + $0x18] sm:$0xff]  ;;  %4080 = vmatpush.msra.mxu0 %v4064_v52  ;;  %v5315_v52 = vld [vmem:[%s7019_s12] ss:$0 sm:$0xff] }
 0xb04   : > { %v5188_v11 = vmul.f32 -1.442695, %v3903_v17  ;;  %v5190_v27 = vmul.f32 -1.442695, %v3950_v32  ;;  %4103 = vmatpush.msra.mxu1 %v4060_v53  ;;  %v4123_v32 = vld [vmem:[#allocation5 + $0x18] sm:$0xff] }
 0xb05   : > { %4143 = vmatpush.msra.mxu2 %v4123_v32 }
 0xb06   : > { %5572 = vpow2.f32 %v5188_v11  ;;  %v4020_v21 = vpop.f32.mrf.mxu3  ;;  %v3991_v43 = vpop.f32.mrf.mxu2  ;;  %4104 = vmatpush.msra.mxu1 %v4059_v44  ;;  %v4122_v11 = vld [vmem:[#allocation5 + $0x10] sm:$0xff] }
 0xb07   : > { %5574 = vpow2.f32 %v5190_v27  ;;  %v4024_v22 = vrot.slane %v4020_v21, 1  ;;  %v3995_v55 = vrot.slane %v3991_v43, 1  ;;  %4144 = vmatpush.msra.mxu2 %v4122_v11  ;;  %v4121_v27 = vld [vmem:[#allocation5 + $0x8] sm:$0xff]  ;;  %v4120_v21 = vld [vmem:[#allocation5] sm:$0xff] }
 0xb08   : > { %4105 = vmatpush.msra.mxu1 %v4058_v54 }
 0xb09   : > { %v4026_v47 = vadd.f32 %v4024_v22, %v6625_v2  ;;  %v4063_v2 = vld [vmem:[%s7065_s11 + $0x10] sm:$0xff]  ;;  %v3997_v15 = vadd.f32 %v3995_v55, %v6631_v28  ;;  %4145 = vmatpush.msra.mxu2 %v4121_v27 }
 0xb0a   : > { %4081 = vmatpush.msra.mxu0 %v4063_v2  ;;  %4106 = vmatpush.msra.mxu1 %v4057_v57 }
 0xb0b   : > { %v5193_v24 = vmul.f32 -1.442695, %v4026_v47  ;;  %4146 = vmatpush.msra.mxu2 %v4120_v21  ;;  %v5314_v47 = vld [vmem:[%s7068_s15] ss:$0 sm:$0xff]  ;;  %s5837_s15 = smov 64  }
 0xb0c   : > { %v5573_v36 = vpop.eup %5572  ;;  %4082 = vmatpush.msra.mxu0 %v4062_v51 }
 0xb0d   : > { %v5575_v37 = vpop.eup %5574  ;;  %v3907_v41 = vadd.f32 1.0, %v5573_v36  ;;  %5576 = vpow2.f32 %v5193_v24 }
 0xb0e   : > { %v3954_v42 = vadd.f32 1.0, %v5575_v37  ;;  %4083 = vmatpush.msra.mxu0 %v4061_v56  ;;  %v6889_v56 = vld [vmem:[%s7017_s10] sm:$0xff] }
 0xb0f   : > { %5578 = vrcp.f32 %v3907_v41  ;;  %5194 = vmatmul.msk.f32.vlgmr.msra.gmra.mxu0 %vm905_vm0, %v4056_v63  ;;  %v3919_v26 = vand.u32 2147483648, %v3907_v41  ;;  %v3917_v9 = vand.u32 2147483647, %v3907_v41  ;;  %vm3913_vm3 = vweird.f32 %v3907_v41 }
 0xb10   : > { %5580 = vrcp.f32 %v3954_v42  ;;  %v3966_v30 = vand.u32 2147483648, %v3954_v42  ;;  %v3964_v8 = vand.u32 2147483647, %v3954_v42  ;;  %vm3960_vm13 = vweird.f32 %v3954_v42 }
 0xb11   : > { %v3920_v10 = vor.u32 1.1754944e-38, %v3919_v26  ;;  %vm3918_vm11 = vcmp.eq.f32.partialorder %v3917_v9, 8.507059e+37 }
 0xb12   : > { %v3967_v18 = vor.u32 1.1754944e-38, %v3966_v30  ;;  %vm3965_vm12 = vcmp.eq.f32.partialorder %v3964_v8, 8.507059e+37  ;;  %v4152_v8 = vld [vmem:[#allocation7 + $0x8] sm:$0xff] }
 0xb13   : > { %v5577_v1 = vpop.eup %5576  ;;  %4241 = vmatpush.msrb.mxu1 %v4152_v8 }
 0xb14   : > { %v4030_v6 = vadd.f32 1.0, %v5577_v1 }
 0xb15   : > { %v5579_v14 = vpop.eup %5578 }
 0xb16   : > { %v5581_v60 = vpop.eup %5580  ;;  %v3909_v25 = vmul.f32 %v5579_v14, %v3907_v41  ;;  %5582 = vrcp.f32 %v4030_v6  ;;  %vm3914_vm5 = vweird.f32 %v5579_v14  ;;  %v4042_v46 = vand.u32 2147483648, %v4030_v6  ;;  %v4117_v41 = vld [vmem:[%s7069_s0] sm:$0xff] }
 0xb17   : > { %v3956_v29 = vmul.f32 %v5581_v60, %v3954_v42  ;;  %5584 = vtanh.f32 %v3997_v15  ;;  %vm3961_vm6 = vweird.f32 %v5581_v60  ;;  %vm3915_vm7 = vmor %vm3913_vm3, %vm3914_vm5  ;;  %vm4036_vm2 = vweird.f32 %v4030_v6 }
 0xb18   : > { %v3910_v34 = vsub.f32 1.0, %v3909_v25  ;;  %vm3962_vm15 = vmor %vm3960_vm13, %vm3961_vm6  ;;  %v4040_v58 = vand.u32 2147483647, %v4030_v6  ;;  %v4043_v49 = vor.u32 1.1754944e-38, %v4042_v46 }
 0xb19   : > { %v3957_v23 = vsub.f32 1.0, %v3956_v29 }
 0xb1a   : > { %v3911_v31 = vmul.f32 %v5579_v14, %v3910_v34  ;;  %vm4041_vm9 = vcmp.eq.f32.partialorder %v4040_v58, 8.507059e+37 }
 0xb1b   : > { %v3958_v7 = vmul.f32 %v5581_v60, %v3957_v23 }
 0xb1c   : > { %v5583_v28 = vpop.eup %5582  ;;  %v3912_v45 = vadd.f32 %v5579_v14, %v3911_v31 }
 0xb1d   : > { %v3959_v16 = vadd.f32 %v5581_v60, %v3958_v7  ;;  %v4032_v12 = vmul.f32 %v5583_v28, %v4030_v6  ;;  %v5585_v40 = vpop.eup %5584  ;;  %vm4037_vm10 = vweird.f32 %v5583_v28 }
 0xb1e   : > { %v3916_v39 = vsel %vm3915_vm7, %v5579_v14, %v3912_v45  ;;  %vm4038_vm8 = vmor %vm4036_vm2, %vm4037_vm10 }
 0xb1f   : > { %v3921_v61 = vsel %vm3918_vm11, %v3920_v10, %v3916_v39  ;;  %v3963_v62 = vsel %vm3962_vm15, %v5581_v60, %v3959_v16  ;;  %v4033_v4 = vsub.f32 1.0, %v4032_v12 }
 0xb20   : > { %v3968_v0 = vsel %vm3965_vm12, %v3967_v18, %v3963_v62  ;;  %v4050_v3 = vmul.f32 %v5585_v40, %v3921_v61  ;;  %v4154_v40 = vld [vmem:[#allocation7 + $0x18] sm:$0xff]  ;;  %v4153_v61 = vld [vmem:[#allocation7 + $0x10] sm:$0xff]  ;;  %v4151_v62 = vld [vmem:[#allocation7] sm:$0xff] }
 0xb21   : > { %v4049_v33 = vmul.f32 %v4047_v13, %v3968_v0  ;;  %v4034_v19 = vmul.f32 %v5583_v28, %v4033_v4  ;;  %4242 = vmatpush.msrb.mxu1 %v4151_v62 }
 0xb23   : > { %v4051_v35 = vadd.f32 %v4050_v3, %v4049_v33  ;;  %v4035_v38 = vadd.f32 %v5583_v28, %v4034_v19  ;;  %v5316_v3 = vld [vmem:[%s7021_s14] ss:$0 sm:$0xff] }
 0xb25   : > { %5586 = vtanh.f32 %v4051_v35  ;;  %v4039_v48 = vsel %vm4038_vm8, %v5583_v28, %v4035_v38 }
 0xb26   : > { %v4044_v5 = vsel %vm4041_vm9, %v4043_v49, %v4039_v48  ;;  %v5838_v48 = vmov 32.0  }
 0xb2b   : > { %v5587_v50 = vpop.eup %5586 }
 0xb2c   : > { %v4053_v20 = vmul.f32 %v5587_v50, %v4044_v5 }
 0xb2e   : > { %4054 = vst.msk [vmem:[#allocation2] sm:$0x80] %vm7067_vm14, %v4053_v20 }
 0xb35   : > { %v4055_v17 = vld [vmem:[#allocation2] sm:$0xff] }
 0xb36   : > { %5195 = vmatmul.msk.f32.vlgmr.msra.gmra.mxu1 %vm905_vm0, %v4055_v17 }
 0xb8c   : > { %v4085_v22 = vpop.f32.mrf.mxu0 }
 0xbb3   : > { %v4108_v24 = vpop.f32.mrf.mxu1 }
 0xbb4   : > { %v4109_v36 = vadd.f32 %v4108_v24, %v4085_v22  ;;  %v4385_v24 = vld [vmem:[#allocation8 + $0x18] sm:$0xff] }
 0xbb5   : > { %4405 = vmatpush.msra.mxu1 %v4385_v24 }
 0xbb6   : > { %v4115_v37 = vadd.f32 %v5314_v47, %v4109_v36  ;;  %v4384_v36 = vld [vmem:[#allocation8 + $0x10] sm:$0xff] }
 0xbb7   : > { %4406 = vmatpush.msra.mxu1 %v4384_v36 }
 0xbb8   : > { %v4116_v42 = vmax.f32 %v4115_v37, 0.0  ;;  %v4383_v37 = vld [vmem:[#allocation8 + $0x8] sm:$0xff] }
 0xbb9   : > { %4407 = vmatpush.msra.mxu1 %v4383_v37 }
 0xbba   : > { %v6872_v43 = vadd.f32 %v4117_v41, %v4116_v42  ;;  %v4382_v41 = vld [vmem:[#allocation8] sm:$0xff]  ;;  %v4417_v42 = vld [vmem:[#allocation10 + $0x18] sm:$0xff] }
 0xbbb   : > { %4408 = vmatpush.msra.mxu1 %v4382_v41 }
 0xbbc   : > { %5196 = vmatmul.msk.f32.vlgmr.msra.gmra.mxu2 %vm905_vm0, %v6872_v43 }
 0xc3f   : > { %v4148_v53 = vpop.f32.mrf.mxu2 }
 0xc40   : > { %v4149_v2 = vadd.f32 %v5315_v52, %v4148_v53 }
 0xc42   : > { %4157 = vrot.lane.b32.xlu1 %v4149_v2, %s5833_s7  ;;  %4253 = vrot.lane.b32.xlu0 %v4149_v2, %s5834_s8 }
 0xc4a   : > { %4251 = vrot.lane.b32.xlu0 %v4149_v2, %s5835_s5 }
 0xcb4   : > { %v4158_v44 = vpop.permute.xlu1 %4157  ;;  %v4254_v51 = vpop.permute.xlu0 %4253 }
 0xcb5   : > { %5197 = vmatpush.xpose.msk.msra.mxu3 %vm4159_vm1, %v4158_v44  ;;  %5201 = vmatpush.xpose.msk.msrb.mxu2 %vm4159_vm1, %v4254_v51 }
 0xcb8   : > { %5198 = vmatmul.msk.f32.vlgmr.msra.gmra.mxu3 %vm4159_vm1, %v4149_v2 }
 0xcb9   : > { %4437 = vmatpush.msra.mxu2 %v4417_v42 }
 0xcbc   : > { %v4252_v54 = vpop.permute.xlu0 %4251 }
 0xcbd   : > { %5202 = vmatmul.msk.f32.vlgmr.msrb.gmra.mxu2 %vm4159_vm1, %v4252_v54 }
 0xd3b   : > { %v4181_v55 = vpop.f32.mrf.mxu3 }
 0xd3c   : > { %v4184_v57 = vmul.f32 0.25, %v4181_v55 }
 0xd3e   : > { %v4185_v59 = vadd.f32 %v4184_v57, %v6889_v56 }
 0xd40   : > { %v4276_v63 = vpop.f32.mrf.mxu2  ;;  %v4187_v1 = vsel %vm4186_vm4, %v4185_v59, -inf }
 0xd41   : > { %v4279_v6 = vmul.f32 0.25, %v4276_v63  ;;  %4188 = vmax.xlane.f32.xlu2 %v4187_v1 }
 0xd43   : > { %v4280_v14 = vadd.f32 %v4279_v6, %v6889_v56  ;;  %v5318_v6 = vld [vmem:[%s7027_s20] ss:$0 sm:$0xff] }
 0xd45   : > { %v4281_v15 = vsel %vm4186_vm4, %v4280_v14, -inf }
 0xd46   : > { %4282 = vmax.xlane.f32.xlu1 %v4281_v15 }
 0xdb4   : > { %v4189_v60 = vpop.xlane.xlu2 %4188 }
 0xdb5   : > { %v4190_v25 = vsub.f32 %v4185_v59, %v4189_v60  ;;  %v5317_v59 = vld [vmem:[%s7026_s19] ss:$0 sm:$0xff]  ;;  %v4416_v60 = vld [vmem:[#allocation10 + $0x10] sm:$0xff] }
 0xdb6   : > { %4438 = vmatpush.msra.mxu2 %v4416_v60 }
 0xdb7   : > { %v4191_v29 = vmul.f32 1.442695, %v4190_v25  ;;  %v4415_v25 = vld [vmem:[#allocation10 + $0x8] sm:$0xff] }
 0xdb8   : > { %4439 = vmatpush.msra.mxu2 %v4415_v25 }
 0xdb9   : > { %5588 = vpow2.f32 %v4191_v29  ;;  %v4283_v34 = vpop.xlane.xlu1 %4282  ;;  %v4414_v29 = vld [vmem:[#allocation10] sm:$0xff] }
 0xdba   : > { %v4284_v23 = vsub.f32 %v4280_v14, %v4283_v34  ;;  %4440 = vmatpush.msra.mxu2 %v4414_v29  ;;  %v5319_v34 = vld [vmem:[%s7023_s16] ss:$0 sm:$0xff] }
 0xdbc   : > { %v4285_v26 = vmul.f32 1.442695, %v4284_v23 }
 0xdbe   : > { %5590 = vpow2.f32 %v4285_v26 }
 0xdbf   : > { %v5589_v30 = vpop.eup %5588 }
 0xdc0   : > { %v4193_v31 = vsel %vm4186_vm4, %v5589_v30, 0.0 }
 0xdc1   : > { %4194 = vadd.xlane.f32.xlu0 %v4193_v31  ;;  %v5320_v31 = vld [vmem:[%s7025_s18] ss:$0 sm:$0xff] }
 0xdc4   : > { %v5591_v9 = vpop.eup %5590 }
 0xdc5   : > { %v4287_v7 = vsel %vm4186_vm4, %v5591_v9, 0.0 }
 0xdc6   : > { %4288 = vadd.xlane.f32.xlu2 %v4287_v7 }
 0xdde   : > { %4292 = vrot.lane.b32.xlu2 %v4149_v2, %s5836_s28 }
 0xde6   : > { %4198 = vrot.lane.b32.xlu2 %v4149_v2, %s5837_s15 }
 0xe34   : > { %v4195_v45 = vpop.xlane.xlu0 %4194 }
 0xe39   : > { %v4289_v28 = vpop.xlane.xlu2 %4288 }
 0xe3a   : > { %5592 = vrcp.f32 %v4289_v28 }
 0xe3b   : > { %5594 = vrcp.f32 %v4195_v45 }
 0xe3c   : > { %5596 = vrcp.f32 %v5838_v48 }
 0xe40   : > { %v5593_v10 = vpop.eup %5592 }
 0xe41   : > { %v4291_v16 = vmul.f32 %v5593_v10, %v5591_v9  ;;  %v4293_v12 = vpop.permute.xlu2 %4292  ;;  %v5595_v13 = vpop.eup %5594 }
 0xe42   : > { %4313 = vmatpush.msrb.mxu3 %v4293_v12  ;;  %v4197_v18 = vmul.f32 %v5595_v13, %v5589_v30  ;;  %v5597_v49 = vpop.eup %5596 }
 0xe43   : > { %5203 = vmatmul.msk.f32.vlgmr.msrb.gmra.mxu3 %vm4186_vm4, %v4291_v16  ;;  %v4349_v50 = vmul.f32 32.0, %v5597_v49  ;;  %vm4353_vm5 = vweird.f32 %v5597_v49 }
 0xe45   : > { %v4350_v5 = vsub.f32 1.0, %v4349_v50  ;;  %v5322_v50 = vld [vmem:[%s7029_s22] ss:$0 sm:$0xff] }
 0xe47   : > { %v4351_v20 = vmul.f32 %v5597_v49, %v4350_v5 }
 0xe49   : > { %v4199_v39 = vpop.permute.xlu2 %4198  ;;  %v4352_v17 = vadd.f32 %v5597_v49, %v4351_v20 }
 0xe4a   : > { %4219 = vmatpush.msrb.mxu0 %v4199_v39  ;;  %v4481_v39 = vld [vmem:[#allocation5 + $0x30] sm:$0xff] }
 0xe4b   : > { %5199 = vmatmul.msk.f32.vlgmr.msrb.gmra.mxu0 %vm4186_vm4, %v4197_v18  ;;  %v6908_v32 = vsel %vm4353_vm5, %v5597_v49, %v4352_v17  ;;  %v4482_v18 = vld [vmem:[#allocation5 + $0x38] sm:$0xff] }
 0xe4c   : > { %4335 = vmatpush.msra.mxu0 %v4154_v40  ;;  %4503 = vmatpush.msra.mxu3 %v4482_v18  ;;  %v4480_v40 = vld [vmem:[#allocation5 + $0x28] sm:$0xff]  ;;  %v5323_v17 = vld [vmem:[%s7019_s12 + $0x1] ss:$0 sm:$0xff] }
 0xe4e   : > { %4336 = vmatpush.msra.mxu0 %v4153_v61  ;;  %4504 = vmatpush.msra.mxu3 %v4481_v39  ;;  %v4479_v61 = vld [vmem:[#allocation5 + $0x20] sm:$0xff] }
 0xe50   : > { %4505 = vmatpush.msra.mxu3 %v4480_v40 }
 0xe52   : > { %4506 = vmatpush.msra.mxu3 %v4479_v61 }
 0xec6   : > { %v4315_v4 = vpop.f32.mrf.mxu3 }
 0xec7   : > { %5204 = vmatmul.msk.f32.vlgmr.msra.gmra.mxu0 %vm4159_vm1, %v4315_v4 }
 0xec8   : > { %v4221_v0 = vpop.f32.mrf.mxu0 }
 0xec9   : > { %5200 = vmatmul.msk.f32.vlgmr.msrb.gmra.mxu1 %vm4159_vm1, %v4221_v0 }
 0xf44   : > { %v4338_v35 = vpop.f32.mrf.mxu0 }
 0xf46   : > { %v4244_v33 = vpop.f32.mrf.mxu1 }
 0xf47   : > { %v4250_v19 = vadd.f32 %v5316_v3, %v4244_v33 }
 0xf49   : > { %v4341_v38 = vadd.f32 %v4338_v35, %v4250_v19 }
 0xf4b   : > { %v4342_v46 = vadd.f32 %v4341_v38, %v6872_v43 }
 0xf4d   : > { %v4345_v58 = vsel %vm905_vm0, %v4342_v46, 0.0 }
 0xf4e   : > { %4346 = vadd.xlane.f32.xlu2 %v4345_v58  ;;  %v5321_v58 = vld [vmem:[%s7028_s21] ss:$0 sm:$0xff] }
 0xfc1   : > { %v4347_v11 = vpop.xlane.xlu2 %4346 }
 0xfc2   : > { %v4355_v27 = vmul.f32 %v6908_v32, %v4347_v11 }
 0xfc4   : > { %v4356_v21 = vsub.f32 %v4342_v46, %v4355_v27 }
 0xfc6   : > { %v4357_v22 = vmul.f32 %v4356_v21, %v4356_v21 }
 0xfc8   : > { %v4358_v47 = vsel %vm905_vm0, %v4357_v22, 0.0 }
 0xfc9   : > { %4359 = vadd.xlane.f32.xlu1 %v4358_v47 }
0x103c   : > { %v4360_v43 = vpop.xlane.xlu1 %4359 }
0x103d   : > { %v4361_v52 = vmul.f32 %v4360_v43, %v6908_v32 }
0x103f   : > { %v4362_v53 = vadd.f32 1e-05, %v4361_v52 }
0x1041   : > { %5598 = vrsqrt.f32 %v4362_v53  ;;  %vm4369_vm3 = vweird.f32 %v4362_v53 }
0x1047   : > { %v5599_v2 = vpop.eup %5598 }
0x1048   : > { %v4364_v44 = vmul.f32 %v5599_v2, %v4362_v53  ;;  %vm4370_vm6 = vweird.f32 %v5599_v2 }
0x1049   : > { %vm4371_vm13 = vmor %vm4369_vm3, %vm4370_vm6 }
0x104a   : > { %v4365_v51 = vmul.f32 %v5599_v2, %v4364_v44 }
0x104c   : > { %v4366_v54 = vmul.f32 0.5, %v4365_v51 }
0x104e   : > { %v4367_v55 = vsub.f32 1.5, %v4366_v54 }
0x1050   : > { %v4368_v57 = vmul.f32 %v5599_v2, %v4367_v55 }
0x1052   : > { %v4372_v63 = vsel %vm4371_vm13, %v5599_v2, %v4368_v57 }
0x1053   : > { %v4373_v1 = vmul.f32 %v4372_v63, %v4356_v21 }
0x1055   : > { %v4377_v14 = vmul.f32 %v5317_v59, %v4373_v1 }
0x1057   : > { %v4381_v15 = vadd.f32 %v5318_v6, %v4377_v14  ;;  %v4513_v14 = vld [vmem:[#allocation7 + $0x28] sm:$0xff] }
0x1058   : > { %4601 = vmatpush.msrb.mxu2 %v4513_v14  ;;  %v4841_v14 = vld [vmem:[#allocation11 + $0x10] sm:$0xff] }
0x1059   : > { %5205 = vmatmul.msk.f32.vlgmr.msra.gmra.mxu1 %vm905_vm0, %v4381_v15 }
0x10d6   : > { %v4410_v23 = vpop.f32.mrf.mxu1 }
0x10d7   : > { %v4411_v26 = vadd.f32 %v5319_v34, %v4410_v23 }
0x10d9   : > { %v4413_v30 = vmax.f32 %v4411_v26, 0.0 }
0x10db   : > { %5206 = vmatmul.msk.f32.vlgmr.msra.gmra.mxu2 %vm905_vm0, %v4413_v30  ;;  %v4512_v30 = vld [vmem:[#allocation7 + $0x20] sm:$0xff] }
0x10dc   : > { %4602 = vmatpush.msrb.mxu2 %v4512_v30 }
0x115e   : > { %v4442_v9 = vpop.f32.mrf.mxu2 }
0x115f   : > { %v4443_v7 = vadd.f32 %v5320_v31, %v4442_v9  ;;  %v4515_v31 = vld [vmem:[#allocation7 + $0x38] sm:$0xff]  ;;  %v4514_v9 = vld [vmem:[#allocation7 + $0x30] sm:$0xff] }
0x1161   : > { %v4445_v8 = vadd.f32 %v4443_v7, %v4381_v15 }
0x1163   : > { %v4448_v28 = vsel %vm905_vm0, %v4445_v8, 0.0 }
0x1164   : > { %4449 = vadd.xlane.f32.xlu0 %v4448_v28  ;;  %v5324_v28 = vld [vmem:[%s7021_s14 + $0x1] ss:$0 sm:$0xff] }
0x11d7   : > { %v4450_v45 = vpop.xlane.xlu0 %4449 }
0x11d8   : > { %v4451_v10 = vmul.f32 %v4450_v45, %v6908_v32 }
0x11da   : > { %v4452_v16 = vsub.f32 %v4445_v8, %v4451_v10 }
0x11dc   : > { %v4453_v12 = vmul.f32 %v4452_v16, %v4452_v16 }
0x11de   : > { %v4454_v13 = vsel %vm905_vm0, %v4453_v12, 0.0 }
0x11df   : > { %4455 = vadd.xlane.f32.xlu1 %v4454_v13 }
0x1252   : > { %v4456_v62 = vpop.xlane.xlu1 %4455 }
0x1253   : > { %v4457_v4 = vmul.f32 %v4456_v62, %v6908_v32 }
0x1255   : > { %v4458_v0 = vadd.f32 1e-05, %v4457_v4 }
0x1257   : > { %5600 = vrsqrt.f32 %v4458_v0  ;;  %vm4465_vm15 = vweird.f32 %v4458_v0 }
0x125d   : > { %v5601_v3 = vpop.eup %5600 }
0x125e   : > { %v4460_v33 = vmul.f32 %v5601_v3, %v4458_v0  ;;  %vm4466_vm7 = vweird.f32 %v5601_v3  ;;  %v4741_v0 = vld [vmem:[#allocation8 + $0x38] sm:$0xff] }
0x125f   : > { %vm4467_vm11 = vmor %vm4465_vm15, %vm4466_vm7  ;;  %4762 = vmatpush.msra.mxu2 %v4741_v0 }
0x1260   : > { %v4461_v19 = vmul.f32 %v5601_v3, %v4460_v33  ;;  %v4739_v33 = vld [vmem:[#allocation8 + $0x28] sm:$0xff] }
0x1262   : > { %v4462_v35 = vmul.f32 0.5, %v4461_v19  ;;  %v4738_v19 = vld [vmem:[#allocation8 + $0x20] sm:$0xff] }
0x1264   : > { %v4463_v38 = vsub.f32 1.5, %v4462_v35  ;;  %v4775_v35 = vld [vmem:[#allocation10 + $0x38] sm:$0xff] }
0x1266   : > { %v4464_v46 = vmul.f32 %v5601_v3, %v4463_v38 }
0x1268   : > { %v4468_v48 = vsel %vm4467_vm11, %v5601_v3, %v4464_v46  ;;  %v4740_v3 = vld [vmem:[#allocation8 + $0x30] sm:$0xff] }
0x1269   : > { %v4469_v49 = vmul.f32 %v4468_v48, %v4452_v16  ;;  %4763 = vmatpush.msra.mxu2 %v4740_v3 }
0x126b   : > { %v4473_v5 = vmul.f32 %v5321_v58, %v4469_v49  ;;  %4764 = vmatpush.msra.mxu2 %v4739_v33 }
0x126d   : > { %v6937_v20 = vadd.f32 %v5322_v50, %v4473_v5  ;;  %4765 = vmatpush.msra.mxu2 %v4738_v19 }
0x126f   : > { %5208 = vmatmul.msk.f32.vlgmr.msra.gmra.mxu3 %vm905_vm0, %v6937_v20 }
0x12f2   : > { %v4508_v11 = vpop.f32.mrf.mxu3 }
0x12f3   : > { %v4509_v27 = vadd.f32 %v5323_v17, %v4508_v11  ;;  %v5325_v11 = vld [vmem:[%s7026_s19 + $0x1] ss:$0 sm:$0xff] }
0x12f5   : > { %4613 = vrot.lane.b32.xlu1 %v4509_v27, %s5834_s8  ;;  %4519 = vrot.lane.b32.xlu0 %v4509_v27, %s5833_s7 }
0x12fd   : > { %4611 = vrot.lane.b32.xlu0 %v4509_v27, %s5835_s5 }
0x1367   : > { %v4614_v21 = vpop.permute.xlu1 %4613  ;;  %v4520_v22 = vpop.permute.xlu0 %4519 }
0x1368   : > { %5210 = vmatpush.xpose.msk.msrb.mxu0 %vm4159_vm1, %v4520_v22  ;;  %5214 = vmatpush.xpose.msk.msrb.mxu3 %vm4159_vm1, %v4614_v21  ;;  %v5326_v22 = vld [vmem:[%s7027_s20 + $0x1] ss:$0 sm:$0xff] }
0x136b   : > { %5211 = vmatmul.msk.f32.vlgmr.msrb.gmra.mxu0 %vm4159_vm1, %v4509_v27 }
0x136c   : > { %4796 = vmatpush.msra.mxu3 %v4775_v35 }
0x136f   : > { %v4612_v47 = vpop.permute.xlu0 %4611 }
0x1370   : > { %5215 = vmatmul.msk.f32.vlgmr.msrb.gmra.mxu3 %vm4159_vm1, %v4612_v47 }
0x13e8   : > { %v4542_v24 = vpop.f32.mrf.mxu0 }
0x13e9   : > { %v4545_v36 = vmul.f32 0.25, %v4542_v24 }
0x13eb   : > { %v4546_v37 = vadd.f32 %v4545_v36, %v6889_v56  ;;  %v4774_v36 = vld [vmem:[#allocation10 + $0x30] sm:$0xff] }
0x13ec   : > { %4797 = vmatpush.msra.mxu3 %v4774_v36 }
0x13ed   : > { %v4547_v41 = vsel %vm4186_vm4, %v4546_v37, -inf }
0x13ee   : > { %4548 = vmax.xlane.f32.xlu2 %v4547_v41  ;;  %v4772_v41 = vld [vmem:[#allocation10 + $0x20] sm:$0xff] }
0x13f3   : > { %v4636_v42 = vpop.f32.mrf.mxu3 }
0x13f4   : > { %v4639_v43 = vmul.f32 0.25, %v4636_v42  ;;  %v5327_v42 = vld [vmem:[%s7023_s16 + $0x1] ss:$0 sm:$0xff] }
0x13f6   : > { %v4640_v52 = vadd.f32 %v4639_v43, %v6889_v56 }
0x13f8   : > { %v4641_v53 = vsel %vm4186_vm4, %v4640_v52, -inf }
0x13f9   : > { %4642 = vmax.xlane.f32.xlu1 %v4641_v53 }
0x1406   : > { %4558 = vrot.lane.b32.xlu2 %v4509_v27, %s5837_s15 }
0x1461   : > { %v4549_v2 = vpop.xlane.xlu2 %4548 }
0x1462   : > { %v4550_v44 = vsub.f32 %v4546_v37, %v4549_v2  ;;  %v4773_v37 = vld [vmem:[#allocation10 + $0x28] sm:$0xff]  ;;  %v5328_v2 = vld [vmem:[%s7025_s18 + $0x1] ss:$0 sm:$0xff] }
0x1463   : > { %4798 = vmatpush.msra.mxu3 %v4773_v37 }
0x1464   : > { %v4551_v51 = vmul.f32 1.442695, %v4550_v44 }
0x1465   : > { %4799 = vmatpush.msra.mxu3 %v4772_v41 }
0x1466   : > { %5602 = vpow2.f32 %v4551_v51 }
0x1469   : > { %v4559_v54 = vpop.permute.xlu2 %4558 }
0x146a   : > { %4579 = vmatpush.msrb.mxu1 %v4559_v54 }
0x146c   : > { %v5603_v55 = vpop.eup %5602  ;;  %v4643_v57 = vpop.xlane.xlu1 %4642  ;;  %4695 = vmatpush.msra.mxu1 %v4515_v31 }
0x146d   : > { %v4644_v59 = vsub.f32 %v4640_v52, %v4643_v57  ;;  %v4553_v63 = vsel %vm4186_vm4, %v5603_v55, 0.0 }
0x146e   : > { %4554 = vadd.xlane.f32.xlu0 %v4553_v63  ;;  %4696 = vmatpush.msra.mxu1 %v4514_v9 }
0x146f   : > { %v4645_v1 = vmul.f32 1.442695, %v4644_v59 }
0x1471   : > { %5604 = vpow2.f32 %v4645_v1 }
0x1477   : > { %v5605_v56 = vpop.eup %5604 }
0x1478   : > { %v4647_v6 = vsel %vm4186_vm4, %v5605_v56, 0.0 }
0x1479   : > { %4648 = vadd.xlane.f32.xlu2 %v4647_v6  ;;  %v4842_v6 = vld [vmem:[#allocation11 + $0x18] sm:$0xff] }
0x1491   : > { %4652 = vrot.lane.b32.xlu2 %v4509_v27, %s5836_s28 }
0x14e1   : > { %v4555_v15 = vpop.xlane.xlu0 %4554 }
0x14e2   : > { %5606 = vrcp.f32 %v4555_v15  ;;  %v4840_v15 = vld [vmem:[#allocation11 + $0x8] sm:$0xff] }
0x14e8   : > { %v5607_v60 = vpop.eup %5606 }
0x14e9   : > { %v4557_v25 = vmul.f32 %v5607_v60, %v5603_v55  ;;  %v4839_v60 = vld [vmem:[#allocation11] sm:$0xff] }
0x14eb   : > { %5212 = vmatmul.msk.f32.vlgmr.msrb.gmra.mxu1 %vm4186_vm4, %v4557_v25 }
0x14ec   : > { %v4649_v29 = vpop.xlane.xlu2 %4648 }
0x14ed   : > { %5608 = vrcp.f32 %v4649_v29 }
0x14f3   : > { %v5609_v34 = vpop.eup %5608 }
0x14f4   : > { %v4651_v23 = vmul.f32 %v5609_v34, %v5605_v56  ;;  %v4653_v26 = vpop.permute.xlu2 %4652 }
0x14f5   : > { %4673 = vmatpush.msra.mxu0 %v4653_v26 }
0x14f6   : > { %5216 = vmatmul.msk.f32.vlgmr.msra.gmra.mxu0 %vm4186_vm4, %v4651_v23 }
0x14f7   : > { %4862 = vmatpush.msrb.mxu0 %v4842_v6 }
0x14f9   : > { %4863 = vmatpush.msrb.mxu0 %v4841_v14 }
0x14fb   : > { %4864 = vmatpush.msrb.mxu0 %v4840_v15 }
0x14fd   : > { %4865 = vmatpush.msrb.mxu0 %v4839_v60 }
0x1568   : > { %v4581_v7 = vpop.f32.mrf.mxu1 }
0x1569   : > { %5213 = vmatmul.msk.f32.vlgmr.msrb.gmra.mxu2 %vm4159_vm1, %v4581_v7 }
0x1573   : > { %v4675_v8 = vpop.f32.mrf.mxu0 }
0x1574   : > { %5217 = vmatmul.msk.f32.vlgmr.msra.gmra.mxu1 %vm4159_vm1, %v4675_v8  ;;  %v5329_v8 = vld [vmem:[%s7028_s21 + $0x1] ss:$0 sm:$0xff] }
0x15ec   : > { %v4604_v45 = vpop.f32.mrf.mxu2 }
0x15ed   : > { %v4610_v10 = vadd.f32 %v5324_v28, %v4604_v45 }
0x15f1   : > { %v4698_v16 = vpop.f32.mrf.mxu1 }
0x15f2   : > { %v4701_v12 = vadd.f32 %v4698_v16, %v4610_v10 }
0x15f4   : > { %v4702_v13 = vadd.f32 %v4701_v12, %v6937_v20  ;;  %v5331_v12 = vld [vmem:[%s7031_s24] ss:$0 sm:$0xff] }
0x15f6   : > { %v4707_v18 = vsel %vm905_vm0, %v4702_v13, 0.0 }
0x15f7   : > { %4708 = vadd.xlane.f32.xlu1 %v4707_v18 }
0x166a   : > { %v4709_v39 = vpop.xlane.xlu1 %4708 }
0x166b   : > { %v4710_v40 = vmul.f32 %v4709_v39, %v6908_v32 }
0x166d   : > { %v4711_v61 = vsub.f32 %v4702_v13, %v4710_v40 }
0x166f   : > { %v4712_v62 = vmul.f32 %v4711_v61, %v4711_v61 }
0x1671   : > { %v4713_v4 = vsel %vm905_vm0, %v4712_v62, 0.0 }
0x1672   : > { %4714 = vadd.xlane.f32.xlu0 %v4713_v4 }
0x16e5   : > { %v4715_v38 = vpop.xlane.xlu0 %4714 }
0x16e6   : > { %v4716_v46 = vmul.f32 %v4715_v38, %v6908_v32 }
0x16e8   : > { %v4717_v58 = vadd.f32 1e-05, %v4716_v46 }
0x16ea   : > { %5610 = vrsqrt.f32 %v4717_v58  ;;  %vm4724_vm10 = vweird.f32 %v4717_v58 }
0x16f0   : > { %v5611_v48 = vpop.eup %5610 }
0x16f1   : > { %v4719_v49 = vmul.f32 %v5611_v48, %v4717_v58  ;;  %vm4725_vm12 = vweird.f32 %v5611_v48 }
0x16f2   : > { %vm4726_vm2 = vmor %vm4724_vm10, %vm4725_vm12 }
0x16f3   : > { %v4720_v50 = vmul.f32 %v5611_v48, %v4719_v49 }
0x16f5   : > { %v4721_v5 = vmul.f32 0.5, %v4720_v50 }
0x16f7   : > { %v4722_v20 = vsub.f32 1.5, %v4721_v5 }
0x16f9   : > { %v4723_v17 = vmul.f32 %v5611_v48, %v4722_v20 }
0x16fb   : > { %v4727_v27 = vsel %vm4726_vm2, %v5611_v48, %v4723_v17 }
0x16fc   : > { %v4728_v21 = vmul.f32 %v4727_v27, %v4711_v61 }
0x16fe   : > { %v4732_v47 = vmul.f32 %v5325_v11, %v4728_v21 }
0x1700   : > { %v4736_v24 = vadd.f32 %v5326_v22, %v4732_v47 }
0x1702   : > { %5221 = vmatmul.msk.f32.vlgmr.msra.gmra.mxu2 %vm905_vm0, %v4736_v24 }
0x1785   : > { %v4767_v43 = vpop.f32.mrf.mxu2 }
0x1786   : > { %v4768_v52 = vadd.f32 %v5327_v42, %v4767_v43 }
0x1788   : > { %v4770_v53 = vmax.f32 %v4768_v52, 0.0 }
0x178a   : > { %5223 = vmatmul.msk.f32.vlgmr.msra.gmra.mxu3 %vm905_vm0, %v4770_v53 }
0x180d   : > { %v4801_v44 = vpop.f32.mrf.mxu3 }
0x180e   : > { %v4802_v51 = vadd.f32 %v5328_v2, %v4801_v44 }
0x1810   : > { %v4804_v54 = vadd.f32 %v4802_v51, %v4736_v24 }
0x1812   : > { %v4809_v55 = vsel %vm905_vm0, %v4804_v54, 0.0 }
0x1813   : > { %4810 = vadd.xlane.f32.xlu2 %v4809_v55 }
0x1886   : > { %v4811_v57 = vpop.xlane.xlu2 %4810 }
0x1887   : > { %v4812_v59 = vmul.f32 %v4811_v57, %v6908_v32 }
0x1889   : > { %v4813_v63 = vsub.f32 %v4804_v54, %v4812_v59 }
0x188b   : > { %v4814_v1 = vmul.f32 %v4813_v63, %v4813_v63 }
0x188d   : > { %v4815_v56 = vsel %vm905_vm0, %v4814_v1, 0.0 }
0x188e   : > { %4816 = vadd.xlane.f32.xlu1 %v4815_v56 }
0x1901   : > { %v4817_v25 = vpop.xlane.xlu1 %4816 }
0x1902   : > { %v4818_v29 = vmul.f32 %v4817_v25, %v6908_v32  ;;  %v5330_v32 = vld [vmem:[%s7029_s22 + $0x1] ss:$0 sm:$0xff] }
0x1904   : > { %v4819_v34 = vadd.f32 1e-05, %v4818_v29 }
0x1906   : > { %5612 = vrsqrt.f32 %v4819_v34  ;;  %vm4826_vm9 = vweird.f32 %v4819_v34 }
0x190c   : > { %v5613_v23 = vpop.eup %5612 }
0x190d   : > { %v4821_v26 = vmul.f32 %v5613_v23, %v4819_v34  ;;  %vm4827_vm8 = vweird.f32 %v5613_v23 }
0x190e   : > { %vm4828_vm14 = vmor %vm4826_vm9, %vm4827_vm8 }
0x190f   : > { %v4822_v30 = vmul.f32 %v5613_v23, %v4821_v26 }
0x1911   : > { %v4823_v31 = vmul.f32 0.5, %v4822_v30 }
0x1913   : > { %v4824_v9 = vsub.f32 1.5, %v4823_v31 }
0x1915   : > { %v4825_v7 = vmul.f32 %v5613_v23, %v4824_v9 }
0x1917   : > { %v4829_v28 = vsel %vm4828_vm14, %v5613_v23, %v4825_v7 }
0x1918   : > { %v4830_v45 = vmul.f32 %v4829_v28, %v4813_v63 }
0x191a   : > { %v4834_v10 = vmul.f32 %v5329_v8, %v4830_v45 }
0x191c   : > { %v4838_v16 = vadd.f32 %v5330_v32, %v4834_v10 }
0x191e   : > { %5226 = vmatmul.msk.f32.vlgmr.msrb.gmra.mxu0 %vm905_vm0, %v4838_v16 }
0x199b   : > { %v4867_v13 = vpop.f32.mrf.mxu0 }
0x199c   : > { %v4868_v18 = vadd.f32 %v5331_v12, %v4867_v13 }
0x199e   : > { %4870 = vmax.xlane.f32.xlu0 %v4868_v18 }
0x1a11   : > { %v4871_v39 = vpop.xlane.xlu0 %4870 }
0x1a12   : > { %v4872_v40 = vsub.f32 %v4868_v18, %v4871_v39 }
0x1a14   : > { %v4873_v61 = vmul.f32 1.442695, %v4872_v40 }
0x1a16   : > { %5614 = vpow2.f32 %v4873_v61 }
0x1a1c   : > { %v5615_v62 = vpop.eup %5614 }
0x1a1d   : > { %4875 = vadd.xlane.f32.xlu1 %v5615_v62 }
0x1a90   : > { %v4876_v4 = vpop.xlane.xlu1 %4875 }
0x1a91   : > { %5616 = vlog2.f32 %v4876_v4 }
0x1a97   : > { %v5617_v0 = vpop.eup %5616 }
0x1a98   : > { %v4878_v3 = vmul.f32 0.6931472, %v5617_v0 }
0x1a9a   : > { %v4879_v33 = vsub.f32 %v4872_v40, %v4878_v3 }
0x1a9c   : > { %4880 = vst [vmem:[%s893_s29] sm:$0xff] %v4879_v33 }
0x1a9d PF: > { %s7071_s25 = sld [smem:[#allocation17_spill]] }
0x1aa3   : > { %s39_s29 = sadd.s32 1, %s7071_s25  }
0x1aa4   : > { %p36_p7 = scmp.ge.s32.totalorder %s39_s29, 4  }
0x1aa6   :  { %38 = sbr.rel (!%p36_p7) target bundleno = 18 (0x12), region = 214 }
0x1aab   :  { %4900 = vsyncpa [#allocation4], 1 }
0x1aac   :  { %4902 = vsyncpa [#allocation4 + $0x1], 1 }
0x1aad   :  { %4903 = vsyncpa [#allocation6], 1 }
0x1aae   :  { %4904 = vsyncpa [#allocation9], 1 }
0x1aaf   :  { %4905 = vsyncpa [#allocation12], 1 }

</bundles_post_ra>
